<compile_context>
chip_gen: v7x
topology: tpu7x:2x2x1
jax: 0.10.0
libtpu: 0.0.40
codegen_flags: <defaults>
</compile_context>

<pallas_src>
import math

import jax
import jax.numpy as jnp
from jax.experimental import pallas as pl
from jax.experimental.pallas import tpu as pltpu


def _gru_cell(x, h, wih_ref, whh_ref, b_ref):
    """One PyTorch GRU cell step.

    wih_ref: (3, in, H) gate-major [r, z, n], already transposed for x @ W.
    whh_ref: (3, H, H)
    b_ref:   (4, 1, H) rows = [b_r, b_z, b_in, b_hn], with
             b_r = b_ir + b_hr and b_z = b_iz + b_hz pre-fused in the wrapper.
    """
    f32 = jnp.float32
    r = jax.nn.sigmoid(jnp.dot(x, wih_ref[0], preferred_element_type=f32)
                       + jnp.dot(h, whh_ref[0], preferred_element_type=f32)
                       + b_ref[0])
    z = jax.nn.sigmoid(jnp.dot(x, wih_ref[1], preferred_element_type=f32)
                       + jnp.dot(h, whh_ref[1], preferred_element_type=f32)
                       + b_ref[1])
    n = jnp.tanh(jnp.dot(x, wih_ref[2], preferred_element_type=f32)
                 + b_ref[2]
                 + r * (jnp.dot(h, whh_ref[2], preferred_element_type=f32)
                        + b_ref[3]))
    return (1.0 - z) * n + z * h


def _gru_kernel(x_ref, h0_ref,
                wih0_ref, whh0_ref, b0_ref,
                wih1_ref, whh1_ref, b1_ref,
                out_ref):
    """Whole sequence in one invocation.

    x_ref:   (B, T, D)  native batch_first input, resident in VMEM
    h0_ref:  (2, B, H)  initial hidden states (layer 0, layer 1)
    out_ref: (B, T, H)  layer-1 outputs for every time step
    """
    T = x_ref.shape[1]
    h1 = h0_ref[0]                 # (B, H) layer-0 hidden state
    h2 = h0_ref[1]                 # (B, H) layer-1 hidden state
    for t in range(T):             # static unroll: T is small and trace-time known
        x_t = x_ref[:, t, :]       # (B, D)
        h1 = _gru_cell(x_t, h1, wih0_ref, whh0_ref, b0_ref)
        h2 = _gru_cell(h1, h2, wih1_ref, whh1_ref, b1_ref)
        out_ref[:, t, :] = h2


def gru_forward_pallas(x_btd, h0, kparams):
    """x_btd: (B, T, D) batch_first input; h0: (2, B, H); returns (B, T, H)."""
    B, T, D = x_btd.shape
    H = h0.shape[-1]
    wih0, whh0, b0, wih1, whh1, b1 = kparams

    vmem = pl.BlockSpec(memory_space=pltpu.MemorySpace.VMEM)
    # TODO(synk): for larger batches on v7x, add a leading "parallel" batch grid
    # axis so both TensorCores split the (inherently sequential-in-T) work.
    return pl.pallas_call(
        _gru_kernel,
        out_shape=jax.ShapeDtypeStruct((B, T, H), jnp.float32),
        in_specs=[vmem] * 8,
        out_specs=vmem,
    )(x_btd, h0, wih0, whh0, b0, wih1, whh1, b1)


def init_gru_params(key, input_dim, hidden_dim):
    """Per-gate params, U(-1/sqrt(H), 1/sqrt(H)) like nn.GRU's default init.

    Raw layout (used by the pure-JAX reference and then packed for the kernel):
      w_ih_l{0,1}: (3, in, H)  gate order [r, z, n], transposed for x @ W
      w_hh_l{0,1}: (3, H, H)
      b_ih / b_hh: (3, H)
    """
    k = 1.0 / math.sqrt(hidden_dim)
    ks = jax.random.split(key, 8)
    u = lambda kk, shape: jax.random.uniform(kk, shape, jnp.float32, -k, k)
    return dict(
        w_ih0=u(ks[0], (3, input_dim, hidden_dim)),
        w_hh0=u(ks[1], (3, hidden_dim, hidden_dim)),
        b_ih0=u(ks[2], (3, hidden_dim)),
        b_hh0=u(ks[3], (3, hidden_dim)),
        w_ih1=u(ks[4], (3, hidden_dim, hidden_dim)),
        w_hh1=u(ks[5], (3, hidden_dim, hidden_dim)),
        b_ih1=u(ks[6], (3, hidden_dim)),
        b_hh1=u(ks[7], (3, hidden_dim)),
    )


def pack_kernel_params(raw):
    """Fuse r/z biases and stack [b_r, b_z, b_in, b_hn] as (4, 1, H) per layer."""
    def biases(b_ih, b_hh):
        return jnp.stack([b_ih[0] + b_hh[0],   # fused r bias
                          b_ih[1] + b_hh[1],   # fused z bias
                          b_ih[2],             # b_in
                          b_hh[2]],            # b_hn (stays inside r * (...))
                         axis=0)[:, None, :]
    b0 = biases(raw["b_ih0"], raw["b_hh0"])
    b1 = biases(raw["b_ih1"], raw["b_hh1"])
    return (raw["w_ih0"], raw["w_hh0"], b0,
            raw["w_ih1"], raw["w_hh1"], b1)


def xavier_uniform_hidden(key, num_layers, batch, hidden_dim, gain=1.0):
    """nn.init.xavier_uniform_ on a (num_layers, B, H) tensor (torch's 3-D fan
    rule: fan_in = size(1)*rf, fan_out = size(0)*rf, rf = prod(dims[2:]))."""
    rf = hidden_dim
    fan_in = batch * rf
    fan_out = num_layers * rf
    bound = gain * math.sqrt(6.0 / (fan_in + fan_out))
    return jax.random.uniform(key, (num_layers, batch, hidden_dim),
                              jnp.float32, -bound, bound)


def gru_forward_ref(x_btd, h0, raw):
    """Pure-JAX reference using the standard PyTorch GRU equations (validates
    the gate-major / fused-bias packing used by the kernel)."""
    def cell(x, h, w_ih, w_hh, b_ih, b_hh):
        r = jax.nn.sigmoid(x @ w_ih[0] + b_ih[0] + h @ w_hh[0] + b_hh[0])
        z = jax.nn.sigmoid(x @ w_ih[1] + b_ih[1] + h @ w_hh[1] + b_hh[1])
        n = jnp.tanh(x @ w_ih[2] + b_ih[2] + r * (h @ w_hh[2] + b_hh[2]))
        return (1.0 - z) * n + z * h

    def step(carry, x_t):
        h1, h2 = carry
        h1n = cell(x_t, h1, raw["w_ih0"], raw["w_hh0"], raw["b_ih0"], raw["b_hh0"])
        h2n = cell(h1n, h2, raw["w_ih1"], raw["w_hh1"], raw["b_ih1"], raw["b_hh1"])
        return (h1n, h2n), h2n

    x_tbd = jnp.transpose(x_btd, (1, 0, 2))
    _, out_tbh = jax.lax.scan(step, (h0[0], h0[1]), x_tbd)
    return jnp.transpose(out_tbh, (1, 0, 2))


if __name__ == "__main__":
    # Matches RNN(input_shape=32, hidden_dim=32); obs of shape (B, T, input_shape)
    B, T, D, H = 8, 8, 32, 32
    key = jax.random.PRNGKey(0)
    k_x, k_h, k_p = jax.random.split(key, 3)

    obs = jax.random.normal(k_x, (B, T, D), jnp.float32)
    # obs.reshape(B, T, input_shape) in the torch module is an identity here.
    h0 = xavier_uniform_hidden(k_h, num_layers=2, batch=B, hidden_dim=H, gain=1.0)
    raw = init_gru_params(k_p, D, H)
    kparams = pack_kernel_params(raw)

    out = jax.jit(gru_forward_pallas)(obs, h0, kparams)
    out = jax.block_until_ready(out)

    ref = jax.block_until_ready(gru_forward_ref(obs, h0, raw))
    assert out.shape == (B, T, H)
    # Tolerance absorbs f32 reassociation (fused biases, per-gate matmuls) between
    # the Mosaic kernel and the XLA reference.
    assert jnp.allclose(out, ref, atol=1e-4, rtol=1e-4), "mismatch vs JAX reference"

    print("KERNEL_OK")
</pallas_src>

<mosaic_0001>
module attributes {stable_mosaic.version = 11 : i64} {
  func.func @_gru_kernel(%arg0: memref<8x8x32xf32, #tpu.memory_space<vmem>>, %arg1: memref<2x8x32xf32, #tpu.memory_space<vmem>>, %arg2: memref<3x32x32xf32, #tpu.memory_space<vmem>>, %arg3: memref<3x32x32xf32, #tpu.memory_space<vmem>>, %arg4: memref<4x1x32xf32, #tpu.memory_space<vmem>>, %arg5: memref<3x32x32xf32, #tpu.memory_space<vmem>>, %arg6: memref<3x32x32xf32, #tpu.memory_space<vmem>>, %arg7: memref<4x1x32xf32, #tpu.memory_space<vmem>>, %arg8: memref<8x8x32xf32, #tpu.memory_space<vmem>>) attributes {dimension_semantics = [], scalar_prefetch = 0 : i64, scratch_operands = 0 : i64, tpu.core_type = #tpu.core_type<tc>} {
    %c0 = arith.constant 0 : index
    %c0_0 = arith.constant 0 : index
    %c0_1 = arith.constant 0 : index
    %0 = vector.load %arg1[%c0, %c0_0, %c0_1] : memref<2x8x32xf32, #tpu.memory_space<vmem>>, vector<1x8x32xf32>
    %1 = vector.shape_cast %0 : vector<1x8x32xf32> to vector<8x32xf32>
    %c1 = arith.constant 1 : index
    %c0_2 = arith.constant 0 : index
    %c0_3 = arith.constant 0 : index
    %2 = vector.load %arg1[%c1, %c0_2, %c0_3] : memref<2x8x32xf32, #tpu.memory_space<vmem>>, vector<1x8x32xf32>
    %3 = vector.shape_cast %2 : vector<1x8x32xf32> to vector<8x32xf32>
    %c0_4 = arith.constant 0 : index
    %c0_5 = arith.constant 0 : index
    %c0_6 = arith.constant 0 : index
    %4 = vector.load %arg0[%c0_4, %c0_5, %c0_6] : memref<8x8x32xf32, #tpu.memory_space<vmem>>, vector<8x1x32xf32>
    %5 = vector.shape_cast %4 : vector<8x1x32xf32> to vector<8x32xf32>
    %c0_7 = arith.constant 0 : index
    %c0_8 = arith.constant 0 : index
    %c0_9 = arith.constant 0 : index
    %6 = vector.load %arg2[%c0_7, %c0_8, %c0_9] : memref<3x32x32xf32, #tpu.memory_space<vmem>>, vector<1x32x32xf32>
    %7 = vector.shape_cast %6 : vector<1x32x32xf32> to vector<32x32xf32>
    %cst = arith.constant dense<0.000000e+00> : vector<8x32xf32>
    %8 = tpu.matmul %5, %7, %cst {dimension_numbers = #tpu.dot_dimension_numbers<[1], [0], [0], [1], [0, 0, 1, 1], [], []>} : vector<8x32xf32>, vector<32x32xf32>, vector<8x32xf32> -> vector<8x32xf32>
    %c0_10 = arith.constant 0 : index
    %c0_11 = arith.constant 0 : index
    %c0_12 = arith.constant 0 : index
    %9 = vector.load %arg3[%c0_10, %c0_11, %c0_12] : memref<3x32x32xf32, #tpu.memory_space<vmem>>, vector<1x32x32xf32>
    %10 = vector.shape_cast %9 : vector<1x32x32xf32> to vector<32x32xf32>
    %cst_13 = arith.constant dense<0.000000e+00> : vector<8x32xf32>
    %11 = tpu.matmul %1, %10, %cst_13 {dimension_numbers = #tpu.dot_dimension_numbers<[1], [0], [0], [1], [0, 0, 1, 1], [], []>} : vector<8x32xf32>, vector<32x32xf32>, vector<8x32xf32> -> vector<8x32xf32>
    %12 = arith.addf %8, %11 : vector<8x32xf32>
    %c0_14 = arith.constant 0 : index
    %c0_15 = arith.constant 0 : index
    %c0_16 = arith.constant 0 : index
    %13 = vector.load %arg4[%c0_14, %c0_15, %c0_16] : memref<4x1x32xf32, #tpu.memory_space<vmem>>, vector<1x1x32xf32>
    %14 = vector.shape_cast %13 : vector<1x1x32xf32> to vector<1x32xf32>
    %15 = vector.broadcast %14 : vector<1x32xf32> to vector<8x32xf32>
    %16 = arith.addf %12, %15 : vector<8x32xf32>
    %17 = arith.negf %16 : vector<8x32xf32>
    %18 = math.exp %17 : vector<8x32xf32>
    %cst_17 = arith.constant 1.000000e+00 : f32
    %19 = vector.broadcast %cst_17 : f32 to vector<8x32xf32>
    %20 = arith.addf %19, %18 : vector<8x32xf32>
    %21 = arith.divf %19, %20 : vector<8x32xf32>
    %c1_18 = arith.constant 1 : index
    %c0_19 = arith.constant 0 : index
    %c0_20 = arith.constant 0 : index
    %22 = vector.load %arg2[%c1_18, %c0_19, %c0_20] : memref<3x32x32xf32, #tpu.memory_space<vmem>>, vector<1x32x32xf32>
    %23 = vector.shape_cast %22 : vector<1x32x32xf32> to vector<32x32xf32>
    %cst_21 = arith.constant dense<0.000000e+00> : vector<8x32xf32>
    %24 = tpu.matmul %5, %23, %cst_21 {dimension_numbers = #tpu.dot_dimension_numbers<[1], [0], [0], [1], [0, 0, 1, 1], [], []>} : vector<8x32xf32>, vector<32x32xf32>, vector<8x32xf32> -> vector<8x32xf32>
    %c1_22 = arith.constant 1 : index
    %c0_23 = arith.constant 0 : index
    %c0_24 = arith.constant 0 : index
    %25 = vector.load %arg3[%c1_22, %c0_23, %c0_24] : memref<3x32x32xf32, #tpu.memory_space<vmem>>, vector<1x32x32xf32>
    %26 = vector.shape_cast %25 : vector<1x32x32xf32> to vector<32x32xf32>
    %cst_25 = arith.constant dense<0.000000e+00> : vector<8x32xf32>
    %27 = tpu.matmul %1, %26, %cst_25 {dimension_numbers = #tpu.dot_dimension_numbers<[1], [0], [0], [1], [0, 0, 1, 1], [], []>} : vector<8x32xf32>, vector<32x32xf32>, vector<8x32xf32> -> vector<8x32xf32>
    %28 = arith.addf %24, %27 : vector<8x32xf32>
    %c1_26 = arith.constant 1 : index
    %c0_27 = arith.constant 0 : index
    %c0_28 = arith.constant 0 : index
    %29 = vector.load %arg4[%c1_26, %c0_27, %c0_28] : memref<4x1x32xf32, #tpu.memory_space<vmem>>, vector<1x1x32xf32>
    %30 = vector.shape_cast %29 : vector<1x1x32xf32> to vector<1x32xf32>
    %31 = vector.broadcast %30 : vector<1x32xf32> to vector<8x32xf32>
    %32 = arith.addf %28, %31 : vector<8x32xf32>
    %33 = arith.negf %32 : vector<8x32xf32>
    %34 = math.exp %33 : vector<8x32xf32>
    %cst_29 = arith.constant 1.000000e+00 : f32
    %35 = vector.broadcast %cst_29 : f32 to vector<8x32xf32>
    %36 = arith.addf %35, %34 : vector<8x32xf32>
    %37 = arith.divf %35, %36 : vector<8x32xf32>
    %c2 = arith.constant 2 : index
    %c0_30 = arith.constant 0 : index
    %c0_31 = arith.constant 0 : index
    %38 = vector.load %arg2[%c2, %c0_30, %c0_31] : memref<3x32x32xf32, #tpu.memory_space<vmem>>, vector<1x32x32xf32>
    %39 = vector.shape_cast %38 : vector<1x32x32xf32> to vector<32x32xf32>
    %cst_32 = arith.constant dense<0.000000e+00> : vector<8x32xf32>
    %40 = tpu.matmul %5, %39, %cst_32 {dimension_numbers = #tpu.dot_dimension_numbers<[1], [0], [0], [1], [0, 0, 1, 1], [], []>} : vector<8x32xf32>, vector<32x32xf32>, vector<8x32xf32> -> vector<8x32xf32>
    %c2_33 = arith.constant 2 : index
    %c0_34 = arith.constant 0 : index
    %c0_35 = arith.constant 0 : index
    %41 = vector.load %arg4[%c2_33, %c0_34, %c0_35] : memref<4x1x32xf32, #tpu.memory_space<vmem>>, vector<1x1x32xf32>
    %42 = vector.shape_cast %41 : vector<1x1x32xf32> to vector<1x32xf32>
    %43 = vector.broadcast %42 : vector<1x32xf32> to vector<8x32xf32>
    %44 = arith.addf %40, %43 : vector<8x32xf32>
    %c2_36 = arith.constant 2 : index
    %c0_37 = arith.constant 0 : index
    %c0_38 = arith.constant 0 : index
    %45 = vector.load %arg3[%c2_36, %c0_37, %c0_38] : memref<3x32x32xf32, #tpu.memory_space<vmem>>, vector<1x32x32xf32>
    %46 = vector.shape_cast %45 : vector<1x32x32xf32> to vector<32x32xf32>
    %cst_39 = arith.constant dense<0.000000e+00> : vector<8x32xf32>
    %47 = tpu.matmul %1, %46, %cst_39 {dimension_numbers = #tpu.dot_dimension_numbers<[1], [0], [0], [1], [0, 0, 1, 1], [], []>} : vector<8x32xf32>, vector<32x32xf32>, vector<8x32xf32> -> vector<8x32xf32>
    %c3 = arith.constant 3 : index
    %c0_40 = arith.constant 0 : index
    %c0_41 = arith.constant 0 : index
    %48 = vector.load %arg4[%c3, %c0_40, %c0_41] : memref<4x1x32xf32, #tpu.memory_space<vmem>>, vector<1x1x32xf32>
    %49 = vector.shape_cast %48 : vector<1x1x32xf32> to vector<1x32xf32>
    %50 = vector.broadcast %49 : vector<1x32xf32> to vector<8x32xf32>
    %51 = arith.addf %47, %50 : vector<8x32xf32>
    %52 = arith.mulf %21, %51 : vector<8x32xf32>
    %53 = arith.addf %44, %52 : vector<8x32xf32>
    %54 = math.tanh %53 : vector<8x32xf32>
    %cst_42 = arith.constant 1.000000e+00 : f32
    %55 = vector.broadcast %cst_42 : f32 to vector<8x32xf32>
    %56 = arith.subf %55, %37 : vector<8x32xf32>
    %57 = arith.mulf %56, %54 : vector<8x32xf32>
    %58 = arith.mulf %37, %1 : vector<8x32xf32>
    %59 = arith.addf %57, %58 : vector<8x32xf32>
    %c0_43 = arith.constant 0 : index
    %c0_44 = arith.constant 0 : index
    %c0_45 = arith.constant 0 : index
    %60 = vector.load %arg5[%c0_43, %c0_44, %c0_45] : memref<3x32x32xf32, #tpu.memory_space<vmem>>, vector<1x32x32xf32>
    %61 = vector.shape_cast %60 : vector<1x32x32xf32> to vector<32x32xf32>
    %cst_46 = arith.constant dense<0.000000e+00> : vector<8x32xf32>
    %62 = tpu.matmul %59, %61, %cst_46 {dimension_numbers = #tpu.dot_dimension_numbers<[1], [0], [0], [1], [0, 0, 1, 1], [], []>} : vector<8x32xf32>, vector<32x32xf32>, vector<8x32xf32> -> vector<8x32xf32>
    %c0_47 = arith.constant 0 : index
    %c0_48 = arith.constant 0 : index
    %c0_49 = arith.constant 0 : index
    %63 = vector.load %arg6[%c0_47, %c0_48, %c0_49] : memref<3x32x32xf32, #tpu.memory_space<vmem>>, vector<1x32x32xf32>
    %64 = vector.shape_cast %63 : vector<1x32x32xf32> to vector<32x32xf32>
    %cst_50 = arith.constant dense<0.000000e+00> : vector<8x32xf32>
    %65 = tpu.matmul %3, %64, %cst_50 {dimension_numbers = #tpu.dot_dimension_numbers<[1], [0], [0], [1], [0, 0, 1, 1], [], []>} : vector<8x32xf32>, vector<32x32xf32>, vector<8x32xf32> -> vector<8x32xf32>
    %66 = arith.addf %62, %65 : vector<8x32xf32>
    %c0_51 = arith.constant 0 : index
    %c0_52 = arith.constant 0 : index
    %c0_53 = arith.constant 0 : index
    %67 = vector.load %arg7[%c0_51, %c0_52, %c0_53] : memref<4x1x32xf32, #tpu.memory_space<vmem>>, vector<1x1x32xf32>
    %68 = vector.shape_cast %67 : vector<1x1x32xf32> to vector<1x32xf32>
    %69 = vector.broadcast %68 : vector<1x32xf32> to vector<8x32xf32>
    %70 = arith.addf %66, %69 : vector<8x32xf32>
    %71 = arith.negf %70 : vector<8x32xf32>
    %72 = math.exp %71 : vector<8x32xf32>
    %cst_54 = arith.constant 1.000000e+00 : f32
    %73 = vector.broadcast %cst_54 : f32 to vector<8x32xf32>
    %74 = arith.addf %73, %72 : vector<8x32xf32>
    %75 = arith.divf %73, %74 : vector<8x32xf32>
    %c1_55 = arith.constant 1 : index
    %c0_56 = arith.constant 0 : index
    %c0_57 = arith.constant 0 : index
    %76 = vector.load %arg5[%c1_55, %c0_56, %c0_57] : memref<3x32x32xf32, #tpu.memory_space<vmem>>, vector<1x32x32xf32>
    %77 = vector.shape_cast %76 : vector<1x32x32xf32> to vector<32x32xf32>
    %cst_58 = arith.constant dense<0.000000e+00> : vector<8x32xf32>
    %78 = tpu.matmul %59, %77, %cst_58 {dimension_numbers = #tpu.dot_dimension_numbers<[1], [0], [0], [1], [0, 0, 1, 1], [], []>} : vector<8x32xf32>, vector<32x32xf32>, vector<8x32xf32> -> vector<8x32xf32>
    %c1_59 = arith.constant 1 : index
    %c0_60 = arith.constant 0 : index
    %c0_61 = arith.constant 0 : index
    %79 = vector.load %arg6[%c1_59, %c0_60, %c0_61] : memref<3x32x32xf32, #tpu.memory_space<vmem>>, vector<1x32x32xf32>
    %80 = vector.shape_cast %79 : vector<1x32x32xf32> to vector<32x32xf32>
    %cst_62 = arith.constant dense<0.000000e+00> : vector<8x32xf32>
    %81 = tpu.matmul %3, %80, %cst_62 {dimension_numbers = #tpu.dot_dimension_numbers<[1], [0], [0], [1], [0, 0, 1, 1], [], []>} : vector<8x32xf32>, vector<32x32xf32>, vector<8x32xf32> -> vector<8x32xf32>
    %82 = arith.addf %78, %81 : vector<8x32xf32>
    %c1_63 = arith.constant 1 : index
    %c0_64 = arith.constant 0 : index
    %c0_65 = arith.constant 0 : index
    %83 = vector.load %arg7[%c1_63, %c0_64, %c0_65] : memref<4x1x32xf32, #tpu.memory_space<vmem>>, vector<1x1x32xf32>
    %84 = vector.shape_cast %83 : vector<1x1x32xf32> to vector<1x32xf32>
    %85 = vector.broadcast %84 : vector<1x32xf32> to vector<8x32xf32>
    %86 = arith.addf %82, %85 : vector<8x32xf32>
    %87 = arith.negf %86 : vector<8x32xf32>
    %88 = math.exp %87 : vector<8x32xf32>
    %cst_66 = arith.constant 1.000000e+00 : f32
    %89 = vector.broadcast %cst_66 : f32 to vector<8x32xf32>
    %90 = arith.addf %89, %88 : vector<8x32xf32>
    %91 = arith.divf %89, %90 : vector<8x32xf32>
    %c2_67 = arith.constant 2 : index
    %c0_68 = arith.constant 0 : index
    %c0_69 = arith.constant 0 : index
    %92 = vector.load %arg5[%c2_67, %c0_68, %c0_69] : memref<3x32x32xf32, #tpu.memory_space<vmem>>, vector<1x32x32xf32>
    %93 = vector.shape_cast %92 : vector<1x32x32xf32> to vector<32x32xf32>
    %cst_70 = arith.constant dense<0.000000e+00> : vector<8x32xf32>
    %94 = tpu.matmul %59, %93, %cst_70 {dimension_numbers = #tpu.dot_dimension_numbers<[1], [0], [0], [1], [0, 0, 1, 1], [], []>} : vector<8x32xf32>, vector<32x32xf32>, vector<8x32xf32> -> vector<8x32xf32>
    %c2_71 = arith.constant 2 : index
    %c0_72 = arith.constant 0 : index
    %c0_73 = arith.constant 0 : index
    %95 = vector.load %arg7[%c2_71, %c0_72, %c0_73] : memref<4x1x32xf32, #tpu.memory_space<vmem>>, vector<1x1x32xf32>
    %96 = vector.shape_cast %95 : vector<1x1x32xf32> to vector<1x32xf32>
    %97 = vector.broadcast %96 : vector<1x32xf32> to vector<8x32xf32>
    %98 = arith.addf %94, %97 : vector<8x32xf32>
    %c2_74 = arith.constant 2 : index
    %c0_75 = arith.constant 0 : index
    %c0_76 = arith.constant 0 : index
    %99 = vector.load %arg6[%c2_74, %c0_75, %c0_76] : memref<3x32x32xf32, #tpu.memory_space<vmem>>, vector<1x32x32xf32>
    %100 = vector.shape_cast %99 : vector<1x32x32xf32> to vector<32x32xf32>
    %cst_77 = arith.constant dense<0.000000e+00> : vector<8x32xf32>
    %101 = tpu.matmul %3, %100, %cst_77 {dimension_numbers = #tpu.dot_dimension_numbers<[1], [0], [0], [1], [0, 0, 1, 1], [], []>} : vector<8x32xf32>, vector<32x32xf32>, vector<8x32xf32> -> vector<8x32xf32>
    %c3_78 = arith.constant 3 : index
    %c0_79 = arith.constant 0 : index
    %c0_80 = arith.constant 0 : index
    %102 = vector.load %arg7[%c3_78, %c0_79, %c0_80] : memref<4x1x32xf32, #tpu.memory_space<vmem>>, vector<1x1x32xf32>
    %103 = vector.shape_cast %102 : vector<1x1x32xf32> to vector<1x32xf32>
    %104 = vector.broadcast %103 : vector<1x32xf32> to vector<8x32xf32>
    %105 = arith.addf %101, %104 : vector<8x32xf32>
    %106 = arith.mulf %75, %105 : vector<8x32xf32>
    %107 = arith.addf %98, %106 : vector<8x32xf32>
    %108 = math.tanh %107 : vector<8x32xf32>
    %cst_81 = arith.constant 1.000000e+00 : f32
    %109 = vector.broadcast %cst_81 : f32 to vector<8x32xf32>
    %110 = arith.subf %109, %91 : vector<8x32xf32>
    %111 = arith.mulf %110, %108 : vector<8x32xf32>
    %112 = arith.mulf %91, %3 : vector<8x32xf32>
    %113 = arith.addf %111, %112 : vector<8x32xf32>
    %c0_82 = arith.constant 0 : index
    %c0_83 = arith.constant 0 : index
    %c0_84 = arith.constant 0 : index
    %114 = vector.load %arg8[%c0_82, %c0_83, %c0_84] : memref<8x8x32xf32, #tpu.memory_space<vmem>>, vector<8x1x32xf32>
    %115 = vector.shape_cast %114 : vector<8x1x32xf32> to vector<8x32xf32>
    %116 = vector.shape_cast %113 : vector<8x32xf32> to vector<8x1x32xf32>
    tpu.vector_store %arg8[%c0_82, %c0_83, %c0_84], %116 {strides = array<i32>} : memref<8x8x32xf32, #tpu.memory_space<vmem>>, vector<8x1x32xf32>,
    %c0_85 = arith.constant 0 : index
    %c1_86 = arith.constant 1 : index
    %c0_87 = arith.constant 0 : index
    %117 = vector.load %arg0[%c0_85, %c1_86, %c0_87] : memref<8x8x32xf32, #tpu.memory_space<vmem>>, vector<8x1x32xf32>
    %118 = vector.shape_cast %117 : vector<8x1x32xf32> to vector<8x32xf32>
    %c0_88 = arith.constant 0 : index
    %c0_89 = arith.constant 0 : index
    %c0_90 = arith.constant 0 : index
    %119 = vector.load %arg2[%c0_88, %c0_89, %c0_90] : memref<3x32x32xf32, #tpu.memory_space<vmem>>, vector<1x32x32xf32>
    %120 = vector.shape_cast %119 : vector<1x32x32xf32> to vector<32x32xf32>
    %cst_91 = arith.constant dense<0.000000e+00> : vector<8x32xf32>
    %121 = tpu.matmul %118, %120, %cst_91 {dimension_numbers = #tpu.dot_dimension_numbers<[1], [0], [0], [1], [0, 0, 1, 1], [], []>} : vector<8x32xf32>, vector<32x32xf32>, vector<8x32xf32> -> vector<8x32xf32>
    %c0_92 = arith.constant 0 : index
    %c0_93 = arith.constant 0 : index
    %c0_94 = arith.constant 0 : index
    %122 = vector.load %arg3[%c0_92, %c0_93, %c0_94] : memref<3x32x32xf32, #tpu.memory_space<vmem>>, vector<1x32x32xf32>
    %123 = vector.shape_cast %122 : vector<1x32x32xf32> to vector<32x32xf32>
    %cst_95 = arith.constant dense<0.000000e+00> : vector<8x32xf32>
    %124 = tpu.matmul %59, %123, %cst_95 {dimension_numbers = #tpu.dot_dimension_numbers<[1], [0], [0], [1], [0, 0, 1, 1], [], []>} : vector<8x32xf32>, vector<32x32xf32>, vector<8x32xf32> -> vector<8x32xf32>
    %125 = arith.addf %121, %124 : vector<8x32xf32>
    %c0_96 = arith.constant 0 : index
    %c0_97 = arith.constant 0 : index
    %c0_98 = arith.constant 0 : index
    %126 = vector.load %arg4[%c0_96, %c0_97, %c0_98] : memref<4x1x32xf32, #tpu.memory_space<vmem>>, vector<1x1x32xf32>
    %127 = vector.shape_cast %126 : vector<1x1x32xf32> to vector<1x32xf32>
    %128 = vector.broadcast %127 : vector<1x32xf32> to vector<8x32xf32>
    %129 = arith.addf %125, %128 : vector<8x32xf32>
    %130 = arith.negf %129 : vector<8x32xf32>
    %131 = math.exp %130 : vector<8x32xf32>
    %cst_99 = arith.constant 1.000000e+00 : f32
    %132 = vector.broadcast %cst_99 : f32 to vector<8x32xf32>
    %133 = arith.addf %132, %131 : vector<8x32xf32>
    %134 = arith.divf %132, %133 : vector<8x32xf32>
    %c1_100 = arith.constant 1 : index
    %c0_101 = arith.constant 0 : index
    %c0_102 = arith.constant 0 : index
    %135 = vector.load %arg2[%c1_100, %c0_101, %c0_102] : memref<3x32x32xf32, #tpu.memory_space<vmem>>, vector<1x32x32xf32>
    %136 = vector.shape_cast %135 : vector<1x32x32xf32> to vector<32x32xf32>
    %cst_103 = arith.constant dense<0.000000e+00> : vector<8x32xf32>
    %137 = tpu.matmul %118, %136, %cst_103 {dimension_numbers = #tpu.dot_dimension_numbers<[1], [0], [0], [1], [0, 0, 1, 1], [], []>} : vector<8x32xf32>, vector<32x32xf32>, vector<8x32xf32> -> vector<8x32xf32>
    %c1_104 = arith.constant 1 : index
    %c0_105 = arith.constant 0 : index
    %c0_106 = arith.constant 0 : index
    %138 = vector.load %arg3[%c1_104, %c0_105, %c0_106] : memref<3x32x32xf32, #tpu.memory_space<vmem>>, vector<1x32x32xf32>
    %139 = vector.shape_cast %138 : vector<1x32x32xf32> to vector<32x32xf32>
    %cst_107 = arith.constant dense<0.000000e+00> : vector<8x32xf32>
    %140 = tpu.matmul %59, %139, %cst_107 {dimension_numbers = #tpu.dot_dimension_numbers<[1], [0], [0], [1], [0, 0, 1, 1], [], []>} : vector<8x32xf32>, vector<32x32xf32>, vector<8x32xf32> -> vector<8x32xf32>
    %141 = arith.addf %137, %140 : vector<8x32xf32>
    %c1_108 = arith.constant 1 : index
    %c0_109 = arith.constant 0 : index
    %c0_110 = arith.constant 0 : index
    %142 = vector.load %arg4[%c1_108, %c0_109, %c0_110] : memref<4x1x32xf32, #tpu.memory_space<vmem>>, vector<1x1x32xf32>
    %143 = vector.shape_cast %142 : vector<1x1x32xf32> to vector<1x32xf32>
    %144 = vector.broadcast %143 : vector<1x32xf32> to vector<8x32xf32>
    %145 = arith.addf %141, %144 : vector<8x32xf32>
    %146 = arith.negf %145 : vector<8x32xf32>
    %147 = math.exp %146 : vector<8x32xf32>
    %cst_111 = arith.constant 1.000000e+00 : f32
    %148 = vector.broadcast %cst_111 : f32 to vector<8x32xf32>
    %149 = arith.addf %148, %147 : vector<8x32xf32>
    %150 = arith.divf %148, %149 : vector<8x32xf32>
    %c2_112 = arith.constant 2 : index
    %c0_113 = arith.constant 0 : index
    %c0_114 = arith.constant 0 : index
    %151 = vector.load %arg2[%c2_112, %c0_113, %c0_114] : memref<3x32x32xf32, #tpu.memory_space<vmem>>, vector<1x32x32xf32>
    %152 = vector.shape_cast %151 : vector<1x32x32xf32> to vector<32x32xf32>
    %cst_115 = arith.constant dense<0.000000e+00> : vector<8x32xf32>
    %153 = tpu.matmul %118, %152, %cst_115 {dimension_numbers = #tpu.dot_dimension_numbers<[1], [0], [0], [1], [0, 0, 1, 1], [], []>} : vector<8x32xf32>, vector<32x32xf32>, vector<8x32xf32> -> vector<8x32xf32>
    %c2_116 = arith.constant 2 : index
    %c0_117 = arith.constant 0 : index
    %c0_118 = arith.constant 0 : index
    %154 = vector.load %arg4[%c2_116, %c0_117, %c0_118] : memref<4x1x32xf32, #tpu.memory_space<vmem>>, vector<1x1x32xf32>
    %155 = vector.shape_cast %154 : vector<1x1x32xf32> to vector<1x32xf32>
    %156 = vector.broadcast %155 : vector<1x32xf32> to vector<8x32xf32>
    %157 = arith.addf %153, %156 : vector<8x32xf32>
    %c2_119 = arith.constant 2 : index
    %c0_120 = arith.constant 0 : index
    %c0_121 = arith.constant 0 : index
    %158 = vector.load %arg3[%c2_119, %c0_120, %c0_121] : memref<3x32x32xf32, #tpu.memory_space<vmem>>, vector<1x32x32xf32>
    %159 = vector.shape_cast %158 : vector<1x32x32xf32> to vector<32x32xf32>
    %cst_122 = arith.constant dense<0.000000e+00> : vector<8x32xf32>
    %160 = tpu.matmul %59, %159, %cst_122 {dimension_numbers = #tpu.dot_dimension_numbers<[1], [0], [0], [1], [0, 0, 1, 1], [], []>} : vector<8x32xf32>, vector<32x32xf32>, vector<8x32xf32> -> vector<8x32xf32>
    %c3_123 = arith.constant 3 : index
    %c0_124 = arith.constant 0 : index
    %c0_125 = arith.constant 0 : index
    %161 = vector.load %arg4[%c3_123, %c0_124, %c0_125] : memref<4x1x32xf32, #tpu.memory_space<vmem>>, vector<1x1x32xf32>
    %162 = vector.shape_cast %161 : vector<1x1x32xf32> to vector<1x32xf32>
    %163 = vector.broadcast %162 : vector<1x32xf32> to vector<8x32xf32>
    %164 = arith.addf %160, %163 : vector<8x32xf32>
    %165 = arith.mulf %134, %164 : vector<8x32xf32>
    %166 = arith.addf %157, %165 : vector<8x32xf32>
    %167 = math.tanh %166 : vector<8x32xf32>
    %cst_126 = arith.constant 1.000000e+00 : f32
    %168 = vector.broadcast %cst_126 : f32 to vector<8x32xf32>
    %169 = arith.subf %168, %150 : vector<8x32xf32>
    %170 = arith.mulf %169, %167 : vector<8x32xf32>
    %171 = arith.mulf %150, %59 : vector<8x32xf32>
    %172 = arith.addf %170, %171 : vector<8x32xf32>
    %c0_127 = arith.constant 0 : index
    %c0_128 = arith.constant 0 : index
    %c0_129 = arith.constant 0 : index
    %173 = vector.load %arg5[%c0_127, %c0_128, %c0_129] : memref<3x32x32xf32, #tpu.memory_space<vmem>>, vector<1x32x32xf32>
    %174 = vector.shape_cast %173 : vector<1x32x32xf32> to vector<32x32xf32>
    %cst_130 = arith.constant dense<0.000000e+00> : vector<8x32xf32>
    %175 = tpu.matmul %172, %174, %cst_130 {dimension_numbers = #tpu.dot_dimension_numbers<[1], [0], [0], [1], [0, 0, 1, 1], [], []>} : vector<8x32xf32>, vector<32x32xf32>, vector<8x32xf32> -> vector<8x32xf32>
    %c0_131 = arith.constant 0 : index
    %c0_132 = arith.constant 0 : index
    %c0_133 = arith.constant 0 : index
    %176 = vector.load %arg6[%c0_131, %c0_132, %c0_133] : memref<3x32x32xf32, #tpu.memory_space<vmem>>, vector<1x32x32xf32>
    %177 = vector.shape_cast %176 : vector<1x32x32xf32> to vector<32x32xf32>
    %cst_134 = arith.constant dense<0.000000e+00> : vector<8x32xf32>
    %178 = tpu.matmul %113, %177, %cst_134 {dimension_numbers = #tpu.dot_dimension_numbers<[1], [0], [0], [1], [0, 0, 1, 1], [], []>} : vector<8x32xf32>, vector<32x32xf32>, vector<8x32xf32> -> vector<8x32xf32>
    %179 = arith.addf %175, %178 : vector<8x32xf32>
    %c0_135 = arith.constant 0 : index
    %c0_136 = arith.constant 0 : index
    %c0_137 = arith.constant 0 : index
    %180 = vector.load %arg7[%c0_135, %c0_136, %c0_137] : memref<4x1x32xf32, #tpu.memory_space<vmem>>, vector<1x1x32xf32>
    %181 = vector.shape_cast %180 : vector<1x1x32xf32> to vector<1x32xf32>
    %182 = vector.broadcast %181 : vector<1x32xf32> to vector<8x32xf32>
    %183 = arith.addf %179, %182 : vector<8x32xf32>
    %184 = arith.negf %183 : vector<8x32xf32>
    %185 = math.exp %184 : vector<8x32xf32>
    %cst_138 = arith.constant 1.000000e+00 : f32
    %186 = vector.broadcast %cst_138 : f32 to vector<8x32xf32>
    %187 = arith.addf %186, %185 : vector<8x32xf32>
    %188 = arith.divf %186, %187 : vector<8x32xf32>
    %c1_139 = arith.constant 1 : index
    %c0_140 = arith.constant 0 : index
    %c0_141 = arith.constant 0 : index
    %189 = vector.load %arg5[%c1_139, %c0_140, %c0_141] : memref<3x32x32xf32, #tpu.memory_space<vmem>>, vector<1x32x32xf32>
    %190 = vector.shape_cast %189 : vector<1x32x32xf32> to vector<32x32xf32>
    %cst_142 = arith.constant dense<0.000000e+00> : vector<8x32xf32>
    %191 = tpu.matmul %172, %190, %cst_142 {dimension_numbers = #tpu.dot_dimension_numbers<[1], [0], [0], [1], [0, 0, 1, 1], [], []>} : vector<8x32xf32>, vector<32x32xf32>, vector<8x32xf32> -> vector<8x32xf32>
    %c1_143 = arith.constant 1 : index
    %c0_144 = arith.constant 0 : index
    %c0_145 = arith.constant 0 : index
    %192 = vector.load %arg6[%c1_143, %c0_144, %c0_145] : memref<3x32x32xf32, #tpu.memory_space<vmem>>, vector<1x32x32xf32>
    %193 = vector.shape_cast %192 : vector<1x32x32xf32> to vector<32x32xf32>
    %cst_146 = arith.constant dense<0.000000e+00> : vector<8x32xf32>
    %194 = tpu.matmul %113, %193, %cst_146 {dimension_numbers = #tpu.dot_dimension_numbers<[1], [0], [0], [1], [0, 0, 1, 1], [], []>} : vector<8x32xf32>, vector<32x32xf32>, vector<8x32xf32> -> vector<8x32xf32>
    %195 = arith.addf %191, %194 : vector<8x32xf32>
    %c1_147 = arith.constant 1 : index
    %c0_148 = arith.constant 0 : index
    %c0_149 = arith.constant 0 : index
    %196 = vector.load %arg7[%c1_147, %c0_148, %c0_149] : memref<4x1x32xf32, #tpu.memory_space<vmem>>, vector<1x1x32xf32>
    %197 = vector.shape_cast %196 : vector<1x1x32xf32> to vector<1x32xf32>
    %198 = vector.broadcast %197 : vector<1x32xf32> to vector<8x32xf32>
    %199 = arith.addf %195, %198 : vector<8x32xf32>
    %200 = arith.negf %199 : vector<8x32xf32>
    %201 = math.exp %200 : vector<8x32xf32>
    %cst_150 = arith.constant 1.000000e+00 : f32
    %202 = vector.broadcast %cst_150 : f32 to vector<8x32xf32>
    %203 = arith.addf %202, %201 : vector<8x32xf32>
    %204 = arith.divf %202, %203 : vector<8x32xf32>
    %c2_151 = arith.constant 2 : index
    %c0_152 = arith.constant 0 : index
    %c0_153 = arith.constant 0 : index
    %205 = vector.load %arg5[%c2_151, %c0_152, %c0_153] : memref<3x32x32xf32, #tpu.memory_space<vmem>>, vector<1x32x32xf32>
    %206 = vector.shape_cast %205 : vector<1x32x32xf32> to vector<32x32xf32>
    %cst_154 = arith.constant dense<0.000000e+00> : vector<8x32xf32>
    %207 = tpu.matmul %172, %206, %cst_154 {dimension_numbers = #tpu.dot_dimension_numbers<[1], [0], [0], [1], [0, 0, 1, 1], [], []>} : vector<8x32xf32>, vector<32x32xf32>, vector<8x32xf32> -> vector<8x32xf32>
    %c2_155 = arith.constant 2 : index
    %c0_156 = arith.constant 0 : index
    %c0_157 = arith.constant 0 : index
    %208 = vector.load %arg7[%c2_155, %c0_156, %c0_157] : memref<4x1x32xf32, #tpu.memory_space<vmem>>, vector<1x1x32xf32>
    %209 = vector.shape_cast %208 : vector<1x1x32xf32> to vector<1x32xf32>
    %210 = vector.broadcast %209 : vector<1x32xf32> to vector<8x32xf32>
    %211 = arith.addf %207, %210 : vector<8x32xf32>
    %c2_158 = arith.constant 2 : index
    %c0_159 = arith.constant 0 : index
    %c0_160 = arith.constant 0 : index
    %212 = vector.load %arg6[%c2_158, %c0_159, %c0_160] : memref<3x32x32xf32, #tpu.memory_space<vmem>>, vector<1x32x32xf32>
    %213 = vector.shape_cast %212 : vector<1x32x32xf32> to vector<32x32xf32>
    %cst_161 = arith.constant dense<0.000000e+00> : vector<8x32xf32>
    %214 = tpu.matmul %113, %213, %cst_161 {dimension_numbers = #tpu.dot_dimension_numbers<[1], [0], [0], [1], [0, 0, 1, 1], [], []>} : vector<8x32xf32>, vector<32x32xf32>, vector<8x32xf32> -> vector<8x32xf32>
    %c3_162 = arith.constant 3 : index
    %c0_163 = arith.constant 0 : index
    %c0_164 = arith.constant 0 : index
    %215 = vector.load %arg7[%c3_162, %c0_163, %c0_164] : memref<4x1x32xf32, #tpu.memory_space<vmem>>, vector<1x1x32xf32>
    %216 = vector.shape_cast %215 : vector<1x1x32xf32> to vector<1x32xf32>
    %217 = vector.broadcast %216 : vector<1x32xf32> to vector<8x32xf32>
    %218 = arith.addf %214, %217 : vector<8x32xf32>
    %219 = arith.mulf %188, %218 : vector<8x32xf32>
    %220 = arith.addf %211, %219 : vector<8x32xf32>
    %221 = math.tanh %220 : vector<8x32xf32>
    %cst_165 = arith.constant 1.000000e+00 : f32
    %222 = vector.broadcast %cst_165 : f32 to vector<8x32xf32>
    %223 = arith.subf %222, %204 : vector<8x32xf32>
    %224 = arith.mulf %223, %221 : vector<8x32xf32>
    %225 = arith.mulf %204, %113 : vector<8x32xf32>
    %226 = arith.addf %224, %225 : vector<8x32xf32>
    %c0_166 = arith.constant 0 : index
    %c1_167 = arith.constant 1 : index
    %c0_168 = arith.constant 0 : index
    %227 = vector.load %arg8[%c0_166, %c1_167, %c0_168] : memref<8x8x32xf32, #tpu.memory_space<vmem>>, vector<8x1x32xf32>
    %228 = vector.shape_cast %227 : vector<8x1x32xf32> to vector<8x32xf32>
    %229 = vector.shape_cast %226 : vector<8x32xf32> to vector<8x1x32xf32>
    tpu.vector_store %arg8[%c0_166, %c1_167, %c0_168], %229 {strides = array<i32>} : memref<8x8x32xf32, #tpu.memory_space<vmem>>, vector<8x1x32xf32>,
    %c0_169 = arith.constant 0 : index
    %c2_170 = arith.constant 2 : index
    %c0_171 = arith.constant 0 : index
    %230 = vector.load %arg0[%c0_169, %c2_170, %c0_171] : memref<8x8x32xf32, #tpu.memory_space<vmem>>, vector<8x1x32xf32>
    %231 = vector.shape_cast %230 : vector<8x1x32xf32> to vector<8x32xf32>
    %c0_172 = arith.constant 0 : index
    %c0_173 = arith.constant 0 : index
    %c0_174 = arith.constant 0 : index
    %232 = vector.load %arg2[%c0_172, %c0_173, %c0_174] : memref<3x32x32xf32, #tpu.memory_space<vmem>>, vector<1x32x32xf32>
    %233 = vector.shape_cast %232 : vector<1x32x32xf32> to vector<32x32xf32>
    %cst_175 = arith.constant dense<0.000000e+00> : vector<8x32xf32>
    %234 = tpu.matmul %231, %233, %cst_175 {dimension_numbers = #tpu.dot_dimension_numbers<[1], [0], [0], [1], [0, 0, 1, 1], [], []>} : vector<8x32xf32>, vector<32x32xf32>, vector<8x32xf32> -> vector<8x32xf32>
    %c0_176 = arith.constant 0 : index
    %c0_177 = arith.constant 0 : index
    %c0_178 = arith.constant 0 : index
    %235 = vector.load %arg3[%c0_176, %c0_177, %c0_178] : memref<3x32x32xf32, #tpu.memory_space<vmem>>, vector<1x32x32xf32>
    %236 = vector.shape_cast %235 : vector<1x32x32xf32> to vector<32x32xf32>
    %cst_179 = arith.constant dense<0.000000e+00> : vector<8x32xf32>
    %237 = tpu.matmul %172, %236, %cst_179 {dimension_numbers = #tpu.dot_dimension_numbers<[1], [0], [0], [1], [0, 0, 1, 1], [], []>} : vector<8x32xf32>, vector<32x32xf32>, vector<8x32xf32> -> vector<8x32xf32>
    %238 = arith.addf %234, %237 : vector<8x32xf32>
    %c0_180 = arith.constant 0 : index
    %c0_181 = arith.constant 0 : index
    %c0_182 = arith.constant 0 : index
    %239 = vector.load %arg4[%c0_180, %c0_181, %c0_182] : memref<4x1x32xf32, #tpu.memory_space<vmem>>, vector<1x1x32xf32>
    %240 = vector.shape_cast %239 : vector<1x1x32xf32> to vector<1x32xf32>
    %241 = vector.broadcast %240 : vector<1x32xf32> to vector<8x32xf32>
    %242 = arith.addf %238, %241 : vector<8x32xf32>
    %243 = arith.negf %242 : vector<8x32xf32>
    %244 = math.exp %243 : vector<8x32xf32>
    %cst_183 = arith.constant 1.000000e+00 : f32
    %245 = vector.broadcast %cst_183 : f32 to vector<8x32xf32>
    %246 = arith.addf %245, %244 : vector<8x32xf32>
    %247 = arith.divf %245, %246 : vector<8x32xf32>
    %c1_184 = arith.constant 1 : index
    %c0_185 = arith.constant 0 : index
    %c0_186 = arith.constant 0 : index
    %248 = vector.load %arg2[%c1_184, %c0_185, %c0_186] : memref<3x32x32xf32, #tpu.memory_space<vmem>>, vector<1x32x32xf32>
    %249 = vector.shape_cast %248 : vector<1x32x32xf32> to vector<32x32xf32>
    %cst_187 = arith.constant dense<0.000000e+00> : vector<8x32xf32>
    %250 = tpu.matmul %231, %249, %cst_187 {dimension_numbers = #tpu.dot_dimension_numbers<[1], [0], [0], [1], [0, 0, 1, 1], [], []>} : vector<8x32xf32>, vector<32x32xf32>, vector<8x32xf32> -> vector<8x32xf32>
    %c1_188 = arith.constant 1 : index
    %c0_189 = arith.constant 0 : index
    %c0_190 = arith.constant 0 : index
    %251 = vector.load %arg3[%c1_188, %c0_189, %c0_190] : memref<3x32x32xf32, #tpu.memory_space<vmem>>, vector<1x32x32xf32>
    %252 = vector.shape_cast %251 : vector<1x32x32xf32> to vector<32x32xf32>
    %cst_191 = arith.constant dense<0.000000e+00> : vector<8x32xf32>
    %253 = tpu.matmul %172, %252, %cst_191 {dimension_numbers = #tpu.dot_dimension_numbers<[1], [0], [0], [1], [0, 0, 1, 1], [], []>} : vector<8x32xf32>, vector<32x32xf32>, vector<8x32xf32> -> vector<8x32xf32>
    %254 = arith.addf %250, %253 : vector<8x32xf32>
    %c1_192 = arith.constant 1 : index
    %c0_193 = arith.constant 0 : index
    %c0_194 = arith.constant 0 : index
    %255 = vector.load %arg4[%c1_192, %c0_193, %c0_194] : memref<4x1x32xf32, #tpu.memory_space<vmem>>, vector<1x1x32xf32>
    %256 = vector.shape_cast %255 : vector<1x1x32xf32> to vector<1x32xf32>
    %257 = vector.broadcast %256 : vector<1x32xf32> to vector<8x32xf32>
    %258 = arith.addf %254, %257 : vector<8x32xf32>
    %259 = arith.negf %258 : vector<8x32xf32>
    %260 = math.exp %259 : vector<8x32xf32>
    %cst_195 = arith.constant 1.000000e+00 : f32
    %261 = vector.broadcast %cst_195 : f32 to vector<8x32xf32>
    %262 = arith.addf %261, %260 : vector<8x32xf32>
    %263 = arith.divf %261, %262 : vector<8x32xf32>
    %c2_196 = arith.constant 2 : index
    %c0_197 = arith.constant 0 : index
    %c0_198 = arith.constant 0 : index
    %264 = vector.load %arg2[%c2_196, %c0_197, %c0_198] : memref<3x32x32xf32, #tpu.memory_space<vmem>>, vector<1x32x32xf32>
    %265 = vector.shape_cast %264 : vector<1x32x32xf32> to vector<32x32xf32>
    %cst_199 = arith.constant dense<0.000000e+00> : vector<8x32xf32>
    %266 = tpu.matmul %231, %265, %cst_199 {dimension_numbers = #tpu.dot_dimension_numbers<[1], [0], [0], [1], [0, 0, 1, 1], [], []>} : vector<8x32xf32>, vector<32x32xf32>, vector<8x32xf32> -> vector<8x32xf32>
    %c2_200 = arith.constant 2 : index
    %c0_201 = arith.constant 0 : index
    %c0_202 = arith.constant 0 : index
    %267 = vector.load %arg4[%c2_200, %c0_201, %c0_202] : memref<4x1x32xf32, #tpu.memory_space<vmem>>, vector<1x1x32xf32>
    %268 = vector.shape_cast %267 : vector<1x1x32xf32> to vector<1x32xf32>
    %269 = vector.broadcast %268 : vector<1x32xf32> to vector<8x32xf32>
    %270 = arith.addf %266, %269 : vector<8x32xf32>
    %c2_203 = arith.constant 2 : index
    %c0_204 = arith.constant 0 : index
    %c0_205 = arith.constant 0 : index
    %271 = vector.load %arg3[%c2_203, %c0_204, %c0_205] : memref<3x32x32xf32, #tpu.memory_space<vmem>>, vector<1x32x32xf32>
    %272 = vector.shape_cast %271 : vector<1x32x32xf32> to vector<32x32xf32>
    %cst_206 = arith.constant dense<0.000000e+00> : vector<8x32xf32>
    %273 = tpu.matmul %172, %272, %cst_206 {dimension_numbers = #tpu.dot_dimension_numbers<[1], [0], [0], [1], [0, 0, 1, 1], [], []>} : vector<8x32xf32>, vector<32x32xf32>, vector<8x32xf32> -> vector<8x32xf32>
    %c3_207 = arith.constant 3 : index
    %c0_208 = arith.constant 0 : index
    %c0_209 = arith.constant 0 : index
    %274 = vector.load %arg4[%c3_207, %c0_208, %c0_209] : memref<4x1x32xf32, #tpu.memory_space<vmem>>, vector<1x1x32xf32>
    %275 = vector.shape_cast %274 : vector<1x1x32xf32> to vector<1x32xf32>
    %276 = vector.broadcast %275 : vector<1x32xf32> to vector<8x32xf32>
    %277 = arith.addf %273, %276 : vector<8x32xf32>
    %278 = arith.mulf %247, %277 : vector<8x32xf32>
    %279 = arith.addf %270, %278 : vector<8x32xf32>
    %280 = math.tanh %279 : vector<8x32xf32>
    %cst_210 = arith.constant 1.000000e+00 : f32
    %281 = vector.broadcast %cst_210 : f32 to vector<8x32xf32>
    %282 = arith.subf %281, %263 : vector<8x32xf32>
    %283 = arith.mulf %282, %280 : vector<8x32xf32>
    %284 = arith.mulf %263, %172 : vector<8x32xf32>
    %285 = arith.addf %283, %284 : vector<8x32xf32>
    %c0_211 = arith.constant 0 : index
    %c0_212 = arith.constant 0 : index
    %c0_213 = arith.constant 0 : index
    %286 = vector.load %arg5[%c0_211, %c0_212, %c0_213] : memref<3x32x32xf32, #tpu.memory_space<vmem>>, vector<1x32x32xf32>
    %287 = vector.shape_cast %286 : vector<1x32x32xf32> to vector<32x32xf32>
    %cst_214 = arith.constant dense<0.000000e+00> : vector<8x32xf32>
    %288 = tpu.matmul %285, %287, %cst_214 {dimension_numbers = #tpu.dot_dimension_numbers<[1], [0], [0], [1], [0, 0, 1, 1], [], []>} : vector<8x32xf32>, vector<32x32xf32>, vector<8x32xf32> -> vector<8x32xf32>
    %c0_215 = arith.constant 0 : index
    %c0_216 = arith.constant 0 : index
    %c0_217 = arith.constant 0 : index
    %289 = vector.load %arg6[%c0_215, %c0_216, %c0_217] : memref<3x32x32xf32, #tpu.memory_space<vmem>>, vector<1x32x32xf32>
    %290 = vector.shape_cast %289 : vector<1x32x32xf32> to vector<32x32xf32>
    %cst_218 = arith.constant dense<0.000000e+00> : vector<8x32xf32>
    %291 = tpu.matmul %226, %290, %cst_218 {dimension_numbers = #tpu.dot_dimension_numbers<[1], [0], [0], [1], [0, 0, 1, 1], [], []>} : vector<8x32xf32>, vector<32x32xf32>, vector<8x32xf32> -> vector<8x32xf32>
    %292 = arith.addf %288, %291 : vector<8x32xf32>
    %c0_219 = arith.constant 0 : index
    %c0_220 = arith.constant 0 : index
    %c0_221 = arith.constant 0 : index
    %293 = vector.load %arg7[%c0_219, %c0_220, %c0_221] : memref<4x1x32xf32, #tpu.memory_space<vmem>>, vector<1x1x32xf32>
    %294 = vector.shape_cast %293 : vector<1x1x32xf32> to vector<1x32xf32>
    %295 = vector.broadcast %294 : vector<1x32xf32> to vector<8x32xf32>
    %296 = arith.addf %292, %295 : vector<8x32xf32>
    %297 = arith.negf %296 : vector<8x32xf32>
    %298 = math.exp %297 : vector<8x32xf32>
    %cst_222 = arith.constant 1.000000e+00 : f32
    %299 = vector.broadcast %cst_222 : f32 to vector<8x32xf32>
    %300 = arith.addf %299, %298 : vector<8x32xf32>
    %301 = arith.divf %299, %300 : vector<8x32xf32>
    %c1_223 = arith.constant 1 : index
    %c0_224 = arith.constant 0 : index
    %c0_225 = arith.constant 0 : index
    %302 = vector.load %arg5[%c1_223, %c0_224, %c0_225] : memref<3x32x32xf32, #tpu.memory_space<vmem>>, vector<1x32x32xf32>
    %303 = vector.shape_cast %302 : vector<1x32x32xf32> to vector<32x32xf32>
    %cst_226 = arith.constant dense<0.000000e+00> : vector<8x32xf32>
    %304 = tpu.matmul %285, %303, %cst_226 {dimension_numbers = #tpu.dot_dimension_numbers<[1], [0], [0], [1], [0, 0, 1, 1], [], []>} : vector<8x32xf32>, vector<32x32xf32>, vector<8x32xf32> -> vector<8x32xf32>
    %c1_227 = arith.constant 1 : index
    %c0_228 = arith.constant 0 : index
    %c0_229 = arith.constant 0 : index
    %305 = vector.load %arg6[%c1_227, %c0_228, %c0_229] : memref<3x32x32xf32, #tpu.memory_space<vmem>>, vector<1x32x32xf32>
    %306 = vector.shape_cast %305 : vector<1x32x32xf32> to vector<32x32xf32>
    %cst_230 = arith.constant dense<0.000000e+00> : vector<8x32xf32>
    %307 = tpu.matmul %226, %306, %cst_230 {dimension_numbers = #tpu.dot_dimension_numbers<[1], [0], [0], [1], [0, 0, 1, 1], [], []>} : vector<8x32xf32>, vector<32x32xf32>, vector<8x32xf32> -> vector<8x32xf32>
    %308 = arith.addf %304, %307 : vector<8x32xf32>
    %c1_231 = arith.constant 1 : index
    %c0_232 = arith.constant 0 : index
    %c0_233 = arith.constant 0 : index
    %309 = vector.load %arg7[%c1_231, %c0_232, %c0_233] : memref<4x1x32xf32, #tpu.memory_space<vmem>>, vector<1x1x32xf32>
    %310 = vector.shape_cast %309 : vector<1x1x32xf32> to vector<1x32xf32>
    %311 = vector.broadcast %310 : vector<1x32xf32> to vector<8x32xf32>
    %312 = arith.addf %308, %311 : vector<8x32xf32>
    %313 = arith.negf %312 : vector<8x32xf32>
    %314 = math.exp %313 : vector<8x32xf32>
    %cst_234 = arith.constant 1.000000e+00 : f32
    %315 = vector.broadcast %cst_234 : f32 to vector<8x32xf32>
    %316 = arith.addf %315, %314 : vector<8x32xf32>
    %317 = arith.divf %315, %316 : vector<8x32xf32>
    %c2_235 = arith.constant 2 : index
    %c0_236 = arith.constant 0 : index
    %c0_237 = arith.constant 0 : index
    %318 = vector.load %arg5[%c2_235, %c0_236, %c0_237] : memref<3x32x32xf32, #tpu.memory_space<vmem>>, vector<1x32x32xf32>
    %319 = vector.shape_cast %318 : vector<1x32x32xf32> to vector<32x32xf32>
    %cst_238 = arith.constant dense<0.000000e+00> : vector<8x32xf32>
    %320 = tpu.matmul %285, %319, %cst_238 {dimension_numbers = #tpu.dot_dimension_numbers<[1], [0], [0], [1], [0, 0, 1, 1], [], []>} : vector<8x32xf32>, vector<32x32xf32>, vector<8x32xf32> -> vector<8x32xf32>
    %c2_239 = arith.constant 2 : index
    %c0_240 = arith.constant 0 : index
    %c0_241 = arith.constant 0 : index
    %321 = vector.load %arg7[%c2_239, %c0_240, %c0_241] : memref<4x1x32xf32, #tpu.memory_space<vmem>>, vector<1x1x32xf32>
    %322 = vector.shape_cast %321 : vector<1x1x32xf32> to vector<1x32xf32>
    %323 = vector.broadcast %322 : vector<1x32xf32> to vector<8x32xf32>
    %324 = arith.addf %320, %323 : vector<8x32xf32>
    %c2_242 = arith.constant 2 : index
    %c0_243 = arith.constant 0 : index
    %c0_244 = arith.constant 0 : index
    %325 = vector.load %arg6[%c2_242, %c0_243, %c0_244] : memref<3x32x32xf32, #tpu.memory_space<vmem>>, vector<1x32x32xf32>
    %326 = vector.shape_cast %325 : vector<1x32x32xf32> to vector<32x32xf32>
    %cst_245 = arith.constant dense<0.000000e+00> : vector<8x32xf32>
    %327 = tpu.matmul %226, %326, %cst_245 {dimension_numbers = #tpu.dot_dimension_numbers<[1], [0], [0], [1], [0, 0, 1, 1], [], []>} : vector<8x32xf32>, vector<32x32xf32>, vector<8x32xf32> -> vector<8x32xf32>
    %c3_246 = arith.constant 3 : index
    %c0_247 = arith.constant 0 : index
    %c0_248 = arith.constant 0 : index
    %328 = vector.load %arg7[%c3_246, %c0_247, %c0_248] : memref<4x1x32xf32, #tpu.memory_space<vmem>>, vector<1x1x32xf32>
    %329 = vector.shape_cast %328 : vector<1x1x32xf32> to vector<1x32xf32>
    %330 = vector.broadcast %329 : vector<1x32xf32> to vector<8x32xf32>
    %331 = arith.addf %327, %330 : vector<8x32xf32>
    %332 = arith.mulf %301, %331 : vector<8x32xf32>
    %333 = arith.addf %324, %332 : vector<8x32xf32>
    %334 = math.tanh %333 : vector<8x32xf32>
    %cst_249 = arith.constant 1.000000e+00 : f32
    %335 = vector.broadcast %cst_249 : f32 to vector<8x32xf32>
    %336 = arith.subf %335, %317 : vector<8x32xf32>
    %337 = arith.mulf %336, %334 : vector<8x32xf32>
    %338 = arith.mulf %317, %226 : vector<8x32xf32>
    %339 = arith.addf %337, %338 : vector<8x32xf32>
    %c0_250 = arith.constant 0 : index
    %c2_251 = arith.constant 2 : index
    %c0_252 = arith.constant 0 : index
    %340 = vector.load %arg8[%c0_250, %c2_251, %c0_252] : memref<8x8x32xf32, #tpu.memory_space<vmem>>, vector<8x1x32xf32>
    %341 = vector.shape_cast %340 : vector<8x1x32xf32> to vector<8x32xf32>
    %342 = vector.shape_cast %339 : vector<8x32xf32> to vector<8x1x32xf32>
    tpu.vector_store %arg8[%c0_250, %c2_251, %c0_252], %342 {strides = array<i32>} : memref<8x8x32xf32, #tpu.memory_space<vmem>>, vector<8x1x32xf32>,
    %c0_253 = arith.constant 0 : index
    %c3_254 = arith.constant 3 : index
    %c0_255 = arith.constant 0 : index
    %343 = vector.load %arg0[%c0_253, %c3_254, %c0_255] : memref<8x8x32xf32, #tpu.memory_space<vmem>>, vector<8x1x32xf32>
    %344 = vector.shape_cast %343 : vector<8x1x32xf32> to vector<8x32xf32>
    %c0_256 = arith.constant 0 : index
    %c0_257 = arith.constant 0 : index
    %c0_258 = arith.constant 0 : index
    %345 = vector.load %arg2[%c0_256, %c0_257, %c0_258] : memref<3x32x32xf32, #tpu.memory_space<vmem>>, vector<1x32x32xf32>
    %346 = vector.shape_cast %345 : vector<1x32x32xf32> to vector<32x32xf32>
    %cst_259 = arith.constant dense<0.000000e+00> : vector<8x32xf32>
    %347 = tpu.matmul %344, %346, %cst_259 {dimension_numbers = #tpu.dot_dimension_numbers<[1], [0], [0], [1], [0, 0, 1, 1], [], []>} : vector<8x32xf32>, vector<32x32xf32>, vector<8x32xf32> -> vector<8x32xf32>
    %c0_260 = arith.constant 0 : index
    %c0_261 = arith.constant 0 : index
    %c0_262 = arith.constant 0 : index
    %348 = vector.load %arg3[%c0_260, %c0_261, %c0_262] : memref<3x32x32xf32, #tpu.memory_space<vmem>>, vector<1x32x32xf32>
    %349 = vector.shape_cast %348 : vector<1x32x32xf32> to vector<32x32xf32>
    %cst_263 = arith.constant dense<0.000000e+00> : vector<8x32xf32>
    %350 = tpu.matmul %285, %349, %cst_263 {dimension_numbers = #tpu.dot_dimension_numbers<[1], [0], [0], [1], [0, 0, 1, 1], [], []>} : vector<8x32xf32>, vector<32x32xf32>, vector<8x32xf32> -> vector<8x32xf32>
    %351 = arith.addf %347, %350 : vector<8x32xf32>
    %c0_264 = arith.constant 0 : index
    %c0_265 = arith.constant 0 : index
    %c0_266 = arith.constant 0 : index
    %352 = vector.load %arg4[%c0_264, %c0_265, %c0_266] : memref<4x1x32xf32, #tpu.memory_space<vmem>>, vector<1x1x32xf32>
    %353 = vector.shape_cast %352 : vector<1x1x32xf32> to vector<1x32xf32>
    %354 = vector.broadcast %353 : vector<1x32xf32> to vector<8x32xf32>
    %355 = arith.addf %351, %354 : vector<8x32xf32>
    %356 = arith.negf %355 : vector<8x32xf32>
    %357 = math.exp %356 : vector<8x32xf32>
    %cst_267 = arith.constant 1.000000e+00 : f32
    %358 = vector.broadcast %cst_267 : f32 to vector<8x32xf32>
    %359 = arith.addf %358, %357 : vector<8x32xf32>
    %360 = arith.divf %358, %359 : vector<8x32xf32>
    %c1_268 = arith.constant 1 : index
    %c0_269 = arith.constant 0 : index
    %c0_270 = arith.constant 0 : index
    %361 = vector.load %arg2[%c1_268, %c0_269, %c0_270] : memref<3x32x32xf32, #tpu.memory_space<vmem>>, vector<1x32x32xf32>
    %362 = vector.shape_cast %361 : vector<1x32x32xf32> to vector<32x32xf32>
    %cst_271 = arith.constant dense<0.000000e+00> : vector<8x32xf32>
    %363 = tpu.matmul %344, %362, %cst_271 {dimension_numbers = #tpu.dot_dimension_numbers<[1], [0], [0], [1], [0, 0, 1, 1], [], []>} : vector<8x32xf32>, vector<32x32xf32>, vector<8x32xf32> -> vector<8x32xf32>
    %c1_272 = arith.constant 1 : index
    %c0_273 = arith.constant 0 : index
    %c0_274 = arith.constant 0 : index
    %364 = vector.load %arg3[%c1_272, %c0_273, %c0_274] : memref<3x32x32xf32, #tpu.memory_space<vmem>>, vector<1x32x32xf32>
    %365 = vector.shape_cast %364 : vector<1x32x32xf32> to vector<32x32xf32>
    %cst_275 = arith.constant dense<0.000000e+00> : vector<8x32xf32>
    %366 = tpu.matmul %285, %365, %cst_275 {dimension_numbers = #tpu.dot_dimension_numbers<[1], [0], [0], [1], [0, 0, 1, 1], [], []>} : vector<8x32xf32>, vector<32x32xf32>, vector<8x32xf32> -> vector<8x32xf32>
    %367 = arith.addf %363, %366 : vector<8x32xf32>
    %c1_276 = arith.constant 1 : index
    %c0_277 = arith.constant 0 : index
    %c0_278 = arith.constant 0 : index
    %368 = vector.load %arg4[%c1_276, %c0_277, %c0_278] : memref<4x1x32xf32, #tpu.memory_space<vmem>>, vector<1x1x32xf32>
    %369 = vector.shape_cast %368 : vector<1x1x32xf32> to vector<1x32xf32>
    %370 = vector.broadcast %369 : vector<1x32xf32> to vector<8x32xf32>
    %371 = arith.addf %367, %370 : vector<8x32xf32>
    %372 = arith.negf %371 : vector<8x32xf32>
    %373 = math.exp %372 : vector<8x32xf32>
    %cst_279 = arith.constant 1.000000e+00 : f32
    %374 = vector.broadcast %cst_279 : f32 to vector<8x32xf32>
    %375 = arith.addf %374, %373 : vector<8x32xf32>
    %376 = arith.divf %374, %375 : vector<8x32xf32>
    %c2_280 = arith.constant 2 : index
    %c0_281 = arith.constant 0 : index
    %c0_282 = arith.constant 0 : index
    %377 = vector.load %arg2[%c2_280, %c0_281, %c0_282] : memref<3x32x32xf32, #tpu.memory_space<vmem>>, vector<1x32x32xf32>
    %378 = vector.shape_cast %377 : vector<1x32x32xf32> to vector<32x32xf32>
    %cst_283 = arith.constant dense<0.000000e+00> : vector<8x32xf32>
    %379 = tpu.matmul %344, %378, %cst_283 {dimension_numbers = #tpu.dot_dimension_numbers<[1], [0], [0], [1], [0, 0, 1, 1], [], []>} : vector<8x32xf32>, vector<32x32xf32>, vector<8x32xf32> -> vector<8x32xf32>
    %c2_284 = arith.constant 2 : index
    %c0_285 = arith.constant 0 : index
    %c0_286 = arith.constant 0 : index
    %380 = vector.load %arg4[%c2_284, %c0_285, %c0_286] : memref<4x1x32xf32, #tpu.memory_space<vmem>>, vector<1x1x32xf32>
    %381 = vector.shape_cast %380 : vector<1x1x32xf32> to vector<1x32xf32>
    %382 = vector.broadcast %381 : vector<1x32xf32> to vector<8x32xf32>
    %383 = arith.addf %379, %382 : vector<8x32xf32>
    %c2_287 = arith.constant 2 : index
    %c0_288 = arith.constant 0 : index
    %c0_289 = arith.constant 0 : index
    %384 = vector.load %arg3[%c2_287, %c0_288, %c0_289] : memref<3x32x32xf32, #tpu.memory_space<vmem>>, vector<1x32x32xf32>
    %385 = vector.shape_cast %384 : vector<1x32x32xf32> to vector<32x32xf32>
    %cst_290 = arith.constant dense<0.000000e+00> : vector<8x32xf32>
    %386 = tpu.matmul %285, %385, %cst_290 {dimension_numbers = #tpu.dot_dimension_numbers<[1], [0], [0], [1], [0, 0, 1, 1], [], []>} : vector<8x32xf32>, vector<32x32xf32>, vector<8x32xf32> -> vector<8x32xf32>
    %c3_291 = arith.constant 3 : index
    %c0_292 = arith.constant 0 : index
    %c0_293 = arith.constant 0 : index
    %387 = vector.load %arg4[%c3_291, %c0_292, %c0_293] : memref<4x1x32xf32, #tpu.memory_space<vmem>>, vector<1x1x32xf32>
    %388 = vector.shape_cast %387 : vector<1x1x32xf32> to vector<1x32xf32>
    %389 = vector.broadcast %388 : vector<1x32xf32> to vector<8x32xf32>
    %390 = arith.addf %386, %389 : vector<8x32xf32>
    %391 = arith.mulf %360, %390 : vector<8x32xf32>
    %392 = arith.addf %383, %391 : vector<8x32xf32>
    %393 = math.tanh %392 : vector<8x32xf32>
    %cst_294 = arith.constant 1.000000e+00 : f32
    %394 = vector.broadcast %cst_294 : f32 to vector<8x32xf32>
    %395 = arith.subf %394, %376 : vector<8x32xf32>
    %396 = arith.mulf %395, %393 : vector<8x32xf32>
    %397 = arith.mulf %376, %285 : vector<8x32xf32>
    %398 = arith.addf %396, %397 : vector<8x32xf32>
    %c0_295 = arith.constant 0 : index
    %c0_296 = arith.constant 0 : index
    %c0_297 = arith.constant 0 : index
    %399 = vector.load %arg5[%c0_295, %c0_296, %c0_297] : memref<3x32x32xf32, #tpu.memory_space<vmem>>, vector<1x32x32xf32>
    %400 = vector.shape_cast %399 : vector<1x32x32xf32> to vector<32x32xf32>
    %cst_298 = arith.constant dense<0.000000e+00> : vector<8x32xf32>
    %401 = tpu.matmul %398, %400, %cst_298 {dimension_numbers = #tpu.dot_dimension_numbers<[1], [0], [0], [1], [0, 0, 1, 1], [], []>} : vector<8x32xf32>, vector<32x32xf32>, vector<8x32xf32> -> vector<8x32xf32>
    %c0_299 = arith.constant 0 : index
    %c0_300 = arith.constant 0 : index
    %c0_301 = arith.constant 0 : index
    %402 = vector.load %arg6[%c0_299, %c0_300, %c0_301] : memref<3x32x32xf32, #tpu.memory_space<vmem>>, vector<1x32x32xf32>
    %403 = vector.shape_cast %402 : vector<1x32x32xf32> to vector<32x32xf32>
    %cst_302 = arith.constant dense<0.000000e+00> : vector<8x32xf32>
    %404 = tpu.matmul %339, %403, %cst_302 {dimension_numbers = #tpu.dot_dimension_numbers<[1], [0], [0], [1], [0, 0, 1, 1], [], []>} : vector<8x32xf32>, vector<32x32xf32>, vector<8x32xf32> -> vector<8x32xf32>
    %405 = arith.addf %401, %404 : vector<8x32xf32>
    %c0_303 = arith.constant 0 : index
    %c0_304 = arith.constant 0 : index
    %c0_305 = arith.constant 0 : index
    %406 = vector.load %arg7[%c0_303, %c0_304, %c0_305] : memref<4x1x32xf32, #tpu.memory_space<vmem>>, vector<1x1x32xf32>
    %407 = vector.shape_cast %406 : vector<1x1x32xf32> to vector<1x32xf32>
    %408 = vector.broadcast %407 : vector<1x32xf32> to vector<8x32xf32>
    %409 = arith.addf %405, %408 : vector<8x32xf32>
    %410 = arith.negf %409 : vector<8x32xf32>
    %411 = math.exp %410 : vector<8x32xf32>
    %cst_306 = arith.constant 1.000000e+00 : f32
    %412 = vector.broadcast %cst_306 : f32 to vector<8x32xf32>
    %413 = arith.addf %412, %411 : vector<8x32xf32>
    %414 = arith.divf %412, %413 : vector<8x32xf32>
    %c1_307 = arith.constant 1 : index
    %c0_308 = arith.constant 0 : index
    %c0_309 = arith.constant 0 : index
    %415 = vector.load %arg5[%c1_307, %c0_308, %c0_309] : memref<3x32x32xf32, #tpu.memory_space<vmem>>, vector<1x32x32xf32>
    %416 = vector.shape_cast %415 : vector<1x32x32xf32> to vector<32x32xf32>
    %cst_310 = arith.constant dense<0.000000e+00> : vector<8x32xf32>
    %417 = tpu.matmul %398, %416, %cst_310 {dimension_numbers = #tpu.dot_dimension_numbers<[1], [0], [0], [1], [0, 0, 1, 1], [], []>} : vector<8x32xf32>, vector<32x32xf32>, vector<8x32xf32> -> vector<8x32xf32>
    %c1_311 = arith.constant 1 : index
    %c0_312 = arith.constant 0 : index
    %c0_313 = arith.constant 0 : index
    %418 = vector.load %arg6[%c1_311, %c0_312, %c0_313] : memref<3x32x32xf32, #tpu.memory_space<vmem>>, vector<1x32x32xf32>
    %419 = vector.shape_cast %418 : vector<1x32x32xf32> to vector<32x32xf32>
    %cst_314 = arith.constant dense<0.000000e+00> : vector<8x32xf32>
    %420 = tpu.matmul %339, %419, %cst_314 {dimension_numbers = #tpu.dot_dimension_numbers<[1], [0], [0], [1], [0, 0, 1, 1], [], []>} : vector<8x32xf32>, vector<32x32xf32>, vector<8x32xf32> -> vector<8x32xf32>
    %421 = arith.addf %417, %420 : vector<8x32xf32>
    %c1_315 = arith.constant 1 : index
    %c0_316 = arith.constant 0 : index
    %c0_317 = arith.constant 0 : index
    %422 = vector.load %arg7[%c1_315, %c0_316, %c0_317] : memref<4x1x32xf32, #tpu.memory_space<vmem>>, vector<1x1x32xf32>
    %423 = vector.shape_cast %422 : vector<1x1x32xf32> to vector<1x32xf32>
    %424 = vector.broadcast %423 : vector<1x32xf32> to vector<8x32xf32>
    %425 = arith.addf %421, %424 : vector<8x32xf32>
    %426 = arith.negf %425 : vector<8x32xf32>
    %427 = math.exp %426 : vector<8x32xf32>
    %cst_318 = arith.constant 1.000000e+00 : f32
    %428 = vector.broadcast %cst_318 : f32 to vector<8x32xf32>
    %429 = arith.addf %428, %427 : vector<8x32xf32>
    %430 = arith.divf %428, %429 : vector<8x32xf32>
    %c2_319 = arith.constant 2 : index
    %c0_320 = arith.constant 0 : index
    %c0_321 = arith.constant 0 : index
    %431 = vector.load %arg5[%c2_319, %c0_320, %c0_321] : memref<3x32x32xf32, #tpu.memory_space<vmem>>, vector<1x32x32xf32>
    %432 = vector.shape_cast %431 : vector<1x32x32xf32> to vector<32x32xf32>
    %cst_322 = arith.constant dense<0.000000e+00> : vector<8x32xf32>
    %433 = tpu.matmul %398, %432, %cst_322 {dimension_numbers = #tpu.dot_dimension_numbers<[1], [0], [0], [1], [0, 0, 1, 1], [], []>} : vector<8x32xf32>, vector<32x32xf32>, vector<8x32xf32> -> vector<8x32xf32>
    %c2_323 = arith.constant 2 : index
    %c0_324 = arith.constant 0 : index
    %c0_325 = arith.constant 0 : index
    %434 = vector.load %arg7[%c2_323, %c0_324, %c0_325] : memref<4x1x32xf32, #tpu.memory_space<vmem>>, vector<1x1x32xf32>
    %435 = vector.shape_cast %434 : vector<1x1x32xf32> to vector<1x32xf32>
    %436 = vector.broadcast %435 : vector<1x32xf32> to vector<8x32xf32>
    %437 = arith.addf %433, %436 : vector<8x32xf32>
    %c2_326 = arith.constant 2 : index
    %c0_327 = arith.constant 0 : index
    %c0_328 = arith.constant 0 : index
    %438 = vector.load %arg6[%c2_326, %c0_327, %c0_328] : memref<3x32x32xf32, #tpu.memory_space<vmem>>, vector<1x32x32xf32>
    %439 = vector.shape_cast %438 : vector<1x32x32xf32> to vector<32x32xf32>
    %cst_329 = arith.constant dense<0.000000e+00> : vector<8x32xf32>
    %440 = tpu.matmul %339, %439, %cst_329 {dimension_numbers = #tpu.dot_dimension_numbers<[1], [0], [0], [1], [0, 0, 1, 1], [], []>} : vector<8x32xf32>, vector<32x32xf32>, vector<8x32xf32> -> vector<8x32xf32>
    %c3_330 = arith.constant 3 : index
    %c0_331 = arith.constant 0 : index
    %c0_332 = arith.constant 0 : index
    %441 = vector.load %arg7[%c3_330, %c0_331, %c0_332] : memref<4x1x32xf32, #tpu.memory_space<vmem>>, vector<1x1x32xf32>
    %442 = vector.shape_cast %441 : vector<1x1x32xf32> to vector<1x32xf32>
    %443 = vector.broadcast %442 : vector<1x32xf32> to vector<8x32xf32>
    %444 = arith.addf %440, %443 : vector<8x32xf32>
    %445 = arith.mulf %414, %444 : vector<8x32xf32>
    %446 = arith.addf %437, %445 : vector<8x32xf32>
    %447 = math.tanh %446 : vector<8x32xf32>
    %cst_333 = arith.constant 1.000000e+00 : f32
    %448 = vector.broadcast %cst_333 : f32 to vector<8x32xf32>
    %449 = arith.subf %448, %430 : vector<8x32xf32>
    %450 = arith.mulf %449, %447 : vector<8x32xf32>
    %451 = arith.mulf %430, %339 : vector<8x32xf32>
    %452 = arith.addf %450, %451 : vector<8x32xf32>
    %c0_334 = arith.constant 0 : index
    %c3_335 = arith.constant 3 : index
    %c0_336 = arith.constant 0 : index
    %453 = vector.load %arg8[%c0_334, %c3_335, %c0_336] : memref<8x8x32xf32, #tpu.memory_space<vmem>>, vector<8x1x32xf32>
    %454 = vector.shape_cast %453 : vector<8x1x32xf32> to vector<8x32xf32>
    %455 = vector.shape_cast %452 : vector<8x32xf32> to vector<8x1x32xf32>
    tpu.vector_store %arg8[%c0_334, %c3_335, %c0_336], %455 {strides = array<i32>} : memref<8x8x32xf32, #tpu.memory_space<vmem>>, vector<8x1x32xf32>,
    %c0_337 = arith.constant 0 : index
    %c4 = arith.constant 4 : index
    %c0_338 = arith.constant 0 : index
    %456 = vector.load %arg0[%c0_337, %c4, %c0_338] : memref<8x8x32xf32, #tpu.memory_space<vmem>>, vector<8x1x32xf32>
    %457 = vector.shape_cast %456 : vector<8x1x32xf32> to vector<8x32xf32>
    %c0_339 = arith.constant 0 : index
    %c0_340 = arith.constant 0 : index
    %c0_341 = arith.constant 0 : index
    %458 = vector.load %arg2[%c0_339, %c0_340, %c0_341] : memref<3x32x32xf32, #tpu.memory_space<vmem>>, vector<1x32x32xf32>
    %459 = vector.shape_cast %458 : vector<1x32x32xf32> to vector<32x32xf32>
    %cst_342 = arith.constant dense<0.000000e+00> : vector<8x32xf32>
    %460 = tpu.matmul %457, %459, %cst_342 {dimension_numbers = #tpu.dot_dimension_numbers<[1], [0], [0], [1], [0, 0, 1, 1], [], []>} : vector<8x32xf32>, vector<32x32xf32>, vector<8x32xf32> -> vector<8x32xf32>
    %c0_343 = arith.constant 0 : index
    %c0_344 = arith.constant 0 : index
    %c0_345 = arith.constant 0 : index
    %461 = vector.load %arg3[%c0_343, %c0_344, %c0_345] : memref<3x32x32xf32, #tpu.memory_space<vmem>>, vector<1x32x32xf32>
    %462 = vector.shape_cast %461 : vector<1x32x32xf32> to vector<32x32xf32>
    %cst_346 = arith.constant dense<0.000000e+00> : vector<8x32xf32>
    %463 = tpu.matmul %398, %462, %cst_346 {dimension_numbers = #tpu.dot_dimension_numbers<[1], [0], [0], [1], [0, 0, 1, 1], [], []>} : vector<8x32xf32>, vector<32x32xf32>, vector<8x32xf32> -> vector<8x32xf32>
    %464 = arith.addf %460, %463 : vector<8x32xf32>
    %c0_347 = arith.constant 0 : index
    %c0_348 = arith.constant 0 : index
    %c0_349 = arith.constant 0 : index
    %465 = vector.load %arg4[%c0_347, %c0_348, %c0_349] : memref<4x1x32xf32, #tpu.memory_space<vmem>>, vector<1x1x32xf32>
    %466 = vector.shape_cast %465 : vector<1x1x32xf32> to vector<1x32xf32>
    %467 = vector.broadcast %466 : vector<1x32xf32> to vector<8x32xf32>
    %468 = arith.addf %464, %467 : vector<8x32xf32>
    %469 = arith.negf %468 : vector<8x32xf32>
    %470 = math.exp %469 : vector<8x32xf32>
    %cst_350 = arith.constant 1.000000e+00 : f32
    %471 = vector.broadcast %cst_350 : f32 to vector<8x32xf32>
    %472 = arith.addf %471, %470 : vector<8x32xf32>
    %473 = arith.divf %471, %472 : vector<8x32xf32>
    %c1_351 = arith.constant 1 : index
    %c0_352 = arith.constant 0 : index
    %c0_353 = arith.constant 0 : index
    %474 = vector.load %arg2[%c1_351, %c0_352, %c0_353] : memref<3x32x32xf32, #tpu.memory_space<vmem>>, vector<1x32x32xf32>
    %475 = vector.shape_cast %474 : vector<1x32x32xf32> to vector<32x32xf32>
    %cst_354 = arith.constant dense<0.000000e+00> : vector<8x32xf32>
    %476 = tpu.matmul %457, %475, %cst_354 {dimension_numbers = #tpu.dot_dimension_numbers<[1], [0], [0], [1], [0, 0, 1, 1], [], []>} : vector<8x32xf32>, vector<32x32xf32>, vector<8x32xf32> -> vector<8x32xf32>
    %c1_355 = arith.constant 1 : index
    %c0_356 = arith.constant 0 : index
    %c0_357 = arith.constant 0 : index
    %477 = vector.load %arg3[%c1_355, %c0_356, %c0_357] : memref<3x32x32xf32, #tpu.memory_space<vmem>>, vector<1x32x32xf32>
    %478 = vector.shape_cast %477 : vector<1x32x32xf32> to vector<32x32xf32>
    %cst_358 = arith.constant dense<0.000000e+00> : vector<8x32xf32>
    %479 = tpu.matmul %398, %478, %cst_358 {dimension_numbers = #tpu.dot_dimension_numbers<[1], [0], [0], [1], [0, 0, 1, 1], [], []>} : vector<8x32xf32>, vector<32x32xf32>, vector<8x32xf32> -> vector<8x32xf32>
    %480 = arith.addf %476, %479 : vector<8x32xf32>
    %c1_359 = arith.constant 1 : index
    %c0_360 = arith.constant 0 : index
    %c0_361 = arith.constant 0 : index
    %481 = vector.load %arg4[%c1_359, %c0_360, %c0_361] : memref<4x1x32xf32, #tpu.memory_space<vmem>>, vector<1x1x32xf32>
    %482 = vector.shape_cast %481 : vector<1x1x32xf32> to vector<1x32xf32>
    %483 = vector.broadcast %482 : vector<1x32xf32> to vector<8x32xf32>
    %484 = arith.addf %480, %483 : vector<8x32xf32>
    %485 = arith.negf %484 : vector<8x32xf32>
    %486 = math.exp %485 : vector<8x32xf32>
    %cst_362 = arith.constant 1.000000e+00 : f32
    %487 = vector.broadcast %cst_362 : f32 to vector<8x32xf32>
    %488 = arith.addf %487, %486 : vector<8x32xf32>
    %489 = arith.divf %487, %488 : vector<8x32xf32>
    %c2_363 = arith.constant 2 : index
    %c0_364 = arith.constant 0 : index
    %c0_365 = arith.constant 0 : index
    %490 = vector.load %arg2[%c2_363, %c0_364, %c0_365] : memref<3x32x32xf32, #tpu.memory_space<vmem>>, vector<1x32x32xf32>
    %491 = vector.shape_cast %490 : vector<1x32x32xf32> to vector<32x32xf32>
    %cst_366 = arith.constant dense<0.000000e+00> : vector<8x32xf32>
    %492 = tpu.matmul %457, %491, %cst_366 {dimension_numbers = #tpu.dot_dimension_numbers<[1], [0], [0], [1], [0, 0, 1, 1], [], []>} : vector<8x32xf32>, vector<32x32xf32>, vector<8x32xf32> -> vector<8x32xf32>
    %c2_367 = arith.constant 2 : index
    %c0_368 = arith.constant 0 : index
    %c0_369 = arith.constant 0 : index
    %493 = vector.load %arg4[%c2_367, %c0_368, %c0_369] : memref<4x1x32xf32, #tpu.memory_space<vmem>>, vector<1x1x32xf32>
    %494 = vector.shape_cast %493 : vector<1x1x32xf32> to vector<1x32xf32>
    %495 = vector.broadcast %494 : vector<1x32xf32> to vector<8x32xf32>
    %496 = arith.addf %492, %495 : vector<8x32xf32>
    %c2_370 = arith.constant 2 : index
    %c0_371 = arith.constant 0 : index
    %c0_372 = arith.constant 0 : index
    %497 = vector.load %arg3[%c2_370, %c0_371, %c0_372] : memref<3x32x32xf32, #tpu.memory_space<vmem>>, vector<1x32x32xf32>
    %498 = vector.shape_cast %497 : vector<1x32x32xf32> to vector<32x32xf32>
    %cst_373 = arith.constant dense<0.000000e+00> : vector<8x32xf32>
    %499 = tpu.matmul %398, %498, %cst_373 {dimension_numbers = #tpu.dot_dimension_numbers<[1], [0], [0], [1], [0, 0, 1, 1], [], []>} : vector<8x32xf32>, vector<32x32xf32>, vector<8x32xf32> -> vector<8x32xf32>
    %c3_374 = arith.constant 3 : index
    %c0_375 = arith.constant 0 : index
    %c0_376 = arith.constant 0 : index
    %500 = vector.load %arg4[%c3_374, %c0_375, %c0_376] : memref<4x1x32xf32, #tpu.memory_space<vmem>>, vector<1x1x32xf32>
    %501 = vector.shape_cast %500 : vector<1x1x32xf32> to vector<1x32xf32>
    %502 = vector.broadcast %501 : vector<1x32xf32> to vector<8x32xf32>
    %503 = arith.addf %499, %502 : vector<8x32xf32>
    %504 = arith.mulf %473, %503 : vector<8x32xf32>
    %505 = arith.addf %496, %504 : vector<8x32xf32>
    %506 = math.tanh %505 : vector<8x32xf32>
    %cst_377 = arith.constant 1.000000e+00 : f32
    %507 = vector.broadcast %cst_377 : f32 to vector<8x32xf32>
    %508 = arith.subf %507, %489 : vector<8x32xf32>
    %509 = arith.mulf %508, %506 : vector<8x32xf32>
    %510 = arith.mulf %489, %398 : vector<8x32xf32>
    %511 = arith.addf %509, %510 : vector<8x32xf32>
    %c0_378 = arith.constant 0 : index
    %c0_379 = arith.constant 0 : index
    %c0_380 = arith.constant 0 : index
    %512 = vector.load %arg5[%c0_378, %c0_379, %c0_380] : memref<3x32x32xf32, #tpu.memory_space<vmem>>, vector<1x32x32xf32>
    %513 = vector.shape_cast %512 : vector<1x32x32xf32> to vector<32x32xf32>
    %cst_381 = arith.constant dense<0.000000e+00> : vector<8x32xf32>
    %514 = tpu.matmul %511, %513, %cst_381 {dimension_numbers = #tpu.dot_dimension_numbers<[1], [0], [0], [1], [0, 0, 1, 1], [], []>} : vector<8x32xf32>, vector<32x32xf32>, vector<8x32xf32> -> vector<8x32xf32>
    %c0_382 = arith.constant 0 : index
    %c0_383 = arith.constant 0 : index
    %c0_384 = arith.constant 0 : index
    %515 = vector.load %arg6[%c0_382, %c0_383, %c0_384] : memref<3x32x32xf32, #tpu.memory_space<vmem>>, vector<1x32x32xf32>
    %516 = vector.shape_cast %515 : vector<1x32x32xf32> to vector<32x32xf32>
    %cst_385 = arith.constant dense<0.000000e+00> : vector<8x32xf32>
    %517 = tpu.matmul %452, %516, %cst_385 {dimension_numbers = #tpu.dot_dimension_numbers<[1], [0], [0], [1], [0, 0, 1, 1], [], []>} : vector<8x32xf32>, vector<32x32xf32>, vector<8x32xf32> -> vector<8x32xf32>
    %518 = arith.addf %514, %517 : vector<8x32xf32>
    %c0_386 = arith.constant 0 : index
    %c0_387 = arith.constant 0 : index
    %c0_388 = arith.constant 0 : index
    %519 = vector.load %arg7[%c0_386, %c0_387, %c0_388] : memref<4x1x32xf32, #tpu.memory_space<vmem>>, vector<1x1x32xf32>
    %520 = vector.shape_cast %519 : vector<1x1x32xf32> to vector<1x32xf32>
    %521 = vector.broadcast %520 : vector<1x32xf32> to vector<8x32xf32>
    %522 = arith.addf %518, %521 : vector<8x32xf32>
    %523 = arith.negf %522 : vector<8x32xf32>
    %524 = math.exp %523 : vector<8x32xf32>
    %cst_389 = arith.constant 1.000000e+00 : f32
    %525 = vector.broadcast %cst_389 : f32 to vector<8x32xf32>
    %526 = arith.addf %525, %524 : vector<8x32xf32>
    %527 = arith.divf %525, %526 : vector<8x32xf32>
    %c1_390 = arith.constant 1 : index
    %c0_391 = arith.constant 0 : index
    %c0_392 = arith.constant 0 : index
    %528 = vector.load %arg5[%c1_390, %c0_391, %c0_392] : memref<3x32x32xf32, #tpu.memory_space<vmem>>, vector<1x32x32xf32>
    %529 = vector.shape_cast %528 : vector<1x32x32xf32> to vector<32x32xf32>
    %cst_393 = arith.constant dense<0.000000e+00> : vector<8x32xf32>
    %530 = tpu.matmul %511, %529, %cst_393 {dimension_numbers = #tpu.dot_dimension_numbers<[1], [0], [0], [1], [0, 0, 1, 1], [], []>} : vector<8x32xf32>, vector<32x32xf32>, vector<8x32xf32> -> vector<8x32xf32>
    %c1_394 = arith.constant 1 : index
    %c0_395 = arith.constant 0 : index
    %c0_396 = arith.constant 0 : index
    %531 = vector.load %arg6[%c1_394, %c0_395, %c0_396] : memref<3x32x32xf32, #tpu.memory_space<vmem>>, vector<1x32x32xf32>
    %532 = vector.shape_cast %531 : vector<1x32x32xf32> to vector<32x32xf32>
    %cst_397 = arith.constant dense<0.000000e+00> : vector<8x32xf32>
    %533 = tpu.matmul %452, %532, %cst_397 {dimension_numbers = #tpu.dot_dimension_numbers<[1], [0], [0], [1], [0, 0, 1, 1], [], []>} : vector<8x32xf32>, vector<32x32xf32>, vector<8x32xf32> -> vector<8x32xf32>
    %534 = arith.addf %530, %533 : vector<8x32xf32>
    %c1_398 = arith.constant 1 : index
    %c0_399 = arith.constant 0 : index
    %c0_400 = arith.constant 0 : index
    %535 = vector.load %arg7[%c1_398, %c0_399, %c0_400] : memref<4x1x32xf32, #tpu.memory_space<vmem>>, vector<1x1x32xf32>
    %536 = vector.shape_cast %535 : vector<1x1x32xf32> to vector<1x32xf32>
    %537 = vector.broadcast %536 : vector<1x32xf32> to vector<8x32xf32>
    %538 = arith.addf %534, %537 : vector<8x32xf32>
    %539 = arith.negf %538 : vector<8x32xf32>
    %540 = math.exp %539 : vector<8x32xf32>
    %cst_401 = arith.constant 1.000000e+00 : f32
    %541 = vector.broadcast %cst_401 : f32 to vector<8x32xf32>
    %542 = arith.addf %541, %540 : vector<8x32xf32>
    %543 = arith.divf %541, %542 : vector<8x32xf32>
    %c2_402 = arith.constant 2 : index
    %c0_403 = arith.constant 0 : index
    %c0_404 = arith.constant 0 : index
    %544 = vector.load %arg5[%c2_402, %c0_403, %c0_404] : memref<3x32x32xf32, #tpu.memory_space<vmem>>, vector<1x32x32xf32>
    %545 = vector.shape_cast %544 : vector<1x32x32xf32> to vector<32x32xf32>
    %cst_405 = arith.constant dense<0.000000e+00> : vector<8x32xf32>
    %546 = tpu.matmul %511, %545, %cst_405 {dimension_numbers = #tpu.dot_dimension_numbers<[1], [0], [0], [1], [0, 0, 1, 1], [], []>} : vector<8x32xf32>, vector<32x32xf32>, vector<8x32xf32> -> vector<8x32xf32>
    %c2_406 = arith.constant 2 : index
    %c0_407 = arith.constant 0 : index
    %c0_408 = arith.constant 0 : index
    %547 = vector.load %arg7[%c2_406, %c0_407, %c0_408] : memref<4x1x32xf32, #tpu.memory_space<vmem>>, vector<1x1x32xf32>
    %548 = vector.shape_cast %547 : vector<1x1x32xf32> to vector<1x32xf32>
    %549 = vector.broadcast %548 : vector<1x32xf32> to vector<8x32xf32>
    %550 = arith.addf %546, %549 : vector<8x32xf32>
    %c2_409 = arith.constant 2 : index
    %c0_410 = arith.constant 0 : index
    %c0_411 = arith.constant 0 : index
    %551 = vector.load %arg6[%c2_409, %c0_410, %c0_411] : memref<3x32x32xf32, #tpu.memory_space<vmem>>, vector<1x32x32xf32>
    %552 = vector.shape_cast %551 : vector<1x32x32xf32> to vector<32x32xf32>
    %cst_412 = arith.constant dense<0.000000e+00> : vector<8x32xf32>
    %553 = tpu.matmul %452, %552, %cst_412 {dimension_numbers = #tpu.dot_dimension_numbers<[1], [0], [0], [1], [0, 0, 1, 1], [], []>} : vector<8x32xf32>, vector<32x32xf32>, vector<8x32xf32> -> vector<8x32xf32>
    %c3_413 = arith.constant 3 : index
    %c0_414 = arith.constant 0 : index
    %c0_415 = arith.constant 0 : index
    %554 = vector.load %arg7[%c3_413, %c0_414, %c0_415] : memref<4x1x32xf32, #tpu.memory_space<vmem>>, vector<1x1x32xf32>
    %555 = vector.shape_cast %554 : vector<1x1x32xf32> to vector<1x32xf32>
    %556 = vector.broadcast %555 : vector<1x32xf32> to vector<8x32xf32>
    %557 = arith.addf %553, %556 : vector<8x32xf32>
    %558 = arith.mulf %527, %557 : vector<8x32xf32>
    %559 = arith.addf %550, %558 : vector<8x32xf32>
    %560 = math.tanh %559 : vector<8x32xf32>
    %cst_416 = arith.constant 1.000000e+00 : f32
    %561 = vector.broadcast %cst_416 : f32 to vector<8x32xf32>
    %562 = arith.subf %561, %543 : vector<8x32xf32>
    %563 = arith.mulf %562, %560 : vector<8x32xf32>
    %564 = arith.mulf %543, %452 : vector<8x32xf32>
    %565 = arith.addf %563, %564 : vector<8x32xf32>
    %c0_417 = arith.constant 0 : index
    %c4_418 = arith.constant 4 : index
    %c0_419 = arith.constant 0 : index
    %566 = vector.load %arg8[%c0_417, %c4_418, %c0_419] : memref<8x8x32xf32, #tpu.memory_space<vmem>>, vector<8x1x32xf32>
    %567 = vector.shape_cast %566 : vector<8x1x32xf32> to vector<8x32xf32>
    %568 = vector.shape_cast %565 : vector<8x32xf32> to vector<8x1x32xf32>
    tpu.vector_store %arg8[%c0_417, %c4_418, %c0_419], %568 {strides = array<i32>} : memref<8x8x32xf32, #tpu.memory_space<vmem>>, vector<8x1x32xf32>,
    %c0_420 = arith.constant 0 : index
    %c5 = arith.constant 5 : index
    %c0_421 = arith.constant 0 : index
    %569 = vector.load %arg0[%c0_420, %c5, %c0_421] : memref<8x8x32xf32, #tpu.memory_space<vmem>>, vector<8x1x32xf32>
    %570 = vector.shape_cast %569 : vector<8x1x32xf32> to vector<8x32xf32>
    %c0_422 = arith.constant 0 : index
    %c0_423 = arith.constant 0 : index
    %c0_424 = arith.constant 0 : index
    %571 = vector.load %arg2[%c0_422, %c0_423, %c0_424] : memref<3x32x32xf32, #tpu.memory_space<vmem>>, vector<1x32x32xf32>
    %572 = vector.shape_cast %571 : vector<1x32x32xf32> to vector<32x32xf32>
    %cst_425 = arith.constant dense<0.000000e+00> : vector<8x32xf32>
    %573 = tpu.matmul %570, %572, %cst_425 {dimension_numbers = #tpu.dot_dimension_numbers<[1], [0], [0], [1], [0, 0, 1, 1], [], []>} : vector<8x32xf32>, vector<32x32xf32>, vector<8x32xf32> -> vector<8x32xf32>
    %c0_426 = arith.constant 0 : index
    %c0_427 = arith.constant 0 : index
    %c0_428 = arith.constant 0 : index
    %574 = vector.load %arg3[%c0_426, %c0_427, %c0_428] : memref<3x32x32xf32, #tpu.memory_space<vmem>>, vector<1x32x32xf32>
    %575 = vector.shape_cast %574 : vector<1x32x32xf32> to vector<32x32xf32>
    %cst_429 = arith.constant dense<0.000000e+00> : vector<8x32xf32>
    %576 = tpu.matmul %511, %575, %cst_429 {dimension_numbers = #tpu.dot_dimension_numbers<[1], [0], [0], [1], [0, 0, 1, 1], [], []>} : vector<8x32xf32>, vector<32x32xf32>, vector<8x32xf32> -> vector<8x32xf32>
    %577 = arith.addf %573, %576 : vector<8x32xf32>
    %c0_430 = arith.constant 0 : index
    %c0_431 = arith.constant 0 : index
    %c0_432 = arith.constant 0 : index
    %578 = vector.load %arg4[%c0_430, %c0_431, %c0_432] : memref<4x1x32xf32, #tpu.memory_space<vmem>>, vector<1x1x32xf32>
    %579 = vector.shape_cast %578 : vector<1x1x32xf32> to vector<1x32xf32>
    %580 = vector.broadcast %579 : vector<1x32xf32> to vector<8x32xf32>
    %581 = arith.addf %577, %580 : vector<8x32xf32>
    %582 = arith.negf %581 : vector<8x32xf32>
    %583 = math.exp %582 : vector<8x32xf32>
    %cst_433 = arith.constant 1.000000e+00 : f32
    %584 = vector.broadcast %cst_433 : f32 to vector<8x32xf32>
    %585 = arith.addf %584, %583 : vector<8x32xf32>
    %586 = arith.divf %584, %585 : vector<8x32xf32>
    %c1_434 = arith.constant 1 : index
    %c0_435 = arith.constant 0 : index
    %c0_436 = arith.constant 0 : index
    %587 = vector.load %arg2[%c1_434, %c0_435, %c0_436] : memref<3x32x32xf32, #tpu.memory_space<vmem>>, vector<1x32x32xf32>
    %588 = vector.shape_cast %587 : vector<1x32x32xf32> to vector<32x32xf32>
    %cst_437 = arith.constant dense<0.000000e+00> : vector<8x32xf32>
    %589 = tpu.matmul %570, %588, %cst_437 {dimension_numbers = #tpu.dot_dimension_numbers<[1], [0], [0], [1], [0, 0, 1, 1], [], []>} : vector<8x32xf32>, vector<32x32xf32>, vector<8x32xf32> -> vector<8x32xf32>
    %c1_438 = arith.constant 1 : index
    %c0_439 = arith.constant 0 : index
    %c0_440 = arith.constant 0 : index
    %590 = vector.load %arg3[%c1_438, %c0_439, %c0_440] : memref<3x32x32xf32, #tpu.memory_space<vmem>>, vector<1x32x32xf32>
    %591 = vector.shape_cast %590 : vector<1x32x32xf32> to vector<32x32xf32>
    %cst_441 = arith.constant dense<0.000000e+00> : vector<8x32xf32>
    %592 = tpu.matmul %511, %591, %cst_441 {dimension_numbers = #tpu.dot_dimension_numbers<[1], [0], [0], [1], [0, 0, 1, 1], [], []>} : vector<8x32xf32>, vector<32x32xf32>, vector<8x32xf32> -> vector<8x32xf32>
    %593 = arith.addf %589, %592 : vector<8x32xf32>
    %c1_442 = arith.constant 1 : index
    %c0_443 = arith.constant 0 : index
    %c0_444 = arith.constant 0 : index
    %594 = vector.load %arg4[%c1_442, %c0_443, %c0_444] : memref<4x1x32xf32, #tpu.memory_space<vmem>>, vector<1x1x32xf32>
    %595 = vector.shape_cast %594 : vector<1x1x32xf32> to vector<1x32xf32>
    %596 = vector.broadcast %595 : vector<1x32xf32> to vector<8x32xf32>
    %597 = arith.addf %593, %596 : vector<8x32xf32>
    %598 = arith.negf %597 : vector<8x32xf32>
    %599 = math.exp %598 : vector<8x32xf32>
    %cst_445 = arith.constant 1.000000e+00 : f32
    %600 = vector.broadcast %cst_445 : f32 to vector<8x32xf32>
    %601 = arith.addf %600, %599 : vector<8x32xf32>
    %602 = arith.divf %600, %601 : vector<8x32xf32>
    %c2_446 = arith.constant 2 : index
    %c0_447 = arith.constant 0 : index
    %c0_448 = arith.constant 0 : index
    %603 = vector.load %arg2[%c2_446, %c0_447, %c0_448] : memref<3x32x32xf32, #tpu.memory_space<vmem>>, vector<1x32x32xf32>
    %604 = vector.shape_cast %603 : vector<1x32x32xf32> to vector<32x32xf32>
    %cst_449 = arith.constant dense<0.000000e+00> : vector<8x32xf32>
    %605 = tpu.matmul %570, %604, %cst_449 {dimension_numbers = #tpu.dot_dimension_numbers<[1], [0], [0], [1], [0, 0, 1, 1], [], []>} : vector<8x32xf32>, vector<32x32xf32>, vector<8x32xf32> -> vector<8x32xf32>
    %c2_450 = arith.constant 2 : index
    %c0_451 = arith.constant 0 : index
    %c0_452 = arith.constant 0 : index
    %606 = vector.load %arg4[%c2_450, %c0_451, %c0_452] : memref<4x1x32xf32, #tpu.memory_space<vmem>>, vector<1x1x32xf32>
    %607 = vector.shape_cast %606 : vector<1x1x32xf32> to vector<1x32xf32>
    %608 = vector.broadcast %607 : vector<1x32xf32> to vector<8x32xf32>
    %609 = arith.addf %605, %608 : vector<8x32xf32>
    %c2_453 = arith.constant 2 : index
    %c0_454 = arith.constant 0 : index
    %c0_455 = arith.constant 0 : index
    %610 = vector.load %arg3[%c2_453, %c0_454, %c0_455] : memref<3x32x32xf32, #tpu.memory_space<vmem>>, vector<1x32x32xf32>
    %611 = vector.shape_cast %610 : vector<1x32x32xf32> to vector<32x32xf32>
    %cst_456 = arith.constant dense<0.000000e+00> : vector<8x32xf32>
    %612 = tpu.matmul %511, %611, %cst_456 {dimension_numbers = #tpu.dot_dimension_numbers<[1], [0], [0], [1], [0, 0, 1, 1], [], []>} : vector<8x32xf32>, vector<32x32xf32>, vector<8x32xf32> -> vector<8x32xf32>
    %c3_457 = arith.constant 3 : index
    %c0_458 = arith.constant 0 : index
    %c0_459 = arith.constant 0 : index
    %613 = vector.load %arg4[%c3_457, %c0_458, %c0_459] : memref<4x1x32xf32, #tpu.memory_space<vmem>>, vector<1x1x32xf32>
    %614 = vector.shape_cast %613 : vector<1x1x32xf32> to vector<1x32xf32>
    %615 = vector.broadcast %614 : vector<1x32xf32> to vector<8x32xf32>
    %616 = arith.addf %612, %615 : vector<8x32xf32>
    %617 = arith.mulf %586, %616 : vector<8x32xf32>
    %618 = arith.addf %609, %617 : vector<8x32xf32>
    %619 = math.tanh %618 : vector<8x32xf32>
    %cst_460 = arith.constant 1.000000e+00 : f32
    %620 = vector.broadcast %cst_460 : f32 to vector<8x32xf32>
    %621 = arith.subf %620, %602 : vector<8x32xf32>
    %622 = arith.mulf %621, %619 : vector<8x32xf32>
    %623 = arith.mulf %602, %511 : vector<8x32xf32>
    %624 = arith.addf %622, %623 : vector<8x32xf32>
    %c0_461 = arith.constant 0 : index
    %c0_462 = arith.constant 0 : index
    %c0_463 = arith.constant 0 : index
    %625 = vector.load %arg5[%c0_461, %c0_462, %c0_463] : memref<3x32x32xf32, #tpu.memory_space<vmem>>, vector<1x32x32xf32>
    %626 = vector.shape_cast %625 : vector<1x32x32xf32> to vector<32x32xf32>
    %cst_464 = arith.constant dense<0.000000e+00> : vector<8x32xf32>
    %627 = tpu.matmul %624, %626, %cst_464 {dimension_numbers = #tpu.dot_dimension_numbers<[1], [0], [0], [1], [0, 0, 1, 1], [], []>} : vector<8x32xf32>, vector<32x32xf32>, vector<8x32xf32> -> vector<8x32xf32>
    %c0_465 = arith.constant 0 : index
    %c0_466 = arith.constant 0 : index
    %c0_467 = arith.constant 0 : index
    %628 = vector.load %arg6[%c0_465, %c0_466, %c0_467] : memref<3x32x32xf32, #tpu.memory_space<vmem>>, vector<1x32x32xf32>
    %629 = vector.shape_cast %628 : vector<1x32x32xf32> to vector<32x32xf32>
    %cst_468 = arith.constant dense<0.000000e+00> : vector<8x32xf32>
    %630 = tpu.matmul %565, %629, %cst_468 {dimension_numbers = #tpu.dot_dimension_numbers<[1], [0], [0], [1], [0, 0, 1, 1], [], []>} : vector<8x32xf32>, vector<32x32xf32>, vector<8x32xf32> -> vector<8x32xf32>
    %631 = arith.addf %627, %630 : vector<8x32xf32>
    %c0_469 = arith.constant 0 : index
    %c0_470 = arith.constant 0 : index
    %c0_471 = arith.constant 0 : index
    %632 = vector.load %arg7[%c0_469, %c0_470, %c0_471] : memref<4x1x32xf32, #tpu.memory_space<vmem>>, vector<1x1x32xf32>
    %633 = vector.shape_cast %632 : vector<1x1x32xf32> to vector<1x32xf32>
    %634 = vector.broadcast %633 : vector<1x32xf32> to vector<8x32xf32>
    %635 = arith.addf %631, %634 : vector<8x32xf32>
    %636 = arith.negf %635 : vector<8x32xf32>
    %637 = math.exp %636 : vector<8x32xf32>
    %cst_472 = arith.constant 1.000000e+00 : f32
    %638 = vector.broadcast %cst_472 : f32 to vector<8x32xf32>
    %639 = arith.addf %638, %637 : vector<8x32xf32>
    %640 = arith.divf %638, %639 : vector<8x32xf32>
    %c1_473 = arith.constant 1 : index
    %c0_474 = arith.constant 0 : index
    %c0_475 = arith.constant 0 : index
    %641 = vector.load %arg5[%c1_473, %c0_474, %c0_475] : memref<3x32x32xf32, #tpu.memory_space<vmem>>, vector<1x32x32xf32>
    %642 = vector.shape_cast %641 : vector<1x32x32xf32> to vector<32x32xf32>
    %cst_476 = arith.constant dense<0.000000e+00> : vector<8x32xf32>
    %643 = tpu.matmul %624, %642, %cst_476 {dimension_numbers = #tpu.dot_dimension_numbers<[1], [0], [0], [1], [0, 0, 1, 1], [], []>} : vector<8x32xf32>, vector<32x32xf32>, vector<8x32xf32> -> vector<8x32xf32>
    %c1_477 = arith.constant 1 : index
    %c0_478 = arith.constant 0 : index
    %c0_479 = arith.constant 0 : index
    %644 = vector.load %arg6[%c1_477, %c0_478, %c0_479] : memref<3x32x32xf32, #tpu.memory_space<vmem>>, vector<1x32x32xf32>
    %645 = vector.shape_cast %644 : vector<1x32x32xf32> to vector<32x32xf32>
    %cst_480 = arith.constant dense<0.000000e+00> : vector<8x32xf32>
    %646 = tpu.matmul %565, %645, %cst_480 {dimension_numbers = #tpu.dot_dimension_numbers<[1], [0], [0], [1], [0, 0, 1, 1], [], []>} : vector<8x32xf32>, vector<32x32xf32>, vector<8x32xf32> -> vector<8x32xf32>
    %647 = arith.addf %643, %646 : vector<8x32xf32>
    %c1_481 = arith.constant 1 : index
    %c0_482 = arith.constant 0 : index
    %c0_483 = arith.constant 0 : index
    %648 = vector.load %arg7[%c1_481, %c0_482, %c0_483] : memref<4x1x32xf32, #tpu.memory_space<vmem>>, vector<1x1x32xf32>
    %649 = vector.shape_cast %648 : vector<1x1x32xf32> to vector<1x32xf32>
    %650 = vector.broadcast %649 : vector<1x32xf32> to vector<8x32xf32>
    %651 = arith.addf %647, %650 : vector<8x32xf32>
    %652 = arith.negf %651 : vector<8x32xf32>
    %653 = math.exp %652 : vector<8x32xf32>
    %cst_484 = arith.constant 1.000000e+00 : f32
    %654 = vector.broadcast %cst_484 : f32 to vector<8x32xf32>
    %655 = arith.addf %654, %653 : vector<8x32xf32>
    %656 = arith.divf %654, %655 : vector<8x32xf32>
    %c2_485 = arith.constant 2 : index
    %c0_486 = arith.constant 0 : index
    %c0_487 = arith.constant 0 : index
    %657 = vector.load %arg5[%c2_485, %c0_486, %c0_487] : memref<3x32x32xf32, #tpu.memory_space<vmem>>, vector<1x32x32xf32>
    %658 = vector.shape_cast %657 : vector<1x32x32xf32> to vector<32x32xf32>
    %cst_488 = arith.constant dense<0.000000e+00> : vector<8x32xf32>
    %659 = tpu.matmul %624, %658, %cst_488 {dimension_numbers = #tpu.dot_dimension_numbers<[1], [0], [0], [1], [0, 0, 1, 1], [], []>} : vector<8x32xf32>, vector<32x32xf32>, vector<8x32xf32> -> vector<8x32xf32>
    %c2_489 = arith.constant 2 : index
    %c0_490 = arith.constant 0 : index
    %c0_491 = arith.constant 0 : index
    %660 = vector.load %arg7[%c2_489, %c0_490, %c0_491] : memref<4x1x32xf32, #tpu.memory_space<vmem>>, vector<1x1x32xf32>
    %661 = vector.shape_cast %660 : vector<1x1x32xf32> to vector<1x32xf32>
    %662 = vector.broadcast %661 : vector<1x32xf32> to vector<8x32xf32>
    %663 = arith.addf %659, %662 : vector<8x32xf32>
    %c2_492 = arith.constant 2 : index
    %c0_493 = arith.constant 0 : index
    %c0_494 = arith.constant 0 : index
    %664 = vector.load %arg6[%c2_492, %c0_493, %c0_494] : memref<3x32x32xf32, #tpu.memory_space<vmem>>, vector<1x32x32xf32>
    %665 = vector.shape_cast %664 : vector<1x32x32xf32> to vector<32x32xf32>
    %cst_495 = arith.constant dense<0.000000e+00> : vector<8x32xf32>
    %666 = tpu.matmul %565, %665, %cst_495 {dimension_numbers = #tpu.dot_dimension_numbers<[1], [0], [0], [1], [0, 0, 1, 1], [], []>} : vector<8x32xf32>, vector<32x32xf32>, vector<8x32xf32> -> vector<8x32xf32>
    %c3_496 = arith.constant 3 : index
    %c0_497 = arith.constant 0 : index
    %c0_498 = arith.constant 0 : index
    %667 = vector.load %arg7[%c3_496, %c0_497, %c0_498] : memref<4x1x32xf32, #tpu.memory_space<vmem>>, vector<1x1x32xf32>
    %668 = vector.shape_cast %667 : vector<1x1x32xf32> to vector<1x32xf32>
    %669 = vector.broadcast %668 : vector<1x32xf32> to vector<8x32xf32>
    %670 = arith.addf %666, %669 : vector<8x32xf32>
    %671 = arith.mulf %640, %670 : vector<8x32xf32>
    %672 = arith.addf %663, %671 : vector<8x32xf32>
    %673 = math.tanh %672 : vector<8x32xf32>
    %cst_499 = arith.constant 1.000000e+00 : f32
    %674 = vector.broadcast %cst_499 : f32 to vector<8x32xf32>
    %675 = arith.subf %674, %656 : vector<8x32xf32>
    %676 = arith.mulf %675, %673 : vector<8x32xf32>
    %677 = arith.mulf %656, %565 : vector<8x32xf32>
    %678 = arith.addf %676, %677 : vector<8x32xf32>
    %c0_500 = arith.constant 0 : index
    %c5_501 = arith.constant 5 : index
    %c0_502 = arith.constant 0 : index
    %679 = vector.load %arg8[%c0_500, %c5_501, %c0_502] : memref<8x8x32xf32, #tpu.memory_space<vmem>>, vector<8x1x32xf32>
    %680 = vector.shape_cast %679 : vector<8x1x32xf32> to vector<8x32xf32>
    %681 = vector.shape_cast %678 : vector<8x32xf32> to vector<8x1x32xf32>
    tpu.vector_store %arg8[%c0_500, %c5_501, %c0_502], %681 {strides = array<i32>} : memref<8x8x32xf32, #tpu.memory_space<vmem>>, vector<8x1x32xf32>,
    %c0_503 = arith.constant 0 : index
    %c6 = arith.constant 6 : index
    %c0_504 = arith.constant 0 : index
    %682 = vector.load %arg0[%c0_503, %c6, %c0_504] : memref<8x8x32xf32, #tpu.memory_space<vmem>>, vector<8x1x32xf32>
    %683 = vector.shape_cast %682 : vector<8x1x32xf32> to vector<8x32xf32>
    %c0_505 = arith.constant 0 : index
    %c0_506 = arith.constant 0 : index
    %c0_507 = arith.constant 0 : index
    %684 = vector.load %arg2[%c0_505, %c0_506, %c0_507] : memref<3x32x32xf32, #tpu.memory_space<vmem>>, vector<1x32x32xf32>
    %685 = vector.shape_cast %684 : vector<1x32x32xf32> to vector<32x32xf32>
    %cst_508 = arith.constant dense<0.000000e+00> : vector<8x32xf32>
    %686 = tpu.matmul %683, %685, %cst_508 {dimension_numbers = #tpu.dot_dimension_numbers<[1], [0], [0], [1], [0, 0, 1, 1], [], []>} : vector<8x32xf32>, vector<32x32xf32>, vector<8x32xf32> -> vector<8x32xf32>
    %c0_509 = arith.constant 0 : index
    %c0_510 = arith.constant 0 : index
    %c0_511 = arith.constant 0 : index
    %687 = vector.load %arg3[%c0_509, %c0_510, %c0_511] : memref<3x32x32xf32, #tpu.memory_space<vmem>>, vector<1x32x32xf32>
    %688 = vector.shape_cast %687 : vector<1x32x32xf32> to vector<32x32xf32>
    %cst_512 = arith.constant dense<0.000000e+00> : vector<8x32xf32>
    %689 = tpu.matmul %624, %688, %cst_512 {dimension_numbers = #tpu.dot_dimension_numbers<[1], [0], [0], [1], [0, 0, 1, 1], [], []>} : vector<8x32xf32>, vector<32x32xf32>, vector<8x32xf32> -> vector<8x32xf32>
    %690 = arith.addf %686, %689 : vector<8x32xf32>
    %c0_513 = arith.constant 0 : index
    %c0_514 = arith.constant 0 : index
    %c0_515 = arith.constant 0 : index
    %691 = vector.load %arg4[%c0_513, %c0_514, %c0_515] : memref<4x1x32xf32, #tpu.memory_space<vmem>>, vector<1x1x32xf32>
    %692 = vector.shape_cast %691 : vector<1x1x32xf32> to vector<1x32xf32>
    %693 = vector.broadcast %692 : vector<1x32xf32> to vector<8x32xf32>
    %694 = arith.addf %690, %693 : vector<8x32xf32>
    %695 = arith.negf %694 : vector<8x32xf32>
    %696 = math.exp %695 : vector<8x32xf32>
    %cst_516 = arith.constant 1.000000e+00 : f32
    %697 = vector.broadcast %cst_516 : f32 to vector<8x32xf32>
    %698 = arith.addf %697, %696 : vector<8x32xf32>
    %699 = arith.divf %697, %698 : vector<8x32xf32>
    %c1_517 = arith.constant 1 : index
    %c0_518 = arith.constant 0 : index
    %c0_519 = arith.constant 0 : index
    %700 = vector.load %arg2[%c1_517, %c0_518, %c0_519] : memref<3x32x32xf32, #tpu.memory_space<vmem>>, vector<1x32x32xf32>
    %701 = vector.shape_cast %700 : vector<1x32x32xf32> to vector<32x32xf32>
    %cst_520 = arith.constant dense<0.000000e+00> : vector<8x32xf32>
    %702 = tpu.matmul %683, %701, %cst_520 {dimension_numbers = #tpu.dot_dimension_numbers<[1], [0], [0], [1], [0, 0, 1, 1], [], []>} : vector<8x32xf32>, vector<32x32xf32>, vector<8x32xf32> -> vector<8x32xf32>
    %c1_521 = arith.constant 1 : index
    %c0_522 = arith.constant 0 : index
    %c0_523 = arith.constant 0 : index
    %703 = vector.load %arg3[%c1_521, %c0_522, %c0_523] : memref<3x32x32xf32, #tpu.memory_space<vmem>>, vector<1x32x32xf32>
    %704 = vector.shape_cast %703 : vector<1x32x32xf32> to vector<32x32xf32>
    %cst_524 = arith.constant dense<0.000000e+00> : vector<8x32xf32>
    %705 = tpu.matmul %624, %704, %cst_524 {dimension_numbers = #tpu.dot_dimension_numbers<[1], [0], [0], [1], [0, 0, 1, 1], [], []>} : vector<8x32xf32>, vector<32x32xf32>, vector<8x32xf32> -> vector<8x32xf32>
    %706 = arith.addf %702, %705 : vector<8x32xf32>
    %c1_525 = arith.constant 1 : index
    %c0_526 = arith.constant 0 : index
    %c0_527 = arith.constant 0 : index
    %707 = vector.load %arg4[%c1_525, %c0_526, %c0_527] : memref<4x1x32xf32, #tpu.memory_space<vmem>>, vector<1x1x32xf32>
    %708 = vector.shape_cast %707 : vector<1x1x32xf32> to vector<1x32xf32>
    %709 = vector.broadcast %708 : vector<1x32xf32> to vector<8x32xf32>
    %710 = arith.addf %706, %709 : vector<8x32xf32>
    %711 = arith.negf %710 : vector<8x32xf32>
    %712 = math.exp %711 : vector<8x32xf32>
    %cst_528 = arith.constant 1.000000e+00 : f32
    %713 = vector.broadcast %cst_528 : f32 to vector<8x32xf32>
    %714 = arith.addf %713, %712 : vector<8x32xf32>
    %715 = arith.divf %713, %714 : vector<8x32xf32>
    %c2_529 = arith.constant 2 : index
    %c0_530 = arith.constant 0 : index
    %c0_531 = arith.constant 0 : index
    %716 = vector.load %arg2[%c2_529, %c0_530, %c0_531] : memref<3x32x32xf32, #tpu.memory_space<vmem>>, vector<1x32x32xf32>
    %717 = vector.shape_cast %716 : vector<1x32x32xf32> to vector<32x32xf32>
    %cst_532 = arith.constant dense<0.000000e+00> : vector<8x32xf32>
    %718 = tpu.matmul %683, %717, %cst_532 {dimension_numbers = #tpu.dot_dimension_numbers<[1], [0], [0], [1], [0, 0, 1, 1], [], []>} : vector<8x32xf32>, vector<32x32xf32>, vector<8x32xf32> -> vector<8x32xf32>
    %c2_533 = arith.constant 2 : index
    %c0_534 = arith.constant 0 : index
    %c0_535 = arith.constant 0 : index
    %719 = vector.load %arg4[%c2_533, %c0_534, %c0_535] : memref<4x1x32xf32, #tpu.memory_space<vmem>>, vector<1x1x32xf32>
    %720 = vector.shape_cast %719 : vector<1x1x32xf32> to vector<1x32xf32>
    %721 = vector.broadcast %720 : vector<1x32xf32> to vector<8x32xf32>
    %722 = arith.addf %718, %721 : vector<8x32xf32>
    %c2_536 = arith.constant 2 : index
    %c0_537 = arith.constant 0 : index
    %c0_538 = arith.constant 0 : index
    %723 = vector.load %arg3[%c2_536, %c0_537, %c0_538] : memref<3x32x32xf32, #tpu.memory_space<vmem>>, vector<1x32x32xf32>
    %724 = vector.shape_cast %723 : vector<1x32x32xf32> to vector<32x32xf32>
    %cst_539 = arith.constant dense<0.000000e+00> : vector<8x32xf32>
    %725 = tpu.matmul %624, %724, %cst_539 {dimension_numbers = #tpu.dot_dimension_numbers<[1], [0], [0], [1], [0, 0, 1, 1], [], []>} : vector<8x32xf32>, vector<32x32xf32>, vector<8x32xf32> -> vector<8x32xf32>
    %c3_540 = arith.constant 3 : index
    %c0_541 = arith.constant 0 : index
    %c0_542 = arith.constant 0 : index
    %726 = vector.load %arg4[%c3_540, %c0_541, %c0_542] : memref<4x1x32xf32, #tpu.memory_space<vmem>>, vector<1x1x32xf32>
    %727 = vector.shape_cast %726 : vector<1x1x32xf32> to vector<1x32xf32>
    %728 = vector.broadcast %727 : vector<1x32xf32> to vector<8x32xf32>
    %729 = arith.addf %725, %728 : vector<8x32xf32>
    %730 = arith.mulf %699, %729 : vector<8x32xf32>
    %731 = arith.addf %722, %730 : vector<8x32xf32>
    %732 = math.tanh %731 : vector<8x32xf32>
    %cst_543 = arith.constant 1.000000e+00 : f32
    %733 = vector.broadcast %cst_543 : f32 to vector<8x32xf32>
    %734 = arith.subf %733, %715 : vector<8x32xf32>
    %735 = arith.mulf %734, %732 : vector<8x32xf32>
    %736 = arith.mulf %715, %624 : vector<8x32xf32>
    %737 = arith.addf %735, %736 : vector<8x32xf32>
    %c0_544 = arith.constant 0 : index
    %c0_545 = arith.constant 0 : index
    %c0_546 = arith.constant 0 : index
    %738 = vector.load %arg5[%c0_544, %c0_545, %c0_546] : memref<3x32x32xf32, #tpu.memory_space<vmem>>, vector<1x32x32xf32>
    %739 = vector.shape_cast %738 : vector<1x32x32xf32> to vector<32x32xf32>
    %cst_547 = arith.constant dense<0.000000e+00> : vector<8x32xf32>
    %740 = tpu.matmul %737, %739, %cst_547 {dimension_numbers = #tpu.dot_dimension_numbers<[1], [0], [0], [1], [0, 0, 1, 1], [], []>} : vector<8x32xf32>, vector<32x32xf32>, vector<8x32xf32> -> vector<8x32xf32>
    %c0_548 = arith.constant 0 : index
    %c0_549 = arith.constant 0 : index
    %c0_550 = arith.constant 0 : index
    %741 = vector.load %arg6[%c0_548, %c0_549, %c0_550] : memref<3x32x32xf32, #tpu.memory_space<vmem>>, vector<1x32x32xf32>
    %742 = vector.shape_cast %741 : vector<1x32x32xf32> to vector<32x32xf32>
    %cst_551 = arith.constant dense<0.000000e+00> : vector<8x32xf32>
    %743 = tpu.matmul %678, %742, %cst_551 {dimension_numbers = #tpu.dot_dimension_numbers<[1], [0], [0], [1], [0, 0, 1, 1], [], []>} : vector<8x32xf32>, vector<32x32xf32>, vector<8x32xf32> -> vector<8x32xf32>
    %744 = arith.addf %740, %743 : vector<8x32xf32>
    %c0_552 = arith.constant 0 : index
    %c0_553 = arith.constant 0 : index
    %c0_554 = arith.constant 0 : index
    %745 = vector.load %arg7[%c0_552, %c0_553, %c0_554] : memref<4x1x32xf32, #tpu.memory_space<vmem>>, vector<1x1x32xf32>
    %746 = vector.shape_cast %745 : vector<1x1x32xf32> to vector<1x32xf32>
    %747 = vector.broadcast %746 : vector<1x32xf32> to vector<8x32xf32>
    %748 = arith.addf %744, %747 : vector<8x32xf32>
    %749 = arith.negf %748 : vector<8x32xf32>
    %750 = math.exp %749 : vector<8x32xf32>
    %cst_555 = arith.constant 1.000000e+00 : f32
    %751 = vector.broadcast %cst_555 : f32 to vector<8x32xf32>
    %752 = arith.addf %751, %750 : vector<8x32xf32>
    %753 = arith.divf %751, %752 : vector<8x32xf32>
    %c1_556 = arith.constant 1 : index
    %c0_557 = arith.constant 0 : index
    %c0_558 = arith.constant 0 : index
    %754 = vector.load %arg5[%c1_556, %c0_557, %c0_558] : memref<3x32x32xf32, #tpu.memory_space<vmem>>, vector<1x32x32xf32>
    %755 = vector.shape_cast %754 : vector<1x32x32xf32> to vector<32x32xf32>
    %cst_559 = arith.constant dense<0.000000e+00> : vector<8x32xf32>
    %756 = tpu.matmul %737, %755, %cst_559 {dimension_numbers = #tpu.dot_dimension_numbers<[1], [0], [0], [1], [0, 0, 1, 1], [], []>} : vector<8x32xf32>, vector<32x32xf32>, vector<8x32xf32> -> vector<8x32xf32>
    %c1_560 = arith.constant 1 : index
    %c0_561 = arith.constant 0 : index
    %c0_562 = arith.constant 0 : index
    %757 = vector.load %arg6[%c1_560, %c0_561, %c0_562] : memref<3x32x32xf32, #tpu.memory_space<vmem>>, vector<1x32x32xf32>
    %758 = vector.shape_cast %757 : vector<1x32x32xf32> to vector<32x32xf32>
    %cst_563 = arith.constant dense<0.000000e+00> : vector<8x32xf32>
    %759 = tpu.matmul %678, %758, %cst_563 {dimension_numbers = #tpu.dot_dimension_numbers<[1], [0], [0], [1], [0, 0, 1, 1], [], []>} : vector<8x32xf32>, vector<32x32xf32>, vector<8x32xf32> -> vector<8x32xf32>
    %760 = arith.addf %756, %759 : vector<8x32xf32>
    %c1_564 = arith.constant 1 : index
    %c0_565 = arith.constant 0 : index
    %c0_566 = arith.constant 0 : index
    %761 = vector.load %arg7[%c1_564, %c0_565, %c0_566] : memref<4x1x32xf32, #tpu.memory_space<vmem>>, vector<1x1x32xf32>
    %762 = vector.shape_cast %761 : vector<1x1x32xf32> to vector<1x32xf32>
    %763 = vector.broadcast %762 : vector<1x32xf32> to vector<8x32xf32>
    %764 = arith.addf %760, %763 : vector<8x32xf32>
    %765 = arith.negf %764 : vector<8x32xf32>
    %766 = math.exp %765 : vector<8x32xf32>
    %cst_567 = arith.constant 1.000000e+00 : f32
    %767 = vector.broadcast %cst_567 : f32 to vector<8x32xf32>
    %768 = arith.addf %767, %766 : vector<8x32xf32>
    %769 = arith.divf %767, %768 : vector<8x32xf32>
    %c2_568 = arith.constant 2 : index
    %c0_569 = arith.constant 0 : index
    %c0_570 = arith.constant 0 : index
    %770 = vector.load %arg5[%c2_568, %c0_569, %c0_570] : memref<3x32x32xf32, #tpu.memory_space<vmem>>, vector<1x32x32xf32>
    %771 = vector.shape_cast %770 : vector<1x32x32xf32> to vector<32x32xf32>
    %cst_571 = arith.constant dense<0.000000e+00> : vector<8x32xf32>
    %772 = tpu.matmul %737, %771, %cst_571 {dimension_numbers = #tpu.dot_dimension_numbers<[1], [0], [0], [1], [0, 0, 1, 1], [], []>} : vector<8x32xf32>, vector<32x32xf32>, vector<8x32xf32> -> vector<8x32xf32>
    %c2_572 = arith.constant 2 : index
    %c0_573 = arith.constant 0 : index
    %c0_574 = arith.constant 0 : index
    %773 = vector.load %arg7[%c2_572, %c0_573, %c0_574] : memref<4x1x32xf32, #tpu.memory_space<vmem>>, vector<1x1x32xf32>
    %774 = vector.shape_cast %773 : vector<1x1x32xf32> to vector<1x32xf32>
    %775 = vector.broadcast %774 : vector<1x32xf32> to vector<8x32xf32>
    %776 = arith.addf %772, %775 : vector<8x32xf32>
    %c2_575 = arith.constant 2 : index
    %c0_576 = arith.constant 0 : index
    %c0_577 = arith.constant 0 : index
    %777 = vector.load %arg6[%c2_575, %c0_576, %c0_577] : memref<3x32x32xf32, #tpu.memory_space<vmem>>, vector<1x32x32xf32>
    %778 = vector.shape_cast %777 : vector<1x32x32xf32> to vector<32x32xf32>
    %cst_578 = arith.constant dense<0.000000e+00> : vector<8x32xf32>
    %779 = tpu.matmul %678, %778, %cst_578 {dimension_numbers = #tpu.dot_dimension_numbers<[1], [0], [0], [1], [0, 0, 1, 1], [], []>} : vector<8x32xf32>, vector<32x32xf32>, vector<8x32xf32> -> vector<8x32xf32>
    %c3_579 = arith.constant 3 : index
    %c0_580 = arith.constant 0 : index
    %c0_581 = arith.constant 0 : index
    %780 = vector.load %arg7[%c3_579, %c0_580, %c0_581] : memref<4x1x32xf32, #tpu.memory_space<vmem>>, vector<1x1x32xf32>
    %781 = vector.shape_cast %780 : vector<1x1x32xf32> to vector<1x32xf32>
    %782 = vector.broadcast %781 : vector<1x32xf32> to vector<8x32xf32>
    %783 = arith.addf %779, %782 : vector<8x32xf32>
    %784 = arith.mulf %753, %783 : vector<8x32xf32>
    %785 = arith.addf %776, %784 : vector<8x32xf32>
    %786 = math.tanh %785 : vector<8x32xf32>
    %cst_582 = arith.constant 1.000000e+00 : f32
    %787 = vector.broadcast %cst_582 : f32 to vector<8x32xf32>
    %788 = arith.subf %787, %769 : vector<8x32xf32>
    %789 = arith.mulf %788, %786 : vector<8x32xf32>
    %790 = arith.mulf %769, %678 : vector<8x32xf32>
    %791 = arith.addf %789, %790 : vector<8x32xf32>
    %c0_583 = arith.constant 0 : index
    %c6_584 = arith.constant 6 : index
    %c0_585 = arith.constant 0 : index
    %792 = vector.load %arg8[%c0_583, %c6_584, %c0_585] : memref<8x8x32xf32, #tpu.memory_space<vmem>>, vector<8x1x32xf32>
    %793 = vector.shape_cast %792 : vector<8x1x32xf32> to vector<8x32xf32>
    %794 = vector.shape_cast %791 : vector<8x32xf32> to vector<8x1x32xf32>
    tpu.vector_store %arg8[%c0_583, %c6_584, %c0_585], %794 {strides = array<i32>} : memref<8x8x32xf32, #tpu.memory_space<vmem>>, vector<8x1x32xf32>,
    %c0_586 = arith.constant 0 : index
    %c7 = arith.constant 7 : index
    %c0_587 = arith.constant 0 : index
    %795 = vector.load %arg0[%c0_586, %c7, %c0_587] : memref<8x8x32xf32, #tpu.memory_space<vmem>>, vector<8x1x32xf32>
    %796 = vector.shape_cast %795 : vector<8x1x32xf32> to vector<8x32xf32>
    %c0_588 = arith.constant 0 : index
    %c0_589 = arith.constant 0 : index
    %c0_590 = arith.constant 0 : index
    %797 = vector.load %arg2[%c0_588, %c0_589, %c0_590] : memref<3x32x32xf32, #tpu.memory_space<vmem>>, vector<1x32x32xf32>
    %798 = vector.shape_cast %797 : vector<1x32x32xf32> to vector<32x32xf32>
    %cst_591 = arith.constant dense<0.000000e+00> : vector<8x32xf32>
    %799 = tpu.matmul %796, %798, %cst_591 {dimension_numbers = #tpu.dot_dimension_numbers<[1], [0], [0], [1], [0, 0, 1, 1], [], []>} : vector<8x32xf32>, vector<32x32xf32>, vector<8x32xf32> -> vector<8x32xf32>
    %c0_592 = arith.constant 0 : index
    %c0_593 = arith.constant 0 : index
    %c0_594 = arith.constant 0 : index
    %800 = vector.load %arg3[%c0_592, %c0_593, %c0_594] : memref<3x32x32xf32, #tpu.memory_space<vmem>>, vector<1x32x32xf32>
    %801 = vector.shape_cast %800 : vector<1x32x32xf32> to vector<32x32xf32>
    %cst_595 = arith.constant dense<0.000000e+00> : vector<8x32xf32>
    %802 = tpu.matmul %737, %801, %cst_595 {dimension_numbers = #tpu.dot_dimension_numbers<[1], [0], [0], [1], [0, 0, 1, 1], [], []>} : vector<8x32xf32>, vector<32x32xf32>, vector<8x32xf32> -> vector<8x32xf32>
    %803 = arith.addf %799, %802 : vector<8x32xf32>
    %c0_596 = arith.constant 0 : index
    %c0_597 = arith.constant 0 : index
    %c0_598 = arith.constant 0 : index
    %804 = vector.load %arg4[%c0_596, %c0_597, %c0_598] : memref<4x1x32xf32, #tpu.memory_space<vmem>>, vector<1x1x32xf32>
    %805 = vector.shape_cast %804 : vector<1x1x32xf32> to vector<1x32xf32>
    %806 = vector.broadcast %805 : vector<1x32xf32> to vector<8x32xf32>
    %807 = arith.addf %803, %806 : vector<8x32xf32>
    %808 = arith.negf %807 : vector<8x32xf32>
    %809 = math.exp %808 : vector<8x32xf32>
    %cst_599 = arith.constant 1.000000e+00 : f32
    %810 = vector.broadcast %cst_599 : f32 to vector<8x32xf32>
    %811 = arith.addf %810, %809 : vector<8x32xf32>
    %812 = arith.divf %810, %811 : vector<8x32xf32>
    %c1_600 = arith.constant 1 : index
    %c0_601 = arith.constant 0 : index
    %c0_602 = arith.constant 0 : index
    %813 = vector.load %arg2[%c1_600, %c0_601, %c0_602] : memref<3x32x32xf32, #tpu.memory_space<vmem>>, vector<1x32x32xf32>
    %814 = vector.shape_cast %813 : vector<1x32x32xf32> to vector<32x32xf32>
    %cst_603 = arith.constant dense<0.000000e+00> : vector<8x32xf32>
    %815 = tpu.matmul %796, %814, %cst_603 {dimension_numbers = #tpu.dot_dimension_numbers<[1], [0], [0], [1], [0, 0, 1, 1], [], []>} : vector<8x32xf32>, vector<32x32xf32>, vector<8x32xf32> -> vector<8x32xf32>
    %c1_604 = arith.constant 1 : index
    %c0_605 = arith.constant 0 : index
    %c0_606 = arith.constant 0 : index
    %816 = vector.load %arg3[%c1_604, %c0_605, %c0_606] : memref<3x32x32xf32, #tpu.memory_space<vmem>>, vector<1x32x32xf32>
    %817 = vector.shape_cast %816 : vector<1x32x32xf32> to vector<32x32xf32>
    %cst_607 = arith.constant dense<0.000000e+00> : vector<8x32xf32>
    %818 = tpu.matmul %737, %817, %cst_607 {dimension_numbers = #tpu.dot_dimension_numbers<[1], [0], [0], [1], [0, 0, 1, 1], [], []>} : vector<8x32xf32>, vector<32x32xf32>, vector<8x32xf32> -> vector<8x32xf32>
    %819 = arith.addf %815, %818 : vector<8x32xf32>
    %c1_608 = arith.constant 1 : index
    %c0_609 = arith.constant 0 : index
    %c0_610 = arith.constant 0 : index
    %820 = vector.load %arg4[%c1_608, %c0_609, %c0_610] : memref<4x1x32xf32, #tpu.memory_space<vmem>>, vector<1x1x32xf32>
    %821 = vector.shape_cast %820 : vector<1x1x32xf32> to vector<1x32xf32>
    %822 = vector.broadcast %821 : vector<1x32xf32> to vector<8x32xf32>
    %823 = arith.addf %819, %822 : vector<8x32xf32>
    %824 = arith.negf %823 : vector<8x32xf32>
    %825 = math.exp %824 : vector<8x32xf32>
    %cst_611 = arith.constant 1.000000e+00 : f32
    %826 = vector.broadcast %cst_611 : f32 to vector<8x32xf32>
    %827 = arith.addf %826, %825 : vector<8x32xf32>
    %828 = arith.divf %826, %827 : vector<8x32xf32>
    %c2_612 = arith.constant 2 : index
    %c0_613 = arith.constant 0 : index
    %c0_614 = arith.constant 0 : index
    %829 = vector.load %arg2[%c2_612, %c0_613, %c0_614] : memref<3x32x32xf32, #tpu.memory_space<vmem>>, vector<1x32x32xf32>
    %830 = vector.shape_cast %829 : vector<1x32x32xf32> to vector<32x32xf32>
    %cst_615 = arith.constant dense<0.000000e+00> : vector<8x32xf32>
    %831 = tpu.matmul %796, %830, %cst_615 {dimension_numbers = #tpu.dot_dimension_numbers<[1], [0], [0], [1], [0, 0, 1, 1], [], []>} : vector<8x32xf32>, vector<32x32xf32>, vector<8x32xf32> -> vector<8x32xf32>
    %c2_616 = arith.constant 2 : index
    %c0_617 = arith.constant 0 : index
    %c0_618 = arith.constant 0 : index
    %832 = vector.load %arg4[%c2_616, %c0_617, %c0_618] : memref<4x1x32xf32, #tpu.memory_space<vmem>>, vector<1x1x32xf32>
    %833 = vector.shape_cast %832 : vector<1x1x32xf32> to vector<1x32xf32>
    %834 = vector.broadcast %833 : vector<1x32xf32> to vector<8x32xf32>
    %835 = arith.addf %831, %834 : vector<8x32xf32>
    %c2_619 = arith.constant 2 : index
    %c0_620 = arith.constant 0 : index
    %c0_621 = arith.constant 0 : index
    %836 = vector.load %arg3[%c2_619, %c0_620, %c0_621] : memref<3x32x32xf32, #tpu.memory_space<vmem>>, vector<1x32x32xf32>
    %837 = vector.shape_cast %836 : vector<1x32x32xf32> to vector<32x32xf32>
    %cst_622 = arith.constant dense<0.000000e+00> : vector<8x32xf32>
    %838 = tpu.matmul %737, %837, %cst_622 {dimension_numbers = #tpu.dot_dimension_numbers<[1], [0], [0], [1], [0, 0, 1, 1], [], []>} : vector<8x32xf32>, vector<32x32xf32>, vector<8x32xf32> -> vector<8x32xf32>
    %c3_623 = arith.constant 3 : index
    %c0_624 = arith.constant 0 : index
    %c0_625 = arith.constant 0 : index
    %839 = vector.load %arg4[%c3_623, %c0_624, %c0_625] : memref<4x1x32xf32, #tpu.memory_space<vmem>>, vector<1x1x32xf32>
    %840 = vector.shape_cast %839 : vector<1x1x32xf32> to vector<1x32xf32>
    %841 = vector.broadcast %840 : vector<1x32xf32> to vector<8x32xf32>
    %842 = arith.addf %838, %841 : vector<8x32xf32>
    %843 = arith.mulf %812, %842 : vector<8x32xf32>
    %844 = arith.addf %835, %843 : vector<8x32xf32>
    %845 = math.tanh %844 : vector<8x32xf32>
    %cst_626 = arith.constant 1.000000e+00 : f32
    %846 = vector.broadcast %cst_626 : f32 to vector<8x32xf32>
    %847 = arith.subf %846, %828 : vector<8x32xf32>
    %848 = arith.mulf %847, %845 : vector<8x32xf32>
    %849 = arith.mulf %828, %737 : vector<8x32xf32>
    %850 = arith.addf %848, %849 : vector<8x32xf32>
    %c0_627 = arith.constant 0 : index
    %c0_628 = arith.constant 0 : index
    %c0_629 = arith.constant 0 : index
    %851 = vector.load %arg5[%c0_627, %c0_628, %c0_629] : memref<3x32x32xf32, #tpu.memory_space<vmem>>, vector<1x32x32xf32>
    %852 = vector.shape_cast %851 : vector<1x32x32xf32> to vector<32x32xf32>
    %cst_630 = arith.constant dense<0.000000e+00> : vector<8x32xf32>
    %853 = tpu.matmul %850, %852, %cst_630 {dimension_numbers = #tpu.dot_dimension_numbers<[1], [0], [0], [1], [0, 0, 1, 1], [], []>} : vector<8x32xf32>, vector<32x32xf32>, vector<8x32xf32> -> vector<8x32xf32>
    %c0_631 = arith.constant 0 : index
    %c0_632 = arith.constant 0 : index
    %c0_633 = arith.constant 0 : index
    %854 = vector.load %arg6[%c0_631, %c0_632, %c0_633] : memref<3x32x32xf32, #tpu.memory_space<vmem>>, vector<1x32x32xf32>
    %855 = vector.shape_cast %854 : vector<1x32x32xf32> to vector<32x32xf32>
    %cst_634 = arith.constant dense<0.000000e+00> : vector<8x32xf32>
    %856 = tpu.matmul %791, %855, %cst_634 {dimension_numbers = #tpu.dot_dimension_numbers<[1], [0], [0], [1], [0, 0, 1, 1], [], []>} : vector<8x32xf32>, vector<32x32xf32>, vector<8x32xf32> -> vector<8x32xf32>
    %857 = arith.addf %853, %856 : vector<8x32xf32>
    %c0_635 = arith.constant 0 : index
    %c0_636 = arith.constant 0 : index
    %c0_637 = arith.constant 0 : index
    %858 = vector.load %arg7[%c0_635, %c0_636, %c0_637] : memref<4x1x32xf32, #tpu.memory_space<vmem>>, vector<1x1x32xf32>
    %859 = vector.shape_cast %858 : vector<1x1x32xf32> to vector<1x32xf32>
    %860 = vector.broadcast %859 : vector<1x32xf32> to vector<8x32xf32>
    %861 = arith.addf %857, %860 : vector<8x32xf32>
    %862 = arith.negf %861 : vector<8x32xf32>
    %863 = math.exp %862 : vector<8x32xf32>
    %cst_638 = arith.constant 1.000000e+00 : f32
    %864 = vector.broadcast %cst_638 : f32 to vector<8x32xf32>
    %865 = arith.addf %864, %863 : vector<8x32xf32>
    %866 = arith.divf %864, %865 : vector<8x32xf32>
    %c1_639 = arith.constant 1 : index
    %c0_640 = arith.constant 0 : index
    %c0_641 = arith.constant 0 : index
    %867 = vector.load %arg5[%c1_639, %c0_640, %c0_641] : memref<3x32x32xf32, #tpu.memory_space<vmem>>, vector<1x32x32xf32>
    %868 = vector.shape_cast %867 : vector<1x32x32xf32> to vector<32x32xf32>
    %cst_642 = arith.constant dense<0.000000e+00> : vector<8x32xf32>
    %869 = tpu.matmul %850, %868, %cst_642 {dimension_numbers = #tpu.dot_dimension_numbers<[1], [0], [0], [1], [0, 0, 1, 1], [], []>} : vector<8x32xf32>, vector<32x32xf32>, vector<8x32xf32> -> vector<8x32xf32>
    %c1_643 = arith.constant 1 : index
    %c0_644 = arith.constant 0 : index
    %c0_645 = arith.constant 0 : index
    %870 = vector.load %arg6[%c1_643, %c0_644, %c0_645] : memref<3x32x32xf32, #tpu.memory_space<vmem>>, vector<1x32x32xf32>
    %871 = vector.shape_cast %870 : vector<1x32x32xf32> to vector<32x32xf32>
    %cst_646 = arith.constant dense<0.000000e+00> : vector<8x32xf32>
    %872 = tpu.matmul %791, %871, %cst_646 {dimension_numbers = #tpu.dot_dimension_numbers<[1], [0], [0], [1], [0, 0, 1, 1], [], []>} : vector<8x32xf32>, vector<32x32xf32>, vector<8x32xf32> -> vector<8x32xf32>
    %873 = arith.addf %869, %872 : vector<8x32xf32>
    %c1_647 = arith.constant 1 : index
    %c0_648 = arith.constant 0 : index
    %c0_649 = arith.constant 0 : index
    %874 = vector.load %arg7[%c1_647, %c0_648, %c0_649] : memref<4x1x32xf32, #tpu.memory_space<vmem>>, vector<1x1x32xf32>
    %875 = vector.shape_cast %874 : vector<1x1x32xf32> to vector<1x32xf32>
    %876 = vector.broadcast %875 : vector<1x32xf32> to vector<8x32xf32>
    %877 = arith.addf %873, %876 : vector<8x32xf32>
    %878 = arith.negf %877 : vector<8x32xf32>
    %879 = math.exp %878 : vector<8x32xf32>
    %cst_650 = arith.constant 1.000000e+00 : f32
    %880 = vector.broadcast %cst_650 : f32 to vector<8x32xf32>
    %881 = arith.addf %880, %879 : vector<8x32xf32>
    %882 = arith.divf %880, %881 : vector<8x32xf32>
    %c2_651 = arith.constant 2 : index
    %c0_652 = arith.constant 0 : index
    %c0_653 = arith.constant 0 : index
    %883 = vector.load %arg5[%c2_651, %c0_652, %c0_653] : memref<3x32x32xf32, #tpu.memory_space<vmem>>, vector<1x32x32xf32>
    %884 = vector.shape_cast %883 : vector<1x32x32xf32> to vector<32x32xf32>
    %cst_654 = arith.constant dense<0.000000e+00> : vector<8x32xf32>
    %885 = tpu.matmul %850, %884, %cst_654 {dimension_numbers = #tpu.dot_dimension_numbers<[1], [0], [0], [1], [0, 0, 1, 1], [], []>} : vector<8x32xf32>, vector<32x32xf32>, vector<8x32xf32> -> vector<8x32xf32>
    %c2_655 = arith.constant 2 : index
    %c0_656 = arith.constant 0 : index
    %c0_657 = arith.constant 0 : index
    %886 = vector.load %arg7[%c2_655, %c0_656, %c0_657] : memref<4x1x32xf32, #tpu.memory_space<vmem>>, vector<1x1x32xf32>
    %887 = vector.shape_cast %886 : vector<1x1x32xf32> to vector<1x32xf32>
    %888 = vector.broadcast %887 : vector<1x32xf32> to vector<8x32xf32>
    %889 = arith.addf %885, %888 : vector<8x32xf32>
    %c2_658 = arith.constant 2 : index
    %c0_659 = arith.constant 0 : index
    %c0_660 = arith.constant 0 : index
    %890 = vector.load %arg6[%c2_658, %c0_659, %c0_660] : memref<3x32x32xf32, #tpu.memory_space<vmem>>, vector<1x32x32xf32>
    %891 = vector.shape_cast %890 : vector<1x32x32xf32> to vector<32x32xf32>
    %cst_661 = arith.constant dense<0.000000e+00> : vector<8x32xf32>
    %892 = tpu.matmul %791, %891, %cst_661 {dimension_numbers = #tpu.dot_dimension_numbers<[1], [0], [0], [1], [0, 0, 1, 1], [], []>} : vector<8x32xf32>, vector<32x32xf32>, vector<8x32xf32> -> vector<8x32xf32>
    %c3_662 = arith.constant 3 : index
    %c0_663 = arith.constant 0 : index
    %c0_664 = arith.constant 0 : index
    %893 = vector.load %arg7[%c3_662, %c0_663, %c0_664] : memref<4x1x32xf32, #tpu.memory_space<vmem>>, vector<1x1x32xf32>
    %894 = vector.shape_cast %893 : vector<1x1x32xf32> to vector<1x32xf32>
    %895 = vector.broadcast %894 : vector<1x32xf32> to vector<8x32xf32>
    %896 = arith.addf %892, %895 : vector<8x32xf32>
    %897 = arith.mulf %866, %896 : vector<8x32xf32>
    %898 = arith.addf %889, %897 : vector<8x32xf32>
    %899 = math.tanh %898 : vector<8x32xf32>
    %cst_665 = arith.constant 1.000000e+00 : f32
    %900 = vector.broadcast %cst_665 : f32 to vector<8x32xf32>
    %901 = arith.subf %900, %882 : vector<8x32xf32>
    %902 = arith.mulf %901, %899 : vector<8x32xf32>
    %903 = arith.mulf %882, %791 : vector<8x32xf32>
    %904 = arith.addf %902, %903 : vector<8x32xf32>
    %c0_666 = arith.constant 0 : index
    %c7_667 = arith.constant 7 : index
    %c0_668 = arith.constant 0 : index
    %905 = vector.load %arg8[%c0_666, %c7_667, %c0_668] : memref<8x8x32xf32, #tpu.memory_space<vmem>>, vector<8x1x32xf32>
    %906 = vector.shape_cast %905 : vector<8x1x32xf32> to vector<8x32xf32>
    %907 = vector.shape_cast %904 : vector<8x32xf32> to vector<8x1x32xf32>
    tpu.vector_store %arg8[%c0_666, %c7_667, %c0_668], %907 {strides = array<i32>} : memref<8x8x32xf32, #tpu.memory_space<vmem>>, vector<8x1x32xf32>,
    return
  }
}

</mosaic_0001>

<bundles_post_ra>
// kernel: gru_forward_pallas.1
= control target key start
LH: loop header
LB: loop body
LE: loop exit
PB: predicated region body
PF: predicated region fallthrough
CT: control target
= control target key end

     0   :  { %13 = vsyncpa [#allocation3], 0  ;;  %s13095_s0 = inlined_call_operand.hbm [shape: f32[8,8,32], index: 0, kind: input, shape index: {}]   ;;  %s13096_s1 = inlined_call_operand.hbm [shape: f32[2,8,32], index: 1, kind: input, shape index: {}]   ;;  %s13097_s2 = inlined_call_operand.hbm [shape: f32[3,32,32], index: 2, kind: input, shape index: {}]   ;;  %s13098_s3 = inlined_call_operand.hbm [shape: f32[3,32,32], index: 3, kind: input, shape index: {}]   ;;  %s13099_s4 = inlined_call_operand.vmem [shape: f32[4,1,32], index: 4, kind: input, shape index: {}]   ;;  %s13100_s5 = inlined_call_operand.hbm [shape: f32[3,32,32], index: 5, kind: input, shape index: {}]   ;;  %s13101_s6 = inlined_call_operand.hbm [shape: f32[3,32,32], index: 6, kind: input, shape index: {}]   ;;  %s13102_s7 = inlined_call_operand.vmem [shape: f32[4,1,32], index: 7, kind: input, shape index: {}]   ;;  %s13103_s8 = inlined_call_operand.hbm [shape: f32[8,8,32], index: 8, kind: output, shape index: {}]  }
   0x1   :  { %14 = vsyncpa [#allocation6], 0 }
   0x2   :  { %15 = vsyncpa [#allocation9], 0 }
   0x3   :  { %16 = vsyncpa [#allocation12], 0 }
   0x4   :  { %17 = vsyncpa [#allocation4], 0  ;;  %s11563_s27 = smov [#allocation5]   ;;  %s11564_s29 = smov [#allocation8]  }
   0x5   :  { %s35_s28 = sshll.u32 %s11563_s27, 4  ;;  %s59_s30 = sshll.u32 %s11564_s29, 4  ;;  %s36_s28 = int_to_ptr.vmem [resolvable:$true] %s35_s28  ;;  %s11621_s30 = int_to_ptr.vmem [resolvable:$true] %s59_s30 }
   0x6   :  { %s11399_s11 = scalar_lea.hbm %s13096_s1, 256 }
   0x7   :  { %p11400_p0 = scmp.ne.s32.totalorder %s13096_s1, %s11399_s11  ;;  %p11403_p1 = scmp.lt.u32.totalorder %s11399_s11, %s13096_s1 }
   0x9   :  { %p11405_p2 = pnand %p11403_p1, %p11400_p0 }
   0xb   :  { %11408 = shalt.err (!%p11405_p2)
}
   0xc   :  { %s11409_s16 = scalar_lea.vmem %s36_s28, 256  ;;  %p11414_p4 = scmp.lt.s32.totalorder %s36_s28, %s36_s28 }
   0xd   :  { %p11410_p3 = scmp.ne.s32.totalorder %s36_s28, %s11409_s16  ;;  %p11415_p5 = scmp.lt.s32.totalorder %s11409_s16, %s11409_s16 }
   0xf   :  { %p11416_p6 = por %p11415_p5, %p11414_p4 }
  0x11   :  { %p11417_p7 = pnand %p11416_p6, %p11410_p3 }
  0x13   :  { %11420 = shalt.err (!%p11417_p7)
}
  0x14   :  { %s11565_s17 = smov 128   ;;  %s11566_s18 = smov 8  }
  0x15   :  { %41 = dma.hbm_to_vmem [thread:$0]  %s13096_s1, 256, %s36_s28, [#allocation6], %s11565_s17, %s11565_s17, %s11566_s18  }
  0x16   :  { %s11421_s23 = scalar_lea.hbm %s13098_s3, 1536 }
  0x17   :  { %p11422_p8 = scmp.ne.s32.totalorder %s13098_s3, %s11421_s23  ;;  %p11425_p9 = scmp.lt.u32.totalorder %s11421_s23, %s13098_s3 }
  0x19   :  { %p11427_p10 = pnand %p11425_p9, %p11422_p8 }
  0x1b   :  { %11430 = shalt.err (!%p11427_p10)
}
  0x1c   :  { %s11431_s29 = scalar_lea.vmem %s11621_s30, 1536  ;;  %p11436_p12 = scmp.lt.s32.totalorder %s11621_s30, %s11621_s30 }
  0x1d   :  { %p11432_p11 = scmp.ne.s32.totalorder %s11621_s30, %s11431_s29  ;;  %p11437_p13 = scmp.lt.s32.totalorder %s11431_s29, %s11431_s29 }
  0x1f   :  { %p11438_p0 = por %p11437_p13, %p11436_p12 }
  0x21   :  { %p11439_p1 = pnand %p11438_p0, %p11432_p11 }
  0x23   :  { %11442 = shalt.err (!%p11439_p1)
}
  0x24   :  { %65 = dma.hbm_to_vmem [thread:$0]  %s13098_s3, 1536, %s11621_s30, [#allocation9], %s11565_s17, %s11565_s17, %s11566_s18  }
  0x25   :  { %s11567_s9 = smov [#allocation2]   ;;  %s11568_s11 = smov [#allocation7]  }
  0x26   :  { %s23_s10 = sshll.u32 %s11567_s9, 4  ;;  %s47_s12 = sshll.u32 %s11568_s11, 4  ;;  %s24_s10 = int_to_ptr.vmem [resolvable:$true] %s23_s10  ;;  %s11658_s12 = int_to_ptr.vmem [resolvable:$true] %s47_s12 }
  0x27   :  { %s11443_s15 = scalar_lea.hbm %s13095_s0, 1024 }
  0x28   :  { %p11444_p2 = scmp.ne.s32.totalorder %s13095_s0, %s11443_s15  ;;  %p11447_p3 = scmp.lt.u32.totalorder %s11443_s15, %s13095_s0 }
  0x2a   :  { %p11449_p4 = pnand %p11447_p3, %p11444_p2 }
  0x2c   :  { %11452 = shalt.err (!%p11449_p4)
}
  0x2d   :  { %s11453_s3 = scalar_lea.vmem %s24_s10, 1024  ;;  %p11458_p6 = scmp.lt.s32.totalorder %s24_s10, %s24_s10 }
  0x2e   :  { %p11454_p5 = scmp.ne.s32.totalorder %s24_s10, %s11453_s3  ;;  %p11459_p7 = scmp.lt.s32.totalorder %s11453_s3, %s11453_s3 }
  0x30   :  { %p11460_p8 = por %p11459_p7, %p11458_p6 }
  0x32   :  { %p11461_p9 = pnand %p11460_p8, %p11454_p5 }
  0x34   :  { %11464 = shalt.err (!%p11461_p9)
}
  0x35   :  { %29 = dma.hbm_to_vmem [thread:$0]  %s13095_s0, 1024, %s24_s10, [#allocation3], %s11565_s17, %s11565_s17, %s11566_s18  }
  0x36   :  { %s11465_s25 = scalar_lea.hbm %s13097_s2, 1536 }
  0x37   :  { %p11466_p10 = scmp.ne.s32.totalorder %s13097_s2, %s11465_s25  ;;  %p11469_p11 = scmp.lt.u32.totalorder %s11465_s25, %s13097_s2 }
  0x39   :  { %p11471_p12 = pnand %p11469_p11, %p11466_p10 }
  0x3b   :  { %11474 = shalt.err (!%p11471_p12)
}
  0x3c   :  { %s11475_s28 = scalar_lea.vmem %s11658_s12, 1536  ;;  %p11480_p0 = scmp.lt.s32.totalorder %s11658_s12, %s11658_s12 }
  0x3d   :  { %p11476_p13 = scmp.ne.s32.totalorder %s11658_s12, %s11475_s28  ;;  %p11481_p1 = scmp.lt.s32.totalorder %s11475_s28, %s11475_s28 }
  0x3f   :  { %p11482_p2 = por %p11481_p1, %p11480_p0 }
  0x41   :  { %p11483_p3 = pnand %p11482_p2, %p11476_p13 }
  0x43   :  { %11486 = shalt.err (!%p11483_p3)
}
  0x44   :  { %53 = dma.hbm_to_vmem [thread:$0]  %s13097_s2, 1536, %s11658_s12, [#allocation6], %s11565_s17, %s11565_s17, %s11566_s18  }
  0x45   :  { %s11569_s10 = smov [#allocation10]   ;;  %s11570_s13 = smov [#allocation11]  }
  0x46   :  { %s73_s11 = sshll.u32 %s11569_s10, 4  ;;  %s85_s14 = sshll.u32 %s11570_s13, 4  ;;  %s74_s11 = int_to_ptr.vmem [resolvable:$true] %s73_s11  ;;  %s11695_s14 = int_to_ptr.vmem [resolvable:$true] %s85_s14 }
  0x47   :  { %s11487_s19 = scalar_lea.hbm %s13100_s5, 1536 }
  0x48   :  { %p11488_p4 = scmp.ne.s32.totalorder %s13100_s5, %s11487_s19  ;;  %p11491_p5 = scmp.lt.u32.totalorder %s11487_s19, %s13100_s5 }
  0x4a   :  { %p11493_p6 = pnand %p11491_p5, %p11488_p4 }
  0x4c   :  { %11496 = shalt.err (!%p11493_p6)
}
  0x4d   :  { %s11497_s2 = scalar_lea.vmem %s74_s11, 1536  ;;  %p11502_p8 = scmp.lt.s32.totalorder %s74_s11, %s74_s11 }
  0x4e   :  { %p11498_p7 = scmp.ne.s32.totalorder %s74_s11, %s11497_s2  ;;  %p11503_p9 = scmp.lt.s32.totalorder %s11497_s2, %s11497_s2 }
  0x50   :  { %p11504_p10 = por %p11503_p9, %p11502_p8 }
  0x52   :  { %p11505_p11 = pnand %p11504_p10, %p11498_p7 }
  0x54   :  { %11508 = shalt.err (!%p11505_p11)
}
  0x55   :  { %79 = dma.hbm_to_vmem [thread:$0]  %s13100_s5, 1536, %s74_s11, [#allocation9], %s11565_s17, %s11565_s17, %s11566_s18  }
  0x56   :  { %s11509_s25 = scalar_lea.hbm %s13101_s6, 1536 }
  0x57   :  { %p11510_p12 = scmp.ne.s32.totalorder %s13101_s6, %s11509_s25  ;;  %p11513_p13 = scmp.lt.u32.totalorder %s11509_s25, %s13101_s6 }
  0x59   :  { %p11515_p0 = pnand %p11513_p13, %p11510_p12 }
  0x5b   :  { %11518 = shalt.err (!%p11515_p0)
}
  0x5c   :  { %s11519_s28 = scalar_lea.vmem %s11695_s14, 1536  ;;  %p11524_p2 = scmp.lt.s32.totalorder %s11695_s14, %s11695_s14 }
  0x5d   :  { %p11520_p1 = scmp.ne.s32.totalorder %s11695_s14, %s11519_s28  ;;  %p11525_p3 = scmp.lt.s32.totalorder %s11519_s28, %s11519_s28 }
  0x5f   :  { %p11526_p4 = por %p11525_p3, %p11524_p2 }
  0x61   :  { %p11527_p5 = pnand %p11526_p4, %p11520_p1 }
  0x63   :  { %11530 = shalt.err (!%p11527_p5)
}
  0x64   :  { %91 = dma.hbm_to_vmem [thread:$0]  %s13101_s6, 1536, %s11695_s14, [#allocation12], %s11565_s17, %s11565_s17, %s11566_s18  }
  0x65   :  { %11553 = dma.done.wait [#allocation3], 1024  }
  0x66   :  { %11554 = vsyncadd [#allocation3], 4294966272 }
  0x67   :  { %11555 = dma.done.wait [#allocation6], 1792  }
  0x68   :  { %11556 = vsyncadd [#allocation6], 4294965504 }
  0x69   :  { %11557 = dma.done.wait [#allocation9], 3072  }
  0x6a   :  { %11558 = vsyncadd [#allocation9], 4294964224 }
  0x6b   :  { %11559 = dma.done.wait [#allocation12], 1536  }
  0x6c   :  { %11560 = vsyncadd [#allocation12], 4294965760  ;;  %v11571_v0 = vmov 0.0|0.0   ;;  %vm11572_vm0 = vmmov 0   ;;  %v11573_v1 = vmov 0.0   ;;  %v127_v2 = vld [vmem:[#allocation8] sm:$0xff] }
  0x6d   :  { %10650 = vmatprep.subr.bf16.mxu0 %v11571_v0  ;;  %10656 = vmatprep.subr.bf16.mxu1 %v11571_v0  ;;  %v128_v3 = vld [vmem:[#allocation8 + $0x8] sm:$0xff]  ;;  %v123_v4 = vld [vmem:[#allocation7] sm:$0xff]  ;;  %v129_v7 = vld [vmem:[#allocation8 + $0x10] sm:$0xff]  ;;  %vm131_vm1 = vcmask 261120   ;;  %vm214_vm2 = vcmask 1041409   ;;  %vm217_vm3 = vcmask 1042434  }
  0x6e   :  { %9602 = vmatprep.mubr.msk.f32.mxu0 %vm11572_vm0, %v11573_v1  ;;  %9613 = vmatprep.mubr.msk.f32.mxu1 %vm11572_vm0, %v11573_v1  ;;  %v11738_v5 = vpack.c.bf16 %v128_v3, %v127_v2  ;;  %v124_v6 = vld [vmem:[#allocation7 + $0x8] sm:$0xff]  ;;  %v130_v8 = vld [vmem:[#allocation8 + $0x18] sm:$0xff]  ;;  %v125_v10 = vld [vmem:[#allocation7 + $0x10] sm:$0xff]  ;;  %vm220_vm4 = vcmask 1043459   ;;  %vm223_vm5 = vcmask 1044484   ;;  %vm226_vm6 = vcmask 1045509  }
  0x6f   :  { %v11740_v9 = vpack.c.bf16 %v124_v6, %v123_v4  ;;  %v126_v11 = vld [vmem:[#allocation7 + $0x18] sm:$0xff]  ;;  %v11743_v12 = vpack.c.bf16 %v130_v8, %v129_v7  ;;  %v115_v13 = vld [vmem:[#allocation2] sm:$0x1]  ;;  %v117_v15 = vld [vmem:[#allocation2 + $0x10] sm:$0x1]  ;;  %vm229_vm7 = vcmask 1046534  }
  0x70   :  { %10652 = vmatpush3.bf16.msra.mxu0 %v11738_v5  ;;  %v116_v14 = vld [vmem:[#allocation2 + $0x8] sm:$0x1]  ;;  %v11747_v16 = vpack.c.bf16 %v126_v11, %v125_v10  ;;  %v118_v17 = vld [vmem:[#allocation2 + $0x18] sm:$0x1]  ;;  %v119_v18 = vld [vmem:[#allocation2 + $0x20] sm:$0x1] }
  0x71   :  { %10658 = vmatpush3.bf16.msra.mxu1 %v11740_v9  ;;  %10653 = vmatprep.subr.bf16.mxu0 %v11571_v0  ;;  %v120_v19 = vld [vmem:[#allocation2 + $0x28] sm:$0x1]  ;;  %v121_v20 = vld [vmem:[#allocation2 + $0x30] sm:$0x1]  ;;  %v213_v21 = vrot.slane %v116_v14, 7  ;;  %v216_v22 = vrot.slane %v117_v15, 6 }
  0x72   :  { %10659 = vmatprep.subr.bf16.mxu1 %v11571_v0  ;;  %v122_v23 = vld [vmem:[#allocation2 + $0x38] sm:$0x1]  ;;  %v219_v24 = vrot.slane %v118_v17, 5  ;;  %v222_v25 = vrot.slane %v119_v18, 4  ;;  %v326_v26 = vld [vmem:[#allocation8 + $0x20] sm:$0xff]  ;;  %v11751_v28 = vld [vmem:[#allocation5] sm:$0xff] }
  0x73   :  { %v327_v27 = vld [vmem:[#allocation8 + $0x28] sm:$0xff]  ;;  %v215_v29 = vsel %vm214_vm2, %v213_v21, %v115_v13  ;;  %v225_v30 = vrot.slane %v120_v19, 3  ;;  %v321_v32 = vld [vmem:[#allocation7 + $0x20] sm:$0xff]  ;;  %v228_v34 = vrot.slane %v121_v20, 2  ;;  %v328_v36 = vld [vmem:[#allocation8 + $0x30] sm:$0xff]  ;;  %v231_v39 = vrot.slane %v122_v23, 1 }
  0x74   :  { %10655 = vmatpush3.bf16.msra.mxu0 %v11743_v12  ;;  %v11754_v31 = vpack.c.bf16 %v327_v27, %v326_v26  ;;  %v218_v33 = vsel %vm217_vm3, %v216_v22, %v215_v29  ;;  %v322_v35 = vld [vmem:[#allocation7 + $0x28] sm:$0xff]  ;;  %v329_v37 = vld [vmem:[#allocation8 + $0x38] sm:$0xff]  ;;  %vm232_vm8 = vcmask 1047559   ;;  %v323_v44 = vld [vmem:[#allocation7 + $0x30] sm:$0xff]  ;;  %vm1222_vm9 = vcmask 253952  }
  0x75   :  { %10661 = vmatpush3.bf16.msra.mxu1 %v11747_v16  ;;  %10662 = vmatprep.subr.bf16.mxu0 %v11571_v0  ;;  %v221_v38 = vsel %vm220_vm4, %v219_v24, %v218_v33  ;;  %v11766_v42 = vpack.c.bf16 %v322_v35, %v321_v32  ;;  %v11768_v43 = vpack.c.bf16 %v329_v37, %v328_v36  ;;  %v324_v46 = vld [vmem:[#allocation7 + $0x38] sm:$0xff]  ;;  %v486_v47 = vld [vmem:[#allocation7 + $0x40] sm:$0xff]  ;;  %v487_v48 = vld [vmem:[#allocation7 + $0x48] sm:$0xff] }
  0x76   :  { %10668 = vmatprep.subr.bf16.mxu1 %v11571_v0  ;;  %v224_v40 = vsel %vm223_vm5, %v222_v25, %v221_v38  ;;  %v11778_v50 = vpack.c.bf16 %v324_v46, %v323_v44  ;;  %v569_v51 = vld [vmem:[#allocation8 + $0x40] sm:$0xff]  ;;  %v11780_v52 = vpack.c.bf16 %v487_v48, %v486_v47  ;;  %v570_v53 = vld [vmem:[#allocation8 + $0x48] sm:$0xff]  ;;  %v488_v54 = vld [vmem:[#allocation7 + $0x50] sm:$0xff] }
  0x77   :  { %9603 = vmatmul.mubr.msk.f32.vlgmr.msra.gmra.mrb[0].mxu0 %vm131_vm1, %v11751_v28  ;;  %v227_v41 = vsel %vm226_vm6, %v225_v30, %v224_v40  ;;  %v489_v55 = vld [vmem:[#allocation7 + $0x58] sm:$0xff]  ;;  %v11789_v56 = vpack.c.bf16 %v570_v53, %v569_v51  ;;  %v571_v58 = vld [vmem:[#allocation8 + $0x50] sm:$0xff]  ;;  %v662_v61 = vld [vmem:[#allocation11] sm:$0xff] }
  0x78   :  { %10664 = vmatpush3.bf16.msra.mxu0 %v11754_v31  ;;  %9624 = vmatprep.mubr.msk.f32.mxu0 %vm11572_vm0, %v11573_v1  ;;  %v230_v45 = vsel %vm229_vm7, %v228_v34, %v227_v41  ;;  %v11792_v57 = vpack.c.bf16 %v489_v55, %v488_v54  ;;  %v572_v59 = vld [vmem:[#allocation8 + $0x58] sm:$0xff]  ;;  %v663_v62 = vld [vmem:[#allocation11 + $0x8] sm:$0xff]  ;;  %v664_v2 = vld [vmem:[#allocation11 + $0x10] sm:$0xff] }
  0x79   :  { %10665 = vmatprep.subr.bf16.mxu0 %v11571_v0  ;;  %v233_v49 = vsel %vm232_vm8, %v231_v39, %v230_v45  ;;  %v11800_v60 = vpack.c.bf16 %v572_v59, %v571_v58  ;;  %v11816_v63 = vpack.c.bf16 %v663_v62, %v662_v61  ;;  %v665_v3 = vld [vmem:[#allocation11 + $0x18] sm:$0xff]  ;;  %v832_v6 = vld [vmem:[#allocation11 + $0x20] sm:$0xff]  ;;  %v833_v7 = vld [vmem:[#allocation11 + $0x28] sm:$0xff] }
  0x7a   :  { %9614 = vmatmul.mubr.msk.f32.vlgmr.msra.gmra.mrb[0].mxu1 %vm131_vm1, %v233_v49  ;;  %v11820_v4 = vpack.c.bf16 %v665_v3, %v664_v2  ;;  %v11824_v8 = vpack.c.bf16 %v833_v7, %v832_v6  ;;  %v11826_v10 = vld [vmem:[#allocation5 + $0x8] sm:$0xff]  ;;  %v834_v11 = vld [vmem:[#allocation11 + $0x30] sm:$0xff]  ;;  %v658_v15 = vld [vmem:[#allocation10] sm:$0xff] }
  0x7b   :  { %10670 = vmatpush3.bf16.msra.mxu1 %v11766_v42  ;;  %9635 = vmatprep.mubr.msk.f32.mxu1 %vm11572_vm0, %v11573_v1  ;;  %v835_v13 = vld [vmem:[#allocation11 + $0x38] sm:$0xff]  ;;  %v659_v17 = vld [vmem:[#allocation10 + $0x8] sm:$0xff]  ;;  %v992_v18 = vld [vmem:[#allocation10 + $0x40] sm:$0xff] }
  0x7c   :  { %10667 = vmatpush3.bf16.msra.mxu0 %v11768_v43  ;;  %10671 = vmatprep.subr.bf16.mxu1 %v11571_v0  ;;  %v11834_v14 = vpack.c.bf16 %v835_v13, %v834_v11  ;;  %v11838_v19 = vpack.c.bf16 %v659_v17, %v658_v15  ;;  %v993_v20 = vld [vmem:[#allocation10 + $0x48] sm:$0xff]  ;;  %v660_v22 = vld [vmem:[#allocation10 + $0x10] sm:$0xff]  ;;  %v661_v23 = vld [vmem:[#allocation10 + $0x18] sm:$0xff] }
  0x7d   :  { %10674 = vmatprep.subr.bf16.mxu0 %v11571_v0  ;;  %v11840_v21 = vpack.c.bf16 %v993_v20, %v992_v18  ;;  %v994_v24 = vld [vmem:[#allocation10 + $0x50] sm:$0xff]  ;;  %v11848_v25 = vpack.c.bf16 %v661_v23, %v660_v22  ;;  %v995_v26 = vld [vmem:[#allocation10 + $0x58] sm:$0xff]  ;;  %v827_v17 = vld [vmem:[#allocation10 + $0x20] sm:$0xff] }
  0x7e   :  { %v11852_v27 = vpack.c.bf16 %v995_v26, %v994_v24  ;;  %v11861_v33 = vld [vmem:[%s13099_s4] ss:$0 sm:$0xff]  ;;  %v11867_v41 = vld [vmem:[%s13099_s4 + $0x1] ss:$0 sm:$0xff]  ;;  %v11873_v58 = vld [vmem:[%s13099_s4 + $0x3] ss:$0 sm:$0xff] }
  0x7f   :  { %9625 = vmatmul.mubr.msk.f32.vlgmr.msra.gmra.mrb[2].mxu0 %vm131_vm1, %v11751_v28  ;;  %10673 = vmatpush3.bf16.msra.mxu1 %v11778_v50  ;;  %v11878_v62 = vld [vmem:[%s13099_s4 + $0x2] ss:$0 sm:$0xff]  ;;  %v828_v18 = vld [vmem:[#allocation10 + $0x28] sm:$0xff]  ;;  %v1232_v24 = vld [vmem:[#allocation2 + $0x9] sm:$0x1] }
  0x80   :  { %10676 = vmatpush3.bf16.msra.mxu0 %v11780_v52  ;;  %10680 = vmatprep.subr.bf16.mxu1 %v11571_v0  ;;  %v11883_v26 = vpack.c.bf16 %v828_v18, %v827_v17 }
  0x81   :  { %10677 = vmatprep.subr.bf16.mxu0 %v11571_v0  ;;  %9646 = vmatprep.mubr.msk.f32.mxu0 %vm11572_vm0, %v11573_v1 }
  0x82   :  { %9636 = vmatmul.mubr.msk.f32.vlgmr.msra.gmra.mrb[2].mxu1 %vm131_vm1, %v233_v49 }
  0x83   :  { %10682 = vmatpush3.bf16.msra.mxu1 %v11789_v56  ;;  %9657 = vmatprep.mubr.msk.f32.mxu1 %vm11572_vm0, %v11573_v1 }
  0x84   :  { %10679 = vmatpush3.bf16.msra.mxu0 %v11792_v57  ;;  %10683 = vmatprep.subr.bf16.mxu1 %v11571_v0 }
  0x85   :  { %10686 = vmatprep.subr.bf16.mxu0 %v11571_v0 }
  0x87   :  { %9647 = vmatmul.mubr.msk.f32.vlgmr.msra.gmra.mrb[4].mxu0 %vm131_vm1, %v233_v49  ;;  %10685 = vmatpush3.bf16.msra.mxu1 %v11800_v60 }
  0x88   :  { %9668 = vmatprep.mubr.msk.f32.mxu0 %vm11572_vm0, %v11573_v1  ;;  %10692 = vmatprep.subr.bf16.mxu1 %v11571_v0 }
  0x89   :  { %10688 = vmatpush3.bf16.msra.mxu0 %v11816_v63 }
  0x8a   :  { %9658 = vmatmul.mubr.msk.f32.vlgmr.msra.gmra.mrb[4].mxu1 %vm131_vm1, %v11751_v28  ;;  %10689 = vmatprep.subr.bf16.mxu0 %v11571_v0 }
  0x8b   :  { %9679 = vmatprep.mubr.msk.f32.mxu1 %vm11572_vm0, %v11573_v1  ;;  %10694 = vmatpush3.bf16.msra.mxu1 %v11838_v19 }
  0x8c   :  { %10695 = vmatprep.subr.bf16.mxu1 %v11571_v0 }
  0x8d   :  { %10691 = vmatpush3.bf16.msra.mxu0 %v11820_v4 }
  0x8e   :  { %10698 = vmatprep.subr.bf16.mxu0 %v11571_v0 }
  0x8f   :  { %10697 = vmatpush3.bf16.msra.mxu1 %v11848_v25 }
  0x90   :  { %9669 = vmatmul.mubr.msk.f32.vlgmr.msra.gmra.mrb[6].mxu0 %vm131_vm1, %v11826_v10  ;;  %10704 = vmatprep.subr.bf16.mxu1 %v11571_v0 }
  0x91   :  { %10700 = vmatpush3.bf16.msra.mxu0 %v11824_v8  ;;  %9690 = vmatprep.mubr.msk.f32.mxu0 %vm11572_vm0, %v11573_v1 }
  0x92   :  { %10701 = vmatprep.subr.bf16.mxu0 %v11571_v0 }
  0x95   :  { %10703 = vmatpush3.bf16.msra.mxu0 %v11834_v14 }
  0x96   :  { %10710 = vmatprep.subr.bf16.mxu0 %v11571_v0 }
  0x98   :  { %9691 = vmatmul.mubr.msk.f32.vlgmr.msra.gmra.mrb[8].mxu0 %vm131_vm1, %v11826_v10 }
  0x99   :  { %10712 = vmatpush3.bf16.msra.mxu0 %v11840_v21  ;;  %9712 = vmatprep.mubr.msk.f32.mxu0 %vm11572_vm0, %v11573_v1 }
  0x9a   :  { %10713 = vmatprep.subr.bf16.mxu0 %v11571_v0 }
  0x9d   :  { %10715 = vmatpush3.bf16.msra.mxu0 %v11852_v27 }
  0x9e   :  { %10722 = vmatprep.subr.bf16.mxu0 %v11571_v0 }
 0x14a   :  { %v201_v29 = vpop.f32.mrb[0].mxu0 }
 0x14b   :  { %v9604_v30 = vpop.f32.mrb[1].mxu0 }
 0x14c   :  { %v829_v30 = vld [vmem:[#allocation10 + $0x30] sm:$0xff] }
 0x14d   :  { %v302_v32 = vpop.f32.mrb[0].mxu1 }
 0x14e   :  { %v303_v34 = vadd.f32 %v302_v32, %v201_v29  ;;  %v9615_v35 = vpop.f32.mrb[1].mxu1  ;;  %v830_v32 = vld [vmem:[#allocation10 + $0x38] sm:$0xff] }
 0x14f   :  { %v1325_v35 = vrot.slane %v1232_v24, 7  ;;  %v11980_v24 = vld [vmem:[%s13102_s7] ss:$0 sm:$0xff] }
 0x150   :  { %v313_v36 = vadd.f32 %v11861_v33, %v303_v34  ;;  %v1233_v34 = vld [vmem:[#allocation2 + $0x11] sm:$0x1] }
 0x152   :  { %v396_v37 = vpop.f32.mrb[2].mxu0  ;;  %v8877_v38 = vmul.f32 -1.442695, %v313_v36  ;;  %v1231_v36 = vld [vmem:[#allocation2 + $0x1] sm:$0x1] }
 0x153   :  { %v9626_v39 = vpop.f32.mrb[3].mxu0 }
 0x154   :  { %11239 = vpow2.f32 %v8877_v38  ;;  %v1076_v38 = vld [vmem:[#allocation11 + $0x48] sm:$0xff] }
 0x155   :  { %v466_v40 = vpop.f32.mrb[2].mxu1  ;;  %v1234_v39 = vld [vmem:[#allocation2 + $0x19] sm:$0x1] }
 0x156   :  { %v467_v44 = vadd.f32 %v466_v40, %v396_v37  ;;  %v9637_v45 = vpop.f32.mrb[3].mxu1  ;;  %v1075_v37 = vld [vmem:[#allocation11 + $0x40] sm:$0xff]  ;;  %v1327_v40 = vrot.slane %v1233_v34, 6 }
 0x157   :  { %v11904_v45 = vpack.c.bf16 %v1076_v38, %v1075_v37  ;;  %v11986_v37 = vld [vmem:[%s13102_s7 + $0x1] ss:$0 sm:$0xff] }
 0x158   :  { %v478_v46 = vadd.f32 %v11867_v41, %v467_v44  ;;  %v1326_v44 = vsel %vm214_vm2, %v1325_v35, %v1231_v36 }
 0x15a   :  { %v564_v47 = vpop.f32.mrb[4].mxu0  ;;  %v8882_v48 = vmul.f32 -1.442695, %v478_v46  ;;  %v1235_v46 = vld [vmem:[#allocation2 + $0x21] sm:$0x1] }
 0x15b   :  { %v9648_v49 = vpop.f32.mrb[5].mxu0  ;;  %v565_v3 = vadd.f32 %v11878_v62, %v564_v47  ;;  %v1329_v47 = vrot.slane %v1234_v39, 5 }
 0x15c   :  { %11241 = vpow2.f32 %v8882_v48  ;;  %v1077_v48 = vld [vmem:[#allocation11 + $0x50] sm:$0xff]  ;;  %v1078_v49 = vld [vmem:[#allocation11 + $0x58] sm:$0xff] }
 0x15d   :  { %v647_v51 = vpop.f32.mrb[4].mxu1 }
 0x15e   :  { %v11240_v53 = vpop.eup %11239  ;;  %v9659_v54 = vpop.f32.mrb[5].mxu1  ;;  %v648_v2 = vadd.f32 %v11873_v58, %v647_v51  ;;  %v1328_v51 = vsel %vm217_vm3, %v1327_v40, %v1326_v44 }
 0x15f   :  { %v317_v55 = vadd.f32 1.0, %v11240_v53  ;;  %v1236_v53 = vld [vmem:[#allocation2 + $0x29] sm:$0x1]  ;;  %v1331_v54 = vrot.slane %v1235_v46, 4 }
 0x161   :  { %11243 = vrcp.f32 %v317_v55  ;;  %v11915_v55 = vpack.c.bf16 %v1078_v49, %v1077_v48 }
 0x166   :  { %v11242_v59 = vpop.eup %11241 }
 0x167   :  { %v482_v61 = vadd.f32 1.0, %v11242_v59  ;;  %v1330_v59 = vsel %vm220_vm4, %v1329_v47, %v1328_v51 }
 0x169   :  { %11245 = vrcp.f32 %v482_v61  ;;  %v1237_v61 = vld [vmem:[#allocation2 + $0x31] sm:$0x1] }
 0x16b   :  { %v11244_v6 = vpop.eup %11243 }
 0x16c   :  { %v651_v7 = vmul.f32 %v11244_v6, %v648_v2  ;;  %v1333_v2 = vrot.slane %v1236_v53, 3  ;;  %v1238_v6 = vld [vmem:[#allocation2 + $0x39] sm:$0x1] }
 0x16e   :  { %v652_v11 = vadd.f32 %v651_v7, %v565_v3  ;;  %v1332_v3 = vsel %vm223_vm5, %v1331_v54, %v1330_v59  ;;  %v1335_v7 = vrot.slane %v1237_v61, 2 }
 0x170   :  { %11247 = vtanh.f32 %v652_v11  ;;  %v1334_v11 = vsel %vm226_vm6, %v1333_v2, %v1332_v3 }
 0x173   :  { %v11246_v13 = vpop.eup %11245 }
 0x174   :  { %v654_v15 = vsub.f32 1.0, %v11246_v13  ;;  %v656_v22 = vmul.f32 %v11246_v13, %v11751_v28  ;;  %v11893_v28 = vpack.c.bf16 %v830_v32, %v829_v30  ;;  %v1337_v13 = vrot.slane %v1238_v6, 1 }
 0x17a   :  { %v11248_v20 = vpop.eup %11247 }
 0x17b   :  { %v655_v23 = vmul.f32 %v11248_v20, %v654_v15  ;;  %v1336_v15 = vsel %vm229_vm7, %v1335_v7, %v1334_v11  ;;  %v11992_v11 = vld [vmem:[%s13102_s7 + $0x3] ss:$0 sm:$0xff] }
 0x17c   :  { %v1338_v17 = vsel %vm232_vm8, %v1337_v13, %v1336_v15 }
 0x17d   :  { %v11885_v29 = vadd.f32 %v656_v22, %v655_v23 }
 0x17f   :  { %9680 = vmatmul.mubr.msk.f32.vlgmr.msra.gmra.mrb[6].mxu1 %vm131_vm1, %v11885_v29  ;;  %9713 = vmatmul.mubr.msk.f32.vlgmr.msra.gmra.mrb[10].mxu0 %vm131_vm1, %v11885_v29 }
 0x180   :  { %10706 = vmatpush3.bf16.msra.mxu1 %v11883_v26  ;;  %10724 = vmatpush3.bf16.msra.mxu0 %v11738_v5 }
 0x181   :  { %10707 = vmatprep.subr.bf16.mxu1 %v11571_v0  ;;  %10725 = vmatprep.subr.bf16.mxu0 %v11571_v0 }
 0x182   :  { %9701 = vmatprep.mubr.msk.f32.mxu1 %vm11572_vm0, %v11573_v1  ;;  %9734 = vmatprep.mubr.msk.f32.mxu0 %vm11572_vm0, %v11573_v1 }
 0x184   :  { %10709 = vmatpush3.bf16.msra.mxu1 %v11893_v28  ;;  %10727 = vmatpush3.bf16.msra.mxu0 %v11743_v12 }
 0x185   :  { %10716 = vmatprep.subr.bf16.mxu1 %v11571_v0  ;;  %10734 = vmatprep.subr.bf16.mxu0 %v11571_v0 }
 0x187   :  { %9702 = vmatmul.mubr.msk.f32.vlgmr.msra.gmra.mrb[8].mxu1 %vm131_vm1, %v11885_v29  ;;  %9735 = vmatmul.mubr.msk.f32.vlgmr.msra.gmra.mrb[12].mxu0 %vm131_vm1, %v11885_v29 }
 0x188   :  { %10718 = vmatpush3.bf16.msra.mxu1 %v11904_v45  ;;  %10736 = vmatpush3.bf16.msra.mxu0 %v11754_v31 }
 0x189   :  { %10719 = vmatprep.subr.bf16.mxu1 %v11571_v0  ;;  %10737 = vmatprep.subr.bf16.mxu0 %v11571_v0 }
 0x18a   :  { %9723 = vmatprep.mubr.msk.f32.mxu1 %vm11572_vm0, %v11573_v1  ;;  %9756 = vmatprep.mubr.msk.f32.mxu0 %vm11572_vm0, %v11573_v1 }
 0x18c   :  { %10721 = vmatpush3.bf16.msra.mxu1 %v11915_v55  ;;  %10739 = vmatpush3.bf16.msra.mxu0 %v11768_v43 }
 0x18d   :  { %10728 = vmatprep.subr.bf16.mxu1 %v11571_v0  ;;  %10746 = vmatprep.subr.bf16.mxu0 %v11571_v0 }
 0x18f   :  { %9724 = vmatmul.mubr.msk.f32.vlgmr.msra.gmra.mrb[10].mxu1 %vm131_vm1, %v11826_v10  ;;  %9757 = vmatmul.mubr.msk.f32.vlgmr.msra.gmra.mrb[14].mxu0 %vm131_vm1, %v11885_v29 }
 0x190   :  { %10730 = vmatpush3.bf16.msra.mxu1 %v11740_v9  ;;  %9745 = vmatprep.mubr.msk.f32.mxu1 %vm11572_vm0, %v11573_v1 }
 0x191   :  { %10731 = vmatprep.subr.bf16.mxu1 %v11571_v0  ;;  %10748 = vmatpush3.bf16.msra.mxu0 %v11780_v52 }
 0x192   :  { %10749 = vmatprep.subr.bf16.mxu0 %v11571_v0  ;;  %9778 = vmatprep.mubr.msk.f32.mxu0 %vm11572_vm0, %v11573_v1 }
 0x194   :  { %10733 = vmatpush3.bf16.msra.mxu1 %v11747_v16 }
 0x195   :  { %10740 = vmatprep.subr.bf16.mxu1 %v11571_v0  ;;  %10751 = vmatpush3.bf16.msra.mxu0 %v11792_v57 }
 0x196   :  { %10758 = vmatprep.subr.bf16.mxu0 %v11571_v0 }
 0x197   :  { %9746 = vmatmul.mubr.msk.f32.vlgmr.msra.gmra.mrb[12].mxu1 %vm131_vm1, %v1338_v17 }
 0x198   :  { %10742 = vmatpush3.bf16.msra.mxu1 %v11766_v42  ;;  %9767 = vmatprep.mubr.msk.f32.mxu1 %vm11572_vm0, %v11573_v1 }
 0x199   :  { %10743 = vmatprep.subr.bf16.mxu1 %v11571_v0  ;;  %9779 = vmatmul.mubr.msk.f32.vlgmr.msra.gmra.mrb[16].mxu0 %vm131_vm1, %v1338_v17 }
 0x19a   :  { %10760 = vmatpush3.bf16.msra.mxu0 %v11816_v63  ;;  %9800 = vmatprep.mubr.msk.f32.mxu0 %vm11572_vm0, %v11573_v1  ;;  %v735_v63 = vpop.f32.mrb[6].mxu0 }
 0x19b   :  { %10761 = vmatprep.subr.bf16.mxu0 %v11571_v0  ;;  %v9670_v18 = vpop.f32.mrb[7].mxu0 }
 0x19c   :  { %10745 = vmatpush3.bf16.msra.mxu1 %v11778_v50  ;;  %v902_v20 = vpop.f32.mrb[8].mxu0 }
 0x19d   :  { %10752 = vmatprep.subr.bf16.mxu1 %v11571_v0  ;;  %v9692_v22 = vpop.f32.mrb[9].mxu0 }
 0x19e   :  { %10763 = vmatpush3.bf16.msra.mxu0 %v11820_v4 }
 0x19f   :  { %9768 = vmatmul.mubr.msk.f32.vlgmr.msra.gmra.mrb[14].mxu1 %vm131_vm1, %v1338_v17  ;;  %10770 = vmatprep.subr.bf16.mxu0 %v11571_v0 }
 0x1a0   :  { %10754 = vmatpush3.bf16.msra.mxu1 %v11789_v56  ;;  %9789 = vmatprep.mubr.msk.f32.mxu1 %vm11572_vm0, %v11573_v1 }
 0x1a1   :  { %10755 = vmatprep.subr.bf16.mxu1 %v11571_v0 }
 0x1a4   :  { %10757 = vmatpush3.bf16.msra.mxu1 %v11800_v60 }
 0x1a5   :  { %10764 = vmatprep.subr.bf16.mxu1 %v11571_v0 }
 0x1a7   :  { %9790 = vmatmul.mubr.msk.f32.vlgmr.msra.gmra.mrb[16].mxu1 %vm131_vm1, %v11885_v29 }
 0x1a8   :  { %10766 = vmatpush3.bf16.msra.mxu1 %v11838_v19  ;;  %9811 = vmatprep.mubr.msk.f32.mxu1 %vm11572_vm0, %v11573_v1 }
 0x1a9   :  { %10767 = vmatprep.subr.bf16.mxu1 %v11571_v0 }
 0x1ac   :  { %10769 = vmatpush3.bf16.msra.mxu1 %v11848_v25 }
 0x1ad   :  { %10776 = vmatprep.subr.bf16.mxu1 %v11571_v0 }
 0x252   :  { %v808_v23 = vpop.f32.mrb[6].mxu1  ;;  %v1070_v19 = vpop.f32.mrb[10].mxu0 }
 0x253   :  { %v809_v30 = vadd.f32 %v808_v23, %v735_v63  ;;  %v9681_v32 = vpop.f32.mrb[7].mxu1  ;;  %v9714_v34 = vpop.f32.mrb[11].mxu0  ;;  %v11998_v63 = vld [vmem:[%s13102_s7 + $0x2] ss:$0 sm:$0xff] }
 0x254   :  { %v1071_v23 = vadd.f32 %v11998_v63, %v1070_v19 }
 0x255   :  { %v819_v35 = vadd.f32 %v11980_v24, %v809_v30 }
 0x257   :  { %v8892_v36 = vmul.f32 -1.442695, %v819_v35 }
 0x259   :  { %11249 = vpow2.f32 %v8892_v36 }
 0x25a   :  { %v972_v25 = vpop.f32.mrb[8].mxu1  ;;  %v1313_v38 = vpop.f32.mrb[12].mxu0 }
 0x25b   :  { %v973_v39 = vadd.f32 %v972_v25, %v902_v20  ;;  %v9703_v40 = vpop.f32.mrb[9].mxu1  ;;  %v9736_v44 = vpop.f32.mrb[13].mxu0 }
 0x25c   :  { %v1169_v44 = vlaneseq }
 0x25d   :  { %v984_v46 = vadd.f32 %v11986_v37, %v973_v39  ;;  %v11574_v39 = vmov 1966171168  }
 0x25e   :  { %v1167_v40 = vunpack.c.l.s4 %v11574_v39 }
 0x25f   :  { %v8897_v47 = vmul.f32 -1.442695, %v984_v46 }
 0x260   :  { %v1168_v19 = vunpack.c.0.s8 %v1167_v40 }
 0x261   :  { %11251 = vpow2.f32 %v8897_v47 }
 0x262   :  { %v1153_v48 = vpop.f32.mrb[10].mxu1  ;;  %v1499_v49 = vpop.f32.mrb[14].mxu0 }
 0x263   :  { %v11250_v51 = vpop.eup %11249  ;;  %v9725_v53 = vpop.f32.mrb[11].mxu1  ;;  %v1154_v18 = vadd.f32 %v11992_v11, %v1153_v48 }
 0x264   :  { %v9758_v54 = vpop.f32.mrb[15].mxu0  ;;  %v823_v59 = vadd.f32 1.0, %v11250_v51 }
 0x265   :  { %v1170_v54 = vshrl.u32 %v1169_v44, 7 }
 0x266   :  { %11253 = vrcp.f32 %v823_v59 }
 0x26a   :  { %v1407_v61 = vpop.f32.mrb[12].mxu1 }
 0x26b   :  { %v11252_v2 = vpop.eup %11251  ;;  %v1408_v3 = vadd.f32 %v1407_v61, %v1313_v38  ;;  %v9747_v6 = vpop.f32.mrb[13].mxu1 }
 0x26c   :  { %v988_v7 = vadd.f32 1.0, %v11252_v2  ;;  %v1664_v13 = vpop.f32.mrb[16].mxu0 }
 0x26d   :  { %v1418_v15 = vadd.f32 %v11861_v33, %v1408_v3  ;;  %v9780_v17 = vpop.f32.mrb[17].mxu0  ;;  %v12004_v3 = vsub.s32 %v1168_v19, %v1170_v54 }
 0x26e   :  { %11255 = vrcp.f32 %v988_v7 }
 0x26f   :  { %v8907_v20 = vmul.f32 -1.442695, %v1418_v15 }
 0x270   :  { %v11254_v22 = vpop.eup %11253 }
 0x271   :  { %v1157_v30 = vmul.f32 %v11254_v22, %v1154_v18  ;;  %11257 = vpow2.f32 %v8907_v20 }
 0x272   :  { %v1569_v32 = vpop.f32.mrb[14].mxu1 }
 0x273   :  { %v1158_v34 = vadd.f32 %v1157_v30, %v1071_v23  ;;  %v1570_v35 = vadd.f32 %v1569_v32, %v1499_v49  ;;  %v9769_v36 = vpop.f32.mrb[15].mxu1  ;;  %v1665_v30 = vadd.f32 %v11878_v62, %v1664_v13 }
 0x275   :  { %11259 = vtanh.f32 %v1158_v34  ;;  %v1580_v25 = vadd.f32 %v11867_v41, %v1570_v35 }
 0x277   :  { %v8912_v38 = vmul.f32 -1.442695, %v1580_v25 }
 0x278   :  { %v11256_v46 = vpop.eup %11255 }
 0x279   :  { %11261 = vpow2.f32 %v8912_v38  ;;  %v1160_v59 = vsub.f32 1.0, %v11256_v46  ;;  %v1162_v49 = vmul.f32 %v11256_v46, %v11826_v10 }
 0x27a   :  { %v1745_v47 = vpop.f32.mrb[16].mxu1 }
 0x27b   :  { %v11258_v48 = vpop.eup %11257  ;;  %v9791_v51 = vpop.f32.mrb[17].mxu1  ;;  %v1746_v23 = vadd.f32 %v11873_v58, %v1745_v47 }
 0x27c   :  { %v1422_v53 = vadd.f32 1.0, %v11258_v48  ;;  %v2321_v51 = vld [vmem:[#allocation2 + $0xa] sm:$0x1] }
 0x27d   :  { %v2414_v19 = vrot.slane %v2321_v51, 7 }
 0x27e   :  { %11263 = vrcp.f32 %v1422_v53 }
 0x27f   :  { %v11260_v61 = vpop.eup %11259 }
 0x280   :  { %v1161_v2 = vmul.f32 %v11260_v61, %v1160_v59 }
 0x282   :  { %v12006_v6 = vadd.f32 %v1162_v49, %v1161_v2  ;;  %v2325_v49 = vld [vmem:[#allocation2 + $0x2a] sm:$0x1] }
 0x283   :  { %v11262_v7 = vpop.eup %11261 }
 0x284   :  { %v1165_v15 = vcombine.high %v12006_v6, %v12006_v6  ;;  %v1172_v17 = vrot.slane %v12006_v6, %v12004_v3  ;;  %9801 = vmatmul.mubr.msk.f32.vlgmr.msra.gmra.mrb[18].mxu0 %vm131_vm1, %v12006_v6  ;;  %v1584_v18 = vadd.f32 1.0, %v11262_v7  ;;  %v2422_v7 = vrot.slane %v2325_v49, 3 }
 0x285   :  { %10772 = vmatpush3.bf16.msra.mxu0 %v11824_v8  ;;  %9822 = vmatprep.mubr.msk.f32.mxu0 %vm11572_vm0, %v11573_v1 }
 0x286   :  { %v1179_v10 = vrot.slane %v1165_v15, %v12004_v3  ;;  %v1180_v20 = vcombine.high %v1172_v17, %v1172_v17  ;;  %v1188_v22 = vrot.slane %v1172_v17, %v12004_v3  ;;  %10773 = vmatprep.subr.bf16.mxu0 %v11571_v0  ;;  %11265 = vrcp.f32 %v1584_v18 }
 0x288   :  { %v11264_v32 = vpop.eup %11263  ;;  %v1181_v34 = vcombine.high %v1179_v10, %v1179_v10  ;;  %v1195_v35 = vrot.slane %v1179_v10, %v12004_v3  ;;  %v1202_v8 = vrot.slane %v1180_v20, %v12004_v3  ;;  %v1210_v36 = vcombine.high %v1188_v22, %v1188_v22  ;;  %1223 = vst.msk [vmem:[#allocation13] sm:$0x1] %vm1222_vm9, %v1188_v22 }
 0x289   :  { %v1749_v25 = vmul.f32 %v11264_v32, %v1746_v23  ;;  %10775 = vmatpush3.bf16.msra.mxu0 %v11834_v14 }
 0x28a   :  { %v1209_v38 = vrot.slane %v1181_v34, %v12004_v3  ;;  %v1211_v39 = vcombine.high %v1195_v35, %v1195_v35  ;;  %v1212_v40 = vcombine.high %v1202_v8, %v1202_v8  ;;  %1224 = vst.msk [vmem:[#allocation13 + $0x8] sm:$0x1] %vm1222_vm9, %v1202_v8  ;;  %1225 = vst.msk [vmem:[#allocation13 + $0x10] sm:$0x1] %vm1222_vm9, %v1210_v36  ;;  %10782 = vmatprep.subr.bf16.mxu0 %v11571_v0 }
 0x28b   :  { %1227 = vst.msk [vmem:[#allocation13 + $0x20] sm:$0x1] %vm1222_vm9, %v1195_v35  ;;  %v1750_v62 = vadd.f32 %v1749_v25, %v1665_v30 }
 0x28c   :  { %v1213_v13 = vcombine.high %v1209_v38, %v1209_v38  ;;  %1226 = vst.msk [vmem:[#allocation13 + $0x18] sm:$0x1] %vm1222_vm9, %v1212_v40  ;;  %1228 = vst.msk [vmem:[#allocation13 + $0x28] sm:$0x1] %vm1222_vm9, %v1209_v38  ;;  %9823 = vmatmul.mubr.msk.f32.vlgmr.msra.gmra.mrb[20].mxu0 %vm131_vm1, %v12006_v6 }
 0x28d   :  { %1229 = vst.msk [vmem:[#allocation13 + $0x30] sm:$0x1] %vm1222_vm9, %v1211_v39  ;;  %11267 = vtanh.f32 %v1750_v62  ;;  %10784 = vmatpush3.bf16.msra.mxu0 %v11840_v21  ;;  %9844 = vmatprep.mubr.msk.f32.mxu0 %vm11572_vm0, %v11573_v1  ;;  %v2322_v21 = vld [vmem:[#allocation2 + $0x12] sm:$0x1] }
 0x28e   :  { %1230 = vst.msk [vmem:[#allocation13 + $0x38] sm:$0x1] %vm1222_vm9, %v1213_v13  ;;  %10785 = vmatprep.subr.bf16.mxu0 %v11571_v0  ;;  %v2416_v54 = vrot.slane %v2322_v21, 6 }
 0x290   :  { %v11266_v14 = vpop.eup %11265 }
 0x291   :  { %10787 = vmatpush3.bf16.msra.mxu0 %v11852_v27  ;;  %v1752_v44 = vsub.f32 1.0, %v11266_v14  ;;  %v1754_v47 = vmul.f32 %v11266_v14, %v11885_v29  ;;  %v2320_v27 = vld [vmem:[#allocation2 + $0x2] sm:$0x1]  ;;  %v2323_v29 = vld [vmem:[#allocation2 + $0x1a] sm:$0x1] }
 0x292   :  { %10794 = vmatprep.subr.bf16.mxu0 %v11571_v0  ;;  %v2415_v59 = vsel %vm214_vm2, %v2414_v19, %v2320_v27 }
 0x293   :  { %v2417_v61 = vsel %vm217_vm3, %v2416_v54, %v2415_v59 }
 0x297   :  { %v11268_v46 = vpop.eup %11267 }
 0x298   :  { %v1753_v48 = vmul.f32 %v11268_v46, %v1752_v44 }
 0x29a   :  { %v12044_v53 = vadd.f32 %v1754_v47, %v1753_v48 }
 0x29c   :  { %9812 = vmatmul.mubr.msk.f32.vlgmr.msra.gmra.mrb[18].mxu1 %vm131_vm1, %v12044_v53  ;;  %9845 = vmatmul.mubr.msk.f32.vlgmr.msra.gmra.mrb[22].mxu0 %vm131_vm1, %v12044_v53 }
 0x29d   :  { %10778 = vmatpush3.bf16.msra.mxu1 %v11883_v26  ;;  %10796 = vmatpush3.bf16.msra.mxu0 %v11738_v5  ;;  %v2324_v26 = vld [vmem:[#allocation2 + $0x22] sm:$0x1]  ;;  %v2418_v5 = vrot.slane %v2323_v29, 5 }
 0x29e   :  { %10779 = vmatprep.subr.bf16.mxu1 %v11571_v0  ;;  %10797 = vmatprep.subr.bf16.mxu0 %v11571_v0  ;;  %v2420_v2 = vrot.slane %v2324_v26, 4 }
 0x29f   :  { %9833 = vmatprep.mubr.msk.f32.mxu1 %vm11572_vm0, %v11573_v1  ;;  %9866 = vmatprep.mubr.msk.f32.mxu0 %vm11572_vm0, %v11573_v1 }
 0x2a1   :  { %10781 = vmatpush3.bf16.msra.mxu1 %v11893_v28  ;;  %10799 = vmatpush3.bf16.msra.mxu0 %v11743_v12  ;;  %v2419_v12 = vsel %vm220_vm4, %v2418_v5, %v2417_v61  ;;  %v2326_v28 = vld [vmem:[#allocation2 + $0x32] sm:$0x1] }
 0x2a2   :  { %10788 = vmatprep.subr.bf16.mxu1 %v11571_v0  ;;  %10806 = vmatprep.subr.bf16.mxu0 %v11571_v0  ;;  %v2421_v15 = vsel %vm223_vm5, %v2420_v2, %v2419_v12 }
 0x2a3   :  { %v2423_v17 = vsel %vm226_vm6, %v2422_v7, %v2421_v15 }
 0x2a4   :  { %9834 = vmatmul.mubr.msk.f32.vlgmr.msra.gmra.mrb[20].mxu1 %vm131_vm1, %v12044_v53  ;;  %9867 = vmatmul.mubr.msk.f32.vlgmr.msra.gmra.mrb[24].mxu0 %vm131_vm1, %v12044_v53 }
 0x2a5   :  { %10790 = vmatpush3.bf16.msra.mxu1 %v11904_v45  ;;  %10808 = vmatpush3.bf16.msra.mxu0 %v11754_v31  ;;  %v2327_v31 = vld [vmem:[#allocation2 + $0x3a] sm:$0x1]  ;;  %v2424_v45 = vrot.slane %v2326_v28, 2 }
 0x2a6   :  { %10791 = vmatprep.subr.bf16.mxu1 %v11571_v0  ;;  %10809 = vmatprep.subr.bf16.mxu0 %v11571_v0 }
 0x2a7   :  { %9855 = vmatprep.mubr.msk.f32.mxu1 %vm11572_vm0, %v11573_v1  ;;  %9888 = vmatprep.mubr.msk.f32.mxu0 %vm11572_vm0, %v11573_v1 }
 0x2a9   :  { %10793 = vmatpush3.bf16.msra.mxu1 %v11915_v55  ;;  %10811 = vmatpush3.bf16.msra.mxu0 %v11768_v43  ;;  %v2426_v43 = vrot.slane %v2327_v31, 1  ;;  %v2425_v55 = vsel %vm229_vm7, %v2424_v45, %v2423_v17 }
 0x2aa   :  { %10800 = vmatprep.subr.bf16.mxu1 %v11571_v0  ;;  %10818 = vmatprep.subr.bf16.mxu0 %v11571_v0 }
 0x2ab   :  { %v2427_v18 = vsel %vm232_vm8, %v2426_v43, %v2425_v55 }
 0x2ac   :  { %9856 = vmatmul.mubr.msk.f32.vlgmr.msra.gmra.mrb[22].mxu1 %vm131_vm1, %v12006_v6  ;;  %9889 = vmatmul.mubr.msk.f32.vlgmr.msra.gmra.mrb[26].mxu0 %vm131_vm1, %v12044_v53 }
 0x2ad   :  { %10802 = vmatpush3.bf16.msra.mxu1 %v11740_v9  ;;  %9877 = vmatprep.mubr.msk.f32.mxu1 %vm11572_vm0, %v11573_v1  ;;  %v2849_v9 = vld [vmem:[#allocation11] sm:$0xff] }
 0x2ae   :  { %10803 = vmatprep.subr.bf16.mxu1 %v11571_v0  ;;  %10820 = vmatpush3.bf16.msra.mxu0 %v11780_v52  ;;  %v2846_v52 = vld [vmem:[#allocation10 + $0x8] sm:$0xff] }
 0x2af   :  { %10821 = vmatprep.subr.bf16.mxu0 %v11571_v0  ;;  %9910 = vmatprep.mubr.msk.f32.mxu0 %vm11572_vm0, %v11573_v1 }
 0x2b1   :  { %10805 = vmatpush3.bf16.msra.mxu1 %v11747_v16  ;;  %v2850_v16 = vld [vmem:[#allocation11 + $0x8] sm:$0xff] }
 0x2b2   :  { %10812 = vmatprep.subr.bf16.mxu1 %v11571_v0  ;;  %10823 = vmatpush3.bf16.msra.mxu0 %v11792_v57  ;;  %v2847_v57 = vld [vmem:[#allocation10 + $0x10] sm:$0xff] }
 0x2b3   :  { %10830 = vmatprep.subr.bf16.mxu0 %v11571_v0 }
 0x2b4   :  { %9878 = vmatmul.mubr.msk.f32.vlgmr.msra.gmra.mrb[24].mxu1 %vm131_vm1, %v2427_v18 }
 0x2b5   :  { %10814 = vmatpush3.bf16.msra.mxu1 %v11766_v42  ;;  %9899 = vmatprep.mubr.msk.f32.mxu1 %vm11572_vm0, %v11573_v1  ;;  %v12122_v42 = vpack.c.bf16 %v2850_v16, %v2849_v9 }
 0x2b6   :  { %10815 = vmatprep.subr.bf16.mxu1 %v11571_v0  ;;  %9911 = vmatmul.mubr.msk.f32.vlgmr.msra.gmra.mrb[28].mxu0 %vm131_vm1, %v2427_v18 }
 0x2b7   :  { %9932 = vmatprep.mubr.msk.f32.mxu0 %vm11572_vm0, %v11573_v1  ;;  %10832 = vmatpush3.bf16.msra.mxu0 %v12122_v42 }
 0x2b8   :  { %10833 = vmatprep.subr.bf16.mxu0 %v11571_v0 }
 0x2b9   :  { %10817 = vmatpush3.bf16.msra.mxu1 %v11778_v50  ;;  %v2845_v50 = vld [vmem:[#allocation10] sm:$0xff] }
 0x2ba   :  { %10824 = vmatprep.subr.bf16.mxu1 %v11571_v0 }
 0x2bb   :  { %10835 = vmatpush3.bf16.msra.mxu0 %v11820_v4 }
 0x2bc   :  { %9900 = vmatmul.mubr.msk.f32.vlgmr.msra.gmra.mrb[26].mxu1 %vm131_vm1, %v2427_v18  ;;  %10842 = vmatprep.subr.bf16.mxu0 %v11571_v0 }
 0x2bd   :  { %10826 = vmatpush3.bf16.msra.mxu1 %v11789_v56  ;;  %9921 = vmatprep.mubr.msk.f32.mxu1 %vm11572_vm0, %v11573_v1  ;;  %v12128_v56 = vpack.c.bf16 %v2846_v52, %v2845_v50  ;;  %v3016_v50 = vld [vmem:[#allocation11 + $0x20] sm:$0xff] }
 0x2be   :  { %10827 = vmatprep.subr.bf16.mxu1 %v11571_v0 }
 0x2c1   :  { %10829 = vmatpush3.bf16.msra.mxu1 %v11800_v60  ;;  %v2848_v60 = vld [vmem:[#allocation10 + $0x18] sm:$0xff] }
 0x2c2   :  { %10836 = vmatprep.subr.bf16.mxu1 %v11571_v0  ;;  %v12132_v10 = vpack.c.bf16 %v2848_v60, %v2847_v57 }
 0x2c4   :  { %9922 = vmatmul.mubr.msk.f32.vlgmr.msra.gmra.mrb[28].mxu1 %vm131_vm1, %v12044_v53 }
 0x2c5   :  { %9943 = vmatprep.mubr.msk.f32.mxu1 %vm11572_vm0, %v11573_v1  ;;  %10838 = vmatpush3.bf16.msra.mxu1 %v12128_v56 }
 0x2c6   :  { %10839 = vmatprep.subr.bf16.mxu1 %v11571_v0 }
 0x2c9   :  { %10841 = vmatpush3.bf16.msra.mxu1 %v12132_v10 }
 0x2ca   :  { %10848 = vmatprep.subr.bf16.mxu1 %v11571_v0 }
 0x357   :  { %v1832_v20 = vpop.f32.mrb[18].mxu0 }
 0x358   :  { %v9802_v4 = vpop.f32.mrb[19].mxu0 }
 0x35f   :  { %v1997_v22 = vpop.f32.mrb[20].mxu0 }
 0x360   :  { %v9824_v23 = vpop.f32.mrb[21].mxu0 }
 0x36f   :  { %v1905_v30 = vpop.f32.mrb[18].mxu1  ;;  %v2162_v32 = vpop.f32.mrb[22].mxu0 }
 0x370   :  { %v1906_v34 = vadd.f32 %v1905_v30, %v1832_v20  ;;  %v9813_v35 = vpop.f32.mrb[19].mxu1  ;;  %v9846_v8 = vpop.f32.mrb[23].mxu0  ;;  %v2163_v12 = vadd.f32 %v11998_v63, %v2162_v32  ;;  %v3017_v63 = vld [vmem:[#allocation11 + $0x28] sm:$0xff] }
 0x371   :  { %v12143_v20 = vpack.c.bf16 %v3017_v63, %v3016_v50  ;;  %v3255_v63 = vld [vmem:[#allocation11 + $0x40] sm:$0xff] }
 0x372   :  { %v1916_v36 = vadd.f32 %v11980_v24, %v1906_v34 }
 0x374   :  { %v8922_v25 = vmul.f32 -1.442695, %v1916_v36 }
 0x376   :  { %11269 = vpow2.f32 %v8922_v25 }
 0x377   :  { %v2067_v38 = vpop.f32.mrb[20].mxu1  ;;  %v2402_v39 = vpop.f32.mrb[24].mxu0 }
 0x378   :  { %v2068_v40 = vadd.f32 %v2067_v38, %v1997_v22  ;;  %v9835_v62 = vpop.f32.mrb[21].mxu1  ;;  %v9868_v13 = vpop.f32.mrb[25].mxu0  ;;  %v3019_v22 = vld [vmem:[#allocation11 + $0x38] sm:$0xff]  ;;  %v3174_v38 = vld [vmem:[#allocation10 + $0x40] sm:$0xff] }
 0x37a   :  { %v2078_v14 = vadd.f32 %v11986_v37, %v2068_v40 }
 0x37c   :  { %v8927_v44 = vmul.f32 -1.442695, %v2078_v14 }
 0x37e   :  { %11271 = vpow2.f32 %v8927_v44 }
 0x37f   :  { %v2243_v46 = vpop.f32.mrb[22].mxu1  ;;  %v2588_v47 = vpop.f32.mrb[26].mxu0 }
 0x380   :  { %v11270_v48 = vpop.eup %11269  ;;  %v9857_v51 = vpop.f32.mrb[23].mxu1  ;;  %v2244_v37 = vadd.f32 %v11992_v11, %v2243_v46 }
 0x381   :  { %v9890_v21 = vpop.f32.mrb[27].mxu0  ;;  %v1920_v19 = vadd.f32 1.0, %v11270_v48 }
 0x383   :  { %11273 = vrcp.f32 %v1920_v19 }
 0x387   :  { %v2496_v27 = vpop.f32.mrb[24].mxu1 }
 0x388   :  { %v11272_v24 = vpop.eup %11271  ;;  %v2497_v29 = vadd.f32 %v2496_v27, %v2402_v39  ;;  %v9879_v54 = vpop.f32.mrb[25].mxu1  ;;  %v3175_v39 = vld [vmem:[#allocation10 + $0x48] sm:$0xff]  ;;  %v3176_v27 = vld [vmem:[#allocation10 + $0x50] sm:$0xff] }
 0x389   :  { %v2082_v59 = vadd.f32 1.0, %v11272_v24  ;;  %v2753_v26 = vpop.f32.mrb[28].mxu0  ;;  %v12172_v51 = vpack.c.bf16 %v3175_v39, %v3174_v38  ;;  %v3177_v24 = vld [vmem:[#allocation10 + $0x58] sm:$0xff]  ;;  %v3609_v38 = vld [vmem:[#allocation8 + $0x30] sm:$0xff] }
 0x38a   :  { %v2507_v5 = vadd.f32 %v11861_v33, %v2497_v29  ;;  %v9912_v61 = vpop.f32.mrb[29].mxu0  ;;  %v3610_v39 = vld [vmem:[#allocation8 + $0x38] sm:$0xff] }
 0x38b   :  { %11275 = vrcp.f32 %v2082_v59  ;;  %v12185_v59 = vpack.c.bf16 %v3177_v24, %v3176_v27  ;;  %v3766_v27 = vld [vmem:[#allocation7 + $0x48] sm:$0xff] }
 0x38c   :  { %v8937_v49 = vmul.f32 -1.442695, %v2507_v5  ;;  %v3012_v5 = vld [vmem:[#allocation10 + $0x20] sm:$0xff] }
 0x38d   :  { %v11274_v2 = vpop.eup %11273 }
 0x38e   :  { %v2247_v28 = vmul.f32 %v11274_v2, %v2244_v37  ;;  %11277 = vpow2.f32 %v8937_v49  ;;  %v3013_v37 = vld [vmem:[#allocation10 + $0x28] sm:$0xff]  ;;  %v3421_v49 = vld [vmem:[#allocation8] sm:$0xff] }
 0x38f   :  { %v2658_v7 = vpop.f32.mrb[26].mxu1  ;;  %v3422_v2 = vld [vmem:[#allocation8 + $0x8] sm:$0xff] }
 0x390   :  { %v2248_v15 = vadd.f32 %v2247_v28, %v2163_v12  ;;  %v2659_v31 = vadd.f32 %v2658_v7, %v2588_v47  ;;  %v9901_v45 = vpop.f32.mrb[27].mxu1 }
 0x391   :  { %v12196_v45 = vpack.c.bf16 %v3422_v2, %v3421_v49  ;;  %v3767_v2 = vld [vmem:[#allocation7 + $0x50] sm:$0xff] }
 0x392   :  { %11279 = vtanh.f32 %v2248_v15  ;;  %v2669_v17 = vadd.f32 %v11867_v41, %v2659_v31  ;;  %v3018_v41 = vld [vmem:[#allocation11 + $0x30] sm:$0xff]  ;;  %v3410_v15 = vld [vmem:[#allocation2 + $0xb] sm:$0x1]  ;;  %v12194_v31 = vpack.c.bf16 %v3013_v37, %v3012_v5  ;;  %v3416_v5 = vld [vmem:[#allocation2 + $0x3b] sm:$0x1] }
 0x393   :  { %v12159_v35 = vpack.c.bf16 %v3019_v22, %v3018_v41  ;;  %v3412_v41 = vld [vmem:[#allocation2 + $0x1b] sm:$0x1] }
 0x394   :  { %v8942_v43 = vmul.f32 -1.442695, %v2669_v17  ;;  %v3014_v17 = vld [vmem:[#allocation10 + $0x30] sm:$0xff] }
 0x395   :  { %v11276_v33 = vpop.eup %11275 }
 0x396   :  { %11281 = vpow2.f32 %v8942_v43  ;;  %v2250_v16 = vsub.f32 1.0, %v11276_v33  ;;  %v2252_v57 = vmul.f32 %v11276_v33, %v12006_v6  ;;  %v12156_v6 = vld [vmem:[%s13099_s4 + $0x2] ss:$0 sm:$0xff]  ;;  %v3015_v33 = vld [vmem:[#allocation10 + $0x38] sm:$0xff] }
 0x397   :  { %v2834_v55 = vpop.f32.mrb[28].mxu1  ;;  %v2754_v62 = vadd.f32 %v12156_v6, %v2753_v26 }
 0x398   :  { %v11278_v18 = vpop.eup %11277  ;;  %v9923_v11 = vpop.f32.mrb[29].mxu1  ;;  %v2835_v40 = vadd.f32 %v11873_v58, %v2834_v55  ;;  %v3423_v55 = vld [vmem:[#allocation8 + $0x10] sm:$0xff] }
 0x399   :  { %v2511_v9 = vadd.f32 1.0, %v11278_v18  ;;  %v3424_v18 = vld [vmem:[#allocation8 + $0x18] sm:$0xff]  ;;  %v3411_v11 = vld [vmem:[#allocation2 + $0x13] sm:$0x1] }
 0x39a   :  { %v12208_v50 = vpack.c.bf16 %v3424_v18, %v3423_v55  ;;  %v3505_v22 = vrot.slane %v3411_v11, 6 }
 0x39b   :  { %11283 = vrcp.f32 %v2511_v9  ;;  %v3503_v9 = vrot.slane %v3410_v15, 7 }
 0x39c   :  { %v11280_v52 = vpop.eup %11279 }
 0x39d   :  { %v2251_v60 = vmul.f32 %v11280_v52, %v2250_v16  ;;  %v12206_v16 = vpack.c.bf16 %v3015_v33, %v3014_v17  ;;  %v3256_v52 = vld [vmem:[#allocation11 + $0x48] sm:$0xff]  ;;  %v3603_v17 = vld [vmem:[#allocation7 + $0x20] sm:$0xff] }
 0x39e   :  { %v3604_v33 = vld [vmem:[#allocation7 + $0x28] sm:$0xff] }
 0x39f   :  { %v12145_v4 = vadd.f32 %v2252_v57, %v2251_v60  ;;  %v3607_v57 = vld [vmem:[#allocation8 + $0x20] sm:$0xff]  ;;  %v3608_v60 = vld [vmem:[#allocation8 + $0x28] sm:$0xff]  ;;  %v12272_v11 = vpack.c.bf16 %v3604_v33, %v3603_v17  ;;  %v12329_v33 = vld [vmem:[%s13099_s4] ss:$0 sm:$0xff] }
 0x3a0   :  { %v11282_v23 = vpop.eup %11281 }
 0x3a1   :  { %v2255_v30 = vcombine.high %v12145_v4, %v12145_v4  ;;  %v2262_v32 = vrot.slane %v12145_v4, %v12004_v3  ;;  %9933 = vmatmul.mubr.msk.f32.vlgmr.msra.gmra.mrb[30].mxu0 %vm131_vm1, %v12145_v4  ;;  %v2673_v34 = vadd.f32 1.0, %v11282_v23 }
 0x3a2   :  { %10844 = vmatpush3.bf16.msra.mxu0 %v12143_v20  ;;  %9954 = vmatprep.mubr.msk.f32.mxu0 %vm11572_vm0, %v11573_v1 }
 0x3a3   :  { %v2269_v8 = vrot.slane %v2255_v30, %v12004_v3  ;;  %v2270_v36 = vcombine.high %v2262_v32, %v2262_v32  ;;  %v2278_v25 = vrot.slane %v2262_v32, %v12004_v3  ;;  %10845 = vmatprep.subr.bf16.mxu0 %v11571_v0  ;;  %11285 = vrcp.f32 %v2673_v34  ;;  %v3257_v34 = vld [vmem:[#allocation11 + $0x50] sm:$0xff] }
 0x3a4   :  { %v12219_v30 = vpack.c.bf16 %v3256_v52, %v3255_v63  ;;  %v12221_v32 = vpack.c.bf16 %v3608_v60, %v3607_v57  ;;  %v3846_v52 = vld [vmem:[#allocation8 + $0x40] sm:$0xff]  ;;  %v3847_v57 = vld [vmem:[#allocation8 + $0x48] sm:$0xff] }
 0x3a5   :  { %v11284_v13 = vpop.eup %11283  ;;  %v2271_v14 = vcombine.high %v2269_v8, %v2269_v8  ;;  %v2285_v44 = vrot.slane %v2269_v8, %v12004_v3  ;;  %v2292_v46 = vrot.slane %v2270_v36, %v12004_v3  ;;  %v2300_v47 = vcombine.high %v2278_v25, %v2278_v25  ;;  %2312 = vst.msk [vmem:[#allocation13 + $0x1] sm:$0x1] %vm1222_vm9, %v2278_v25  ;;  %v3413_v8 = vld [vmem:[#allocation2 + $0x23] sm:$0x1]  ;;  %v3258_v25 = vld [vmem:[#allocation11 + $0x58] sm:$0xff] }
 0x3a6   :  { %v2838_v48 = vmul.f32 %v11284_v13, %v2835_v40  ;;  %10847 = vmatpush3.bf16.msra.mxu0 %v12159_v35  ;;  %v3507_v36 = vrot.slane %v3412_v41, 5  ;;  %v3509_v13 = vrot.slane %v3413_v8, 4  ;;  %v12290_v60 = vpack.c.bf16 %v3847_v57, %v3846_v52  ;;  %v3848_v41 = vld [vmem:[#allocation8 + $0x50] sm:$0xff] }
 0x3a7   :  { %v2299_v21 = vrot.slane %v2271_v14, %v12004_v3  ;;  %v2301_v58 = vcombine.high %v2285_v44, %v2285_v44  ;;  %v2302_v19 = vcombine.high %v2292_v46, %v2292_v46  ;;  %2313 = vst.msk [vmem:[#allocation13 + $0x9] sm:$0x1] %vm1222_vm9, %v2292_v46  ;;  %2314 = vst.msk [vmem:[#allocation13 + $0x11] sm:$0x1] %vm1222_vm9, %v2300_v47  ;;  %10854 = vmatprep.subr.bf16.mxu0 %v11571_v0  ;;  %v3417_v47 = vld [vmem:[#allocation7] sm:$0xff] }
 0x3a8   :  { %2316 = vst.msk [vmem:[#allocation13 + $0x21] sm:$0x1] %vm1222_vm9, %v2285_v44  ;;  %v2839_v29 = vadd.f32 %v2838_v48, %v2754_v62  ;;  %v3414_v62 = vld [vmem:[#allocation2 + $0x2b] sm:$0x1]  ;;  %v12232_v14 = vpack.c.bf16 %v3258_v25, %v3257_v34  ;;  %v12234_v44 = vpack.c.bf16 %v3610_v39, %v3609_v38  ;;  %v3418_v48 = vld [vmem:[#allocation7 + $0x8] sm:$0xff] }
 0x3a9   :  { %v2303_v54 = vcombine.high %v2299_v21, %v2299_v21  ;;  %2315 = vst.msk [vmem:[#allocation13 + $0x19] sm:$0x1] %vm1222_vm9, %v2302_v19  ;;  %2317 = vst.msk [vmem:[#allocation13 + $0x29] sm:$0x1] %vm1222_vm9, %v2299_v21  ;;  %9955 = vmatmul.mubr.msk.f32.vlgmr.msra.gmra.mrb[32].mxu0 %vm131_vm1, %v12145_v4  ;;  %v3415_v21 = vld [vmem:[#allocation2 + $0x33] sm:$0x1] }
 0x3aa   :  { %2318 = vst.msk [vmem:[#allocation13 + $0x31] sm:$0x1] %vm1222_vm9, %v2301_v58  ;;  %11287 = vtanh.f32 %v2839_v29  ;;  %10856 = vmatpush3.bf16.msra.mxu0 %v12172_v51  ;;  %9976 = vmatprep.mubr.msk.f32.mxu0 %vm11572_vm0, %v11573_v1  ;;  %v3511_v58 = vrot.slane %v3414_v62, 3  ;;  %v3765_v19 = vld [vmem:[#allocation7 + $0x40] sm:$0xff]  ;;  %v12246_v29 = vpack.c.bf16 %v3418_v48, %v3417_v47  ;;  %v3941_v34 = vld [vmem:[#allocation11 + $0x18] sm:$0xff] }
 0x3ab   :  { %2319 = vst.msk [vmem:[#allocation13 + $0x39] sm:$0x1] %vm1222_vm9, %v2303_v54  ;;  %10857 = vmatprep.subr.bf16.mxu0 %v11571_v0  ;;  %v3419_v54 = vld [vmem:[#allocation7 + $0x10] sm:$0xff]  ;;  %v12250_v37 = vpack.c.bf16 %v3766_v27, %v3765_v19 }
 0x3ac   :  { %v12334_v57 = vld [vmem:[%s13102_s7 + $0x3] ss:$0 sm:$0xff] }
 0x3ad   :  { %v11286_v26 = vpop.eup %11285 }
 0x3ae   :  { %10859 = vmatpush3.bf16.msra.mxu0 %v12185_v59  ;;  %v2841_v61 = vsub.f32 1.0, %v11286_v26  ;;  %v2843_v28 = vmul.f32 %v11286_v26, %v12044_v53  ;;  %v3409_v53 = vld [vmem:[#allocation2 + $0x3] sm:$0x1]  ;;  %v3420_v26 = vld [vmem:[#allocation7 + $0x18] sm:$0xff] }
 0x3af   :  { %10866 = vmatprep.subr.bf16.mxu0 %v11571_v0  ;;  %v3504_v23 = vsel %vm214_vm2, %v3503_v9, %v3409_v53  ;;  %v3605_v9 = vld [vmem:[#allocation7 + $0x30] sm:$0xff]  ;;  %v3606_v53 = vld [vmem:[#allocation7 + $0x38] sm:$0xff] }
 0x3b0   :  { %v3506_v40 = vsel %vm217_vm3, %v3505_v22, %v3504_v23  ;;  %v12279_v63 = vpack.c.bf16 %v3606_v53, %v3605_v9  ;;  %v3849_v22 = vld [vmem:[#allocation8 + $0x58] sm:$0xff] }
 0x3b1   :  { %v3508_v46 = vsel %vm220_vm4, %v3507_v36, %v3506_v40  ;;  %v12295_v23 = vpack.c.bf16 %v3849_v22, %v3848_v41  ;;  %v12317_v40 = vld [vmem:[%s13102_s7] ss:$0 sm:$0xff] }
 0x3b2   :  { %v3510_v24 = vsel %vm223_vm5, %v3509_v13, %v3508_v46 }
 0x3b3   :  { %v3512_v49 = vsel %vm226_vm6, %v3511_v58, %v3510_v24  ;;  %v12323_v58 = vld [vmem:[%s13102_s7 + $0x1] ss:$0 sm:$0xff] }
 0x3b4   :  { %v11288_v12 = vpop.eup %11287 }
 0x3b5   :  { %v2842_v7 = vmul.f32 %v11288_v12, %v2841_v61  ;;  %v3513_v61 = vrot.slane %v3415_v21, 2  ;;  %v3768_v12 = vld [vmem:[#allocation7 + $0x58] sm:$0xff] }
 0x3b6   :  { %v12265_v55 = vpack.c.bf16 %v3768_v12, %v3767_v2 }
 0x3b7   :  { %v12198_v43 = vadd.f32 %v2843_v28, %v2842_v7  ;;  %v12258_v28 = vpack.c.bf16 %v3420_v26, %v3419_v54  ;;  %v3515_v7 = vrot.slane %v3416_v5, 1  ;;  %v3514_v15 = vsel %vm229_vm7, %v3513_v61, %v3512_v49 }
 0x3b9   :  { %9944 = vmatmul.mubr.msk.f32.vlgmr.msra.gmra.mrb[30].mxu1 %vm131_vm1, %v12198_v43  ;;  %9977 = vmatmul.mubr.msk.f32.vlgmr.msra.gmra.mrb[34].mxu0 %vm131_vm1, %v12198_v43  ;;  %v3516_v18 = vsel %vm232_vm8, %v3515_v7, %v3514_v15 }
 0x3ba   :  { %10850 = vmatpush3.bf16.msra.mxu1 %v12194_v31  ;;  %10868 = vmatpush3.bf16.msra.mxu0 %v12196_v45 }
 0x3bb   :  { %10851 = vmatprep.subr.bf16.mxu1 %v11571_v0  ;;  %10869 = vmatprep.subr.bf16.mxu0 %v11571_v0 }
 0x3bc   :  { %9965 = vmatprep.mubr.msk.f32.mxu1 %vm11572_vm0, %v11573_v1  ;;  %9998 = vmatprep.mubr.msk.f32.mxu0 %vm11572_vm0, %v11573_v1 }
 0x3be   :  { %10853 = vmatpush3.bf16.msra.mxu1 %v12206_v16  ;;  %10871 = vmatpush3.bf16.msra.mxu0 %v12208_v50 }
 0x3bf   :  { %10860 = vmatprep.subr.bf16.mxu1 %v11571_v0  ;;  %10878 = vmatprep.subr.bf16.mxu0 %v11571_v0 }
 0x3c1   :  { %9966 = vmatmul.mubr.msk.f32.vlgmr.msra.gmra.mrb[32].mxu1 %vm131_vm1, %v12198_v43  ;;  %9999 = vmatmul.mubr.msk.f32.vlgmr.msra.gmra.mrb[36].mxu0 %vm131_vm1, %v12198_v43 }
 0x3c2   :  { %10862 = vmatpush3.bf16.msra.mxu1 %v12219_v30  ;;  %10880 = vmatpush3.bf16.msra.mxu0 %v12221_v32 }
 0x3c3   :  { %10863 = vmatprep.subr.bf16.mxu1 %v11571_v0  ;;  %10881 = vmatprep.subr.bf16.mxu0 %v11571_v0 }
 0x3c4   :  { %9987 = vmatprep.mubr.msk.f32.mxu1 %vm11572_vm0, %v11573_v1  ;;  %10020 = vmatprep.mubr.msk.f32.mxu0 %vm11572_vm0, %v11573_v1 }
 0x3c6   :  { %10865 = vmatpush3.bf16.msra.mxu1 %v12232_v14  ;;  %10883 = vmatpush3.bf16.msra.mxu0 %v12234_v44 }
 0x3c7   :  { %10872 = vmatprep.subr.bf16.mxu1 %v11571_v0  ;;  %10890 = vmatprep.subr.bf16.mxu0 %v11571_v0 }
 0x3c9   :  { %9988 = vmatmul.mubr.msk.f32.vlgmr.msra.gmra.mrb[34].mxu1 %vm131_vm1, %v12145_v4  ;;  %10021 = vmatmul.mubr.msk.f32.vlgmr.msra.gmra.mrb[38].mxu0 %vm131_vm1, %v12198_v43 }
 0x3ca   :  { %10874 = vmatpush3.bf16.msra.mxu1 %v12246_v29  ;;  %10009 = vmatprep.mubr.msk.f32.mxu1 %vm11572_vm0, %v11573_v1 }
 0x3cb   :  { %10875 = vmatprep.subr.bf16.mxu1 %v11571_v0  ;;  %10892 = vmatpush3.bf16.msra.mxu0 %v12250_v37 }
 0x3cc   :  { %10893 = vmatprep.subr.bf16.mxu0 %v11571_v0  ;;  %10042 = vmatprep.mubr.msk.f32.mxu0 %vm11572_vm0, %v11573_v1 }
 0x3ce   :  { %10877 = vmatpush3.bf16.msra.mxu1 %v12258_v28 }
 0x3cf   :  { %10884 = vmatprep.subr.bf16.mxu1 %v11571_v0  ;;  %10895 = vmatpush3.bf16.msra.mxu0 %v12265_v55 }
 0x3d0   :  { %10902 = vmatprep.subr.bf16.mxu0 %v11571_v0 }
 0x3d1   :  { %10010 = vmatmul.mubr.msk.f32.vlgmr.msra.gmra.mrb[36].mxu1 %vm131_vm1, %v3516_v18 }
 0x3d2   :  { %10886 = vmatpush3.bf16.msra.mxu1 %v12272_v11  ;;  %10031 = vmatprep.mubr.msk.f32.mxu1 %vm11572_vm0, %v11573_v1 }
 0x3d3   :  { %10887 = vmatprep.subr.bf16.mxu1 %v11571_v0  ;;  %10043 = vmatmul.mubr.msk.f32.vlgmr.msra.gmra.mrb[40].mxu0 %vm131_vm1, %v3516_v18 }
 0x3d4   :  { %10904 = vmatpush3.bf16.msra.mxu0 %v12122_v42  ;;  %10064 = vmatprep.mubr.msk.f32.mxu0 %vm11572_vm0, %v11573_v1  ;;  %v3940_v42 = vld [vmem:[#allocation11 + $0x10] sm:$0xff] }
 0x3d5   :  { %10905 = vmatprep.subr.bf16.mxu0 %v11571_v0  ;;  %v12310_v8 = vpack.c.bf16 %v3941_v34, %v3940_v42  ;;  %v12340_v34 = vld [vmem:[%s13102_s7 + $0x2] ss:$0 sm:$0xff] }
 0x3d6   :  { %10889 = vmatpush3.bf16.msra.mxu1 %v12279_v63 }
 0x3d7   :  { %10896 = vmatprep.subr.bf16.mxu1 %v11571_v0 }
 0x3d8   :  { %10907 = vmatpush3.bf16.msra.mxu0 %v12310_v8 }
 0x3d9   :  { %10032 = vmatmul.mubr.msk.f32.vlgmr.msra.gmra.mrb[38].mxu1 %vm131_vm1, %v3516_v18  ;;  %10914 = vmatprep.subr.bf16.mxu0 %v11571_v0 }
 0x3da   :  { %10898 = vmatpush3.bf16.msra.mxu1 %v12290_v60  ;;  %10053 = vmatprep.mubr.msk.f32.mxu1 %vm11572_vm0, %v11573_v1 }
 0x3db   :  { %10899 = vmatprep.subr.bf16.mxu1 %v11571_v0 }
 0x3de   :  { %10901 = vmatpush3.bf16.msra.mxu1 %v12295_v23 }
 0x3df   :  { %10908 = vmatprep.subr.bf16.mxu1 %v11571_v0 }
 0x3e1   :  { %10054 = vmatmul.mubr.msk.f32.vlgmr.msra.gmra.mrb[40].mxu1 %vm131_vm1, %v12198_v43 }
 0x3e2   :  { %10910 = vmatpush3.bf16.msra.mxu1 %v12128_v56  ;;  %10075 = vmatprep.mubr.msk.f32.mxu1 %vm11572_vm0, %v11573_v1 }
 0x3e3   :  { %10911 = vmatprep.subr.bf16.mxu1 %v11571_v0 }
 0x3e6   :  { %10913 = vmatpush3.bf16.msra.mxu1 %v12132_v10 }
 0x3e7   :  { %10920 = vmatprep.subr.bf16.mxu1 %v11571_v0 }
 0x474   :  { %v2921_v36 = vpop.f32.mrb[30].mxu0 }
 0x475   :  { %v9934_v25 = vpop.f32.mrb[31].mxu0 }
 0x47c   :  { %v3086_v56 = vpop.f32.mrb[32].mxu0 }
 0x47d   :  { %v9956_v38 = vpop.f32.mrb[33].mxu0 }
 0x48c   :  { %v2994_v39 = vpop.f32.mrb[30].mxu1  ;;  %v3251_v10 = vpop.f32.mrb[34].mxu0 }
 0x48d   :  { %v2995_v62 = vadd.f32 %v2994_v39, %v2921_v36  ;;  %v9945_v13 = vpop.f32.mrb[31].mxu1  ;;  %v9978_v46 = vpop.f32.mrb[35].mxu0  ;;  %v3252_v38 = vadd.f32 %v12340_v34, %v3251_v10 }
 0x48e   :  { %v12347_v13 = vld [vmem:[%s13099_s4 + $0x1] ss:$0 sm:$0xff] }
 0x48f   :  { %v3005_v47 = vadd.f32 %v12317_v40, %v2995_v62 }
 0x491   :  { %v8952_v48 = vmul.f32 -1.442695, %v3005_v47 }
 0x493   :  { %11289 = vpow2.f32 %v8952_v48 }
 0x494   :  { %v3156_v21 = vpop.f32.mrb[32].mxu1  ;;  %v3491_v19 = vpop.f32.mrb[36].mxu0 }
 0x495   :  { %v3157_v27 = vadd.f32 %v3156_v21, %v3086_v56  ;;  %v9967_v24 = vpop.f32.mrb[33].mxu1  ;;  %v10000_v54 = vpop.f32.mrb[37].mxu0 }
 0x497   :  { %v3167_v26 = vadd.f32 %v12323_v58, %v3157_v27 }
 0x499   :  { %v8957_v5 = vmul.f32 -1.442695, %v3167_v26 }
 0x49b   :  { %11291 = vpow2.f32 %v8957_v5 }
 0x49c   :  { %v3332_v61 = vpop.f32.mrb[34].mxu1  ;;  %v3677_v49 = vpop.f32.mrb[38].mxu0 }
 0x49d   :  { %v11290_v2 = vpop.eup %11289  ;;  %v9989_v12 = vpop.f32.mrb[35].mxu1  ;;  %v3333_v36 = vadd.f32 %v12334_v57, %v3332_v61 }
 0x49e   :  { %v10022_v7 = vpop.f32.mrb[39].mxu0  ;;  %v3009_v15 = vadd.f32 1.0, %v11290_v2 }
 0x4a0   :  { %11293 = vrcp.f32 %v3009_v15  ;;  %v12356_v15 = vld [vmem:[%s13099_s4 + $0x3] ss:$0 sm:$0xff] }
 0x4a4   :  { %v3585_v17 = vpop.f32.mrb[36].mxu1 }
 0x4a5   :  { %v11292_v18 = vpop.eup %11291  ;;  %v3586_v9 = vadd.f32 %v3585_v17, %v3491_v19  ;;  %v10011_v53 = vpop.f32.mrb[37].mxu1 }
 0x4a6   :  { %v3171_v52 = vadd.f32 1.0, %v11292_v18  ;;  %v3842_v41 = vpop.f32.mrb[40].mxu0 }
 0x4a7   :  { %v3596_v22 = vadd.f32 %v12329_v33, %v3586_v9  ;;  %v10044_v42 = vpop.f32.mrb[41].mxu0 }
 0x4a8   :  { %11295 = vrcp.f32 %v3171_v52  ;;  %v3843_v42 = vadd.f32 %v12156_v6, %v3842_v41 }
 0x4a9   :  { %v8967_v25 = vmul.f32 -1.442695, %v3596_v22 }
 0x4aa   :  { %v11294_v56 = vpop.eup %11293 }
 0x4ab   :  { %v3336_v39 = vmul.f32 %v11294_v56, %v3333_v36  ;;  %11297 = vpow2.f32 %v8967_v25 }
 0x4ac   :  { %v3747_v62 = vpop.f32.mrb[38].mxu1 }
 0x4ad   :  { %v3337_v46 = vadd.f32 %v3336_v39, %v3252_v38  ;;  %v3748_v47 = vadd.f32 %v3747_v62, %v3677_v49  ;;  %v10033_v48 = vpop.f32.mrb[39].mxu1 }
 0x4af   :  { %11299 = vtanh.f32 %v3337_v46  ;;  %v3758_v21 = vadd.f32 %v12347_v13, %v3748_v47 }
 0x4b1   :  { %v8972_v19 = vmul.f32 -1.442695, %v3758_v21 }
 0x4b2   :  { %v11296_v27 = vpop.eup %11295 }
 0x4b3   :  { %11301 = vpow2.f32 %v8972_v19  ;;  %v3339_v5 = vsub.f32 1.0, %v11296_v27  ;;  %v3341_v2 = vmul.f32 %v11296_v27, %v12145_v4 }
 0x4b4   :  { %v3923_v24 = vpop.f32.mrb[40].mxu1 }
 0x4b5   :  { %v11298_v54 = vpop.eup %11297  ;;  %v10055_v10 = vpop.f32.mrb[41].mxu1  ;;  %v3924_v22 = vadd.f32 %v12356_v15, %v3923_v24  ;;  %v4499_v24 = vld [vmem:[#allocation2 + $0xc] sm:$0x1] }
 0x4b6   :  { %v3600_v26 = vadd.f32 1.0, %v11298_v54  ;;  %v4592_v10 = vrot.slane %v4499_v24, 7 }
 0x4b8   :  { %11303 = vrcp.f32 %v3600_v26 }
 0x4b9   :  { %v11300_v61 = vpop.eup %11299 }
 0x4ba   :  { %v3340_v12 = vmul.f32 %v11300_v61, %v3339_v5 }
 0x4bc   :  { %v12351_v7 = vadd.f32 %v3341_v2, %v3340_v12  ;;  %v4503_v2 = vld [vmem:[#allocation2 + $0x2c] sm:$0x1] }
 0x4bd   :  { %v11302_v49 = vpop.eup %11301 }
 0x4be   :  { %v3344_v17 = vcombine.high %v12351_v7, %v12351_v7  ;;  %v3351_v18 = vrot.slane %v12351_v7, %v12004_v3  ;;  %10065 = vmatmul.mubr.msk.f32.vlgmr.msra.gmra.mrb[42].mxu0 %vm131_vm1, %v12351_v7  ;;  %v3762_v9 = vadd.f32 1.0, %v11302_v49  ;;  %v4600_v49 = vrot.slane %v4503_v2, 3 }
 0x4bf   :  { %10916 = vmatpush3.bf16.msra.mxu0 %v12143_v20  ;;  %10086 = vmatprep.mubr.msk.f32.mxu0 %vm11572_vm0, %v11573_v1 }
 0x4c0   :  { %v3358_v4 = vrot.slane %v3344_v17, %v12004_v3  ;;  %v3359_v53 = vcombine.high %v3351_v18, %v3351_v18  ;;  %v3367_v52 = vrot.slane %v3351_v18, %v12004_v3  ;;  %10917 = vmatprep.subr.bf16.mxu0 %v11571_v0  ;;  %11305 = vrcp.f32 %v3762_v9 }
 0x4c2   :  { %v11304_v36 = vpop.eup %11303  ;;  %v3360_v25 = vcombine.high %v3358_v4, %v3358_v4  ;;  %v3374_v56 = vrot.slane %v3358_v4, %v12004_v3  ;;  %v3381_v20 = vrot.slane %v3359_v53, %v12004_v3  ;;  %v3389_v38 = vcombine.high %v3367_v52, %v3367_v52  ;;  %3401 = vst.msk [vmem:[#allocation13 + $0x2] sm:$0x1] %vm1222_vm9, %v3367_v52 }
 0x4c3   :  { %v3927_v39 = vmul.f32 %v11304_v36, %v3924_v22  ;;  %10919 = vmatpush3.bf16.msra.mxu0 %v12159_v35 }
 0x4c4   :  { %v3388_v62 = vrot.slane %v3360_v25, %v12004_v3  ;;  %v3390_v46 = vcombine.high %v3374_v56, %v3374_v56  ;;  %v3391_v47 = vcombine.high %v3381_v20, %v3381_v20  ;;  %3402 = vst.msk [vmem:[#allocation13 + $0xa] sm:$0x1] %vm1222_vm9, %v3381_v20  ;;  %3403 = vst.msk [vmem:[#allocation13 + $0x12] sm:$0x1] %vm1222_vm9, %v3389_v38  ;;  %10926 = vmatprep.subr.bf16.mxu0 %v11571_v0 }
 0x4c5   :  { %3405 = vst.msk [vmem:[#allocation13 + $0x22] sm:$0x1] %vm1222_vm9, %v3374_v56  ;;  %v3928_v6 = vadd.f32 %v3927_v39, %v3843_v42 }
 0x4c6   :  { %v3392_v41 = vcombine.high %v3388_v62, %v3388_v62  ;;  %3404 = vst.msk [vmem:[#allocation13 + $0x1a] sm:$0x1] %vm1222_vm9, %v3391_v47  ;;  %3406 = vst.msk [vmem:[#allocation13 + $0x2a] sm:$0x1] %vm1222_vm9, %v3388_v62  ;;  %10087 = vmatmul.mubr.msk.f32.vlgmr.msra.gmra.mrb[44].mxu0 %vm131_vm1, %v12351_v7 }
 0x4c7   :  { %3407 = vst.msk [vmem:[#allocation13 + $0x32] sm:$0x1] %vm1222_vm9, %v3390_v46  ;;  %11307 = vtanh.f32 %v3928_v6  ;;  %10928 = vmatpush3.bf16.msra.mxu0 %v12172_v51  ;;  %10108 = vmatprep.mubr.msk.f32.mxu0 %vm11572_vm0, %v11573_v1  ;;  %v4500_v51 = vld [vmem:[#allocation2 + $0x14] sm:$0x1] }
 0x4c8   :  { %3408 = vst.msk [vmem:[#allocation13 + $0x3a] sm:$0x1] %vm1222_vm9, %v3392_v41  ;;  %10929 = vmatprep.subr.bf16.mxu0 %v11571_v0  ;;  %v4594_v26 = vrot.slane %v4500_v51, 6 }
 0x4ca   :  { %v11306_v35 = vpop.eup %11305 }
 0x4cb   :  { %10931 = vmatpush3.bf16.msra.mxu0 %v12185_v59  ;;  %v3930_v48 = vsub.f32 1.0, %v11306_v35  ;;  %v3932_v19 = vmul.f32 %v11306_v35, %v12198_v43  ;;  %v4498_v59 = vld [vmem:[#allocation2 + $0x4] sm:$0x1]  ;;  %v4501_v43 = vld [vmem:[#allocation2 + $0x1c] sm:$0x1] }
 0x4cc   :  { %10938 = vmatprep.subr.bf16.mxu0 %v11571_v0  ;;  %v4593_v5 = vsel %vm214_vm2, %v4592_v10, %v4498_v59 }
 0x4cd   :  { %v4595_v61 = vsel %vm217_vm3, %v4594_v26, %v4593_v5 }
 0x4d1   :  { %v11308_v21 = vpop.eup %11307 }
 0x4d2   :  { %v3931_v27 = vmul.f32 %v11308_v21, %v3930_v48 }
 0x4d4   :  { %v12394_v54 = vadd.f32 %v3932_v19, %v3931_v27 }
 0x4d6   :  { %10076 = vmatmul.mubr.msk.f32.vlgmr.msra.gmra.mrb[42].mxu1 %vm131_vm1, %v12394_v54  ;;  %10109 = vmatmul.mubr.msk.f32.vlgmr.msra.gmra.mrb[46].mxu0 %vm131_vm1, %v12394_v54 }
 0x4d7   :  { %10922 = vmatpush3.bf16.msra.mxu1 %v12194_v31  ;;  %10940 = vmatpush3.bf16.msra.mxu0 %v12196_v45  ;;  %v4502_v31 = vld [vmem:[#allocation2 + $0x24] sm:$0x1]  ;;  %v4596_v45 = vrot.slane %v4501_v43, 5 }
 0x4d8   :  { %10923 = vmatprep.subr.bf16.mxu1 %v11571_v0  ;;  %10941 = vmatprep.subr.bf16.mxu0 %v11571_v0  ;;  %v4598_v12 = vrot.slane %v4502_v31, 4 }
 0x4d9   :  { %10097 = vmatprep.mubr.msk.f32.mxu1 %vm11572_vm0, %v11573_v1  ;;  %10130 = vmatprep.mubr.msk.f32.mxu0 %vm11572_vm0, %v11573_v1 }
 0x4db   :  { %10925 = vmatpush3.bf16.msra.mxu1 %v12206_v16  ;;  %10943 = vmatpush3.bf16.msra.mxu0 %v12208_v50  ;;  %v4597_v16 = vsel %vm220_vm4, %v4596_v45, %v4595_v61  ;;  %v4504_v50 = vld [vmem:[#allocation2 + $0x34] sm:$0x1] }
 0x4dc   :  { %10932 = vmatprep.subr.bf16.mxu1 %v11571_v0  ;;  %10950 = vmatprep.subr.bf16.mxu0 %v11571_v0  ;;  %v4599_v17 = vsel %vm223_vm5, %v4598_v12, %v4597_v16 }
 0x4dd   :  { %v4601_v18 = vsel %vm226_vm6, %v4600_v49, %v4599_v17 }
 0x4de   :  { %10098 = vmatmul.mubr.msk.f32.vlgmr.msra.gmra.mrb[44].mxu1 %vm131_vm1, %v12394_v54  ;;  %10131 = vmatmul.mubr.msk.f32.vlgmr.msra.gmra.mrb[48].mxu0 %vm131_vm1, %v12394_v54 }
 0x4df   :  { %10934 = vmatpush3.bf16.msra.mxu1 %v12219_v30  ;;  %10952 = vmatpush3.bf16.msra.mxu0 %v12221_v32  ;;  %v4505_v30 = vld [vmem:[#allocation2 + $0x3c] sm:$0x1]  ;;  %v4602_v32 = vrot.slane %v4504_v50, 2 }
 0x4e0   :  { %10935 = vmatprep.subr.bf16.mxu1 %v11571_v0  ;;  %10953 = vmatprep.subr.bf16.mxu0 %v11571_v0 }
 0x4e1   :  { %10119 = vmatprep.mubr.msk.f32.mxu1 %vm11572_vm0, %v11573_v1  ;;  %10152 = vmatprep.mubr.msk.f32.mxu0 %vm11572_vm0, %v11573_v1 }
 0x4e3   :  { %10937 = vmatpush3.bf16.msra.mxu1 %v12232_v14  ;;  %10955 = vmatpush3.bf16.msra.mxu0 %v12234_v44  ;;  %v4604_v14 = vrot.slane %v4505_v30, 1  ;;  %v4603_v44 = vsel %vm229_vm7, %v4602_v32, %v4601_v18 }
 0x4e4   :  { %10944 = vmatprep.subr.bf16.mxu1 %v11571_v0  ;;  %10962 = vmatprep.subr.bf16.mxu0 %v11571_v0 }
 0x4e5   :  { %v4605_v9 = vsel %vm232_vm8, %v4604_v14, %v4603_v44 }
 0x4e6   :  { %10120 = vmatmul.mubr.msk.f32.vlgmr.msra.gmra.mrb[46].mxu1 %vm131_vm1, %v12351_v7  ;;  %10153 = vmatmul.mubr.msk.f32.vlgmr.msra.gmra.mrb[50].mxu0 %vm131_vm1, %v12394_v54 }
 0x4e7   :  { %10946 = vmatpush3.bf16.msra.mxu1 %v12246_v29  ;;  %10141 = vmatprep.mubr.msk.f32.mxu1 %vm11572_vm0, %v11573_v1  ;;  %v5027_v29 = vld [vmem:[#allocation11] sm:$0xff] }
 0x4e8   :  { %10947 = vmatprep.subr.bf16.mxu1 %v11571_v0  ;;  %10964 = vmatpush3.bf16.msra.mxu0 %v12250_v37  ;;  %v5028_v37 = vld [vmem:[#allocation11 + $0x8] sm:$0xff] }
 0x4e9   :  { %10965 = vmatprep.subr.bf16.mxu0 %v11571_v0  ;;  %10174 = vmatprep.mubr.msk.f32.mxu0 %vm11572_vm0, %v11573_v1 }
 0x4eb   :  { %10949 = vmatpush3.bf16.msra.mxu1 %v12258_v28  ;;  %v12472_v28 = vpack.c.bf16 %v5028_v37, %v5027_v29 }
 0x4ec   :  { %10956 = vmatprep.subr.bf16.mxu1 %v11571_v0  ;;  %10967 = vmatpush3.bf16.msra.mxu0 %v12265_v55  ;;  %v5023_v55 = vld [vmem:[#allocation10] sm:$0xff] }
 0x4ed   :  { %10974 = vmatprep.subr.bf16.mxu0 %v11571_v0 }
 0x4ee   :  { %10142 = vmatmul.mubr.msk.f32.vlgmr.msra.gmra.mrb[48].mxu1 %vm131_vm1, %v4605_v9 }
 0x4ef   :  { %10958 = vmatpush3.bf16.msra.mxu1 %v12272_v11  ;;  %10163 = vmatprep.mubr.msk.f32.mxu1 %vm11572_vm0, %v11573_v1  ;;  %v5024_v11 = vld [vmem:[#allocation10 + $0x8] sm:$0xff] }
 0x4f0   :  { %10959 = vmatprep.subr.bf16.mxu1 %v11571_v0  ;;  %10175 = vmatmul.mubr.msk.f32.vlgmr.msra.gmra.mrb[52].mxu0 %vm131_vm1, %v4605_v9 }
 0x4f1   :  { %10196 = vmatprep.mubr.msk.f32.mxu0 %vm11572_vm0, %v11573_v1  ;;  %10976 = vmatpush3.bf16.msra.mxu0 %v12472_v28 }
 0x4f2   :  { %10977 = vmatprep.subr.bf16.mxu0 %v11571_v0 }
 0x4f3   :  { %10961 = vmatpush3.bf16.msra.mxu1 %v12279_v63  ;;  %v12478_v63 = vpack.c.bf16 %v5024_v11, %v5023_v55  ;;  %v5194_v55 = vld [vmem:[#allocation11 + $0x20] sm:$0xff] }
 0x4f4   :  { %10968 = vmatprep.subr.bf16.mxu1 %v11571_v0 }
 0x4f5   :  { %10979 = vmatpush3.bf16.msra.mxu0 %v12310_v8 }
 0x4f6   :  { %10164 = vmatmul.mubr.msk.f32.vlgmr.msra.gmra.mrb[50].mxu1 %vm131_vm1, %v4605_v9  ;;  %10986 = vmatprep.subr.bf16.mxu0 %v11571_v0 }
 0x4f7   :  { %10970 = vmatpush3.bf16.msra.mxu1 %v12290_v60  ;;  %10185 = vmatprep.mubr.msk.f32.mxu1 %vm11572_vm0, %v11573_v1  ;;  %v5025_v60 = vld [vmem:[#allocation10 + $0x10] sm:$0xff] }
 0x4f8   :  { %10971 = vmatprep.subr.bf16.mxu1 %v11571_v0 }
 0x4fb   :  { %10973 = vmatpush3.bf16.msra.mxu1 %v12295_v23  ;;  %v5026_v23 = vld [vmem:[#allocation10 + $0x18] sm:$0xff] }
 0x4fc   :  { %10980 = vmatprep.subr.bf16.mxu1 %v11571_v0  ;;  %v12482_v4 = vpack.c.bf16 %v5026_v23, %v5025_v60 }
 0x4fe   :  { %10186 = vmatmul.mubr.msk.f32.vlgmr.msra.gmra.mrb[52].mxu1 %vm131_vm1, %v12394_v54 }
 0x4ff   :  { %10207 = vmatprep.mubr.msk.f32.mxu1 %vm11572_vm0, %v11573_v1  ;;  %10982 = vmatpush3.bf16.msra.mxu1 %v12478_v63 }
 0x500   :  { %10983 = vmatprep.subr.bf16.mxu1 %v11571_v0 }
 0x503   :  { %10985 = vmatpush3.bf16.msra.mxu1 %v12482_v4 }
 0x504   :  { %10992 = vmatprep.subr.bf16.mxu1 %v11571_v0 }
 0x591   :  { %v4010_v53 = vpop.f32.mrb[42].mxu0 }
 0x592   :  { %v10066_v8 = vpop.f32.mrb[43].mxu0 }
 0x599   :  { %v4175_v52 = vpop.f32.mrb[44].mxu0 }
 0x59a   :  { %v10088_v22 = vpop.f32.mrb[45].mxu0 }
 0x5a9   :  { %v4083_v42 = vpop.f32.mrb[42].mxu1  ;;  %v4340_v36 = vpop.f32.mrb[46].mxu0 }
 0x5aa   :  { %v4084_v25 = vadd.f32 %v4083_v42, %v4010_v53  ;;  %v10077_v56 = vpop.f32.mrb[43].mxu1  ;;  %v10110_v20 = vpop.f32.mrb[47].mxu0  ;;  %v4341_v16 = vadd.f32 %v12340_v34, %v4340_v36  ;;  %v5195_v34 = vld [vmem:[#allocation11 + $0x28] sm:$0xff] }
 0x5ab   :  { %v12493_v53 = vpack.c.bf16 %v5195_v34, %v5194_v55  ;;  %v5433_v34 = vld [vmem:[#allocation11 + $0x40] sm:$0xff] }
 0x5ac   :  { %v4094_v38 = vadd.f32 %v12317_v40, %v4084_v25 }
 0x5ae   :  { %v8982_v39 = vmul.f32 -1.442695, %v4094_v38 }
 0x5b0   :  { %11309 = vpow2.f32 %v8982_v39 }
 0x5b1   :  { %v4245_v62 = vpop.f32.mrb[44].mxu1  ;;  %v4580_v46 = vpop.f32.mrb[48].mxu0 }
 0x5b2   :  { %v4246_v47 = vadd.f32 %v4245_v62, %v4175_v52  ;;  %v10099_v6 = vpop.f32.mrb[45].mxu1  ;;  %v10132_v41 = vpop.f32.mrb[49].mxu0  ;;  %v5197_v52 = vld [vmem:[#allocation11 + $0x38] sm:$0xff]  ;;  %v5352_v62 = vld [vmem:[#allocation10 + $0x40] sm:$0xff] }
 0x5b4   :  { %v4256_v35 = vadd.f32 %v12323_v58, %v4246_v47 }
 0x5b6   :  { %v8987_v48 = vmul.f32 -1.442695, %v4256_v35 }
 0x5b8   :  { %11311 = vpow2.f32 %v8987_v48 }
 0x5b9   :  { %v4421_v21 = vpop.f32.mrb[46].mxu1  ;;  %v4766_v19 = vpop.f32.mrb[50].mxu0 }
 0x5ba   :  { %v11310_v27 = vpop.eup %11309  ;;  %v10121_v24 = vpop.f32.mrb[47].mxu1  ;;  %v4422_v58 = vadd.f32 %v12334_v57, %v4421_v21 }
 0x5bb   :  { %v10154_v51 = vpop.f32.mrb[51].mxu0  ;;  %v4098_v10 = vadd.f32 1.0, %v11310_v27 }
 0x5bd   :  { %11313 = vrcp.f32 %v4098_v10 }
 0x5c1   :  { %v4674_v59 = vpop.f32.mrb[48].mxu1 }
 0x5c2   :  { %v11312_v40 = vpop.eup %11311  ;;  %v4675_v43 = vadd.f32 %v4674_v59, %v4580_v46  ;;  %v10143_v26 = vpop.f32.mrb[49].mxu1  ;;  %v5353_v46 = vld [vmem:[#allocation10 + $0x48] sm:$0xff]  ;;  %v5354_v59 = vld [vmem:[#allocation10 + $0x50] sm:$0xff] }
 0x5c3   :  { %v4260_v5 = vadd.f32 1.0, %v11312_v40  ;;  %v4931_v31 = vpop.f32.mrb[52].mxu0  ;;  %v12522_v24 = vpack.c.bf16 %v5353_v46, %v5352_v62  ;;  %v5355_v40 = vld [vmem:[#allocation10 + $0x58] sm:$0xff]  ;;  %v5787_v62 = vld [vmem:[#allocation8 + $0x30] sm:$0xff] }
 0x5c4   :  { %v4685_v45 = vadd.f32 %v12329_v33, %v4675_v43  ;;  %v10176_v61 = vpop.f32.mrb[53].mxu0  ;;  %v5788_v46 = vld [vmem:[#allocation8 + $0x38] sm:$0xff] }
 0x5c5   :  { %11315 = vrcp.f32 %v4260_v5  ;;  %v12535_v5 = vpack.c.bf16 %v5355_v40, %v5354_v59  ;;  %v5944_v59 = vld [vmem:[#allocation7 + $0x48] sm:$0xff] }
 0x5c6   :  { %v8997_v2 = vmul.f32 -1.442695, %v4685_v45  ;;  %v5190_v45 = vld [vmem:[#allocation10 + $0x20] sm:$0xff] }
 0x5c7   :  { %v11314_v12 = vpop.eup %11313 }
 0x5c8   :  { %v4425_v50 = vmul.f32 %v11314_v12, %v4422_v58  ;;  %11317 = vpow2.f32 %v8997_v2  ;;  %v5191_v58 = vld [vmem:[#allocation10 + $0x28] sm:$0xff]  ;;  %v5599_v2 = vld [vmem:[#allocation8] sm:$0xff] }
 0x5c9   :  { %v4836_v49 = vpop.f32.mrb[50].mxu1  ;;  %v5600_v12 = vld [vmem:[#allocation8 + $0x8] sm:$0xff] }
 0x5ca   :  { %v4426_v17 = vadd.f32 %v4425_v50, %v4341_v16  ;;  %v4837_v30 = vadd.f32 %v4836_v49, %v4766_v19  ;;  %v10165_v32 = vpop.f32.mrb[51].mxu1 }
 0x5cb   :  { %v12546_v32 = vpack.c.bf16 %v5600_v12, %v5599_v2  ;;  %v5945_v12 = vld [vmem:[#allocation7 + $0x50] sm:$0xff] }
 0x5cc   :  { %11319 = vtanh.f32 %v4426_v17  ;;  %v4847_v18 = vadd.f32 %v12347_v13, %v4837_v30  ;;  %v5196_v13 = vld [vmem:[#allocation11 + $0x30] sm:$0xff]  ;;  %v5588_v17 = vld [vmem:[#allocation2 + $0xd] sm:$0x1]  ;;  %v12544_v30 = vpack.c.bf16 %v5191_v58, %v5190_v45  ;;  %v5594_v45 = vld [vmem:[#allocation2 + $0x3d] sm:$0x1] }
 0x5cd   :  { %v12509_v56 = vpack.c.bf16 %v5197_v52, %v5196_v13  ;;  %v5590_v13 = vld [vmem:[#allocation2 + $0x1d] sm:$0x1] }
 0x5ce   :  { %v9002_v14 = vmul.f32 -1.442695, %v4847_v18  ;;  %v5192_v18 = vld [vmem:[#allocation10 + $0x30] sm:$0xff] }
 0x5cf   :  { %v11316_v33 = vpop.eup %11315 }
 0x5d0   :  { %11321 = vpow2.f32 %v9002_v14  ;;  %v4428_v37 = vsub.f32 1.0, %v11316_v33  ;;  %v4430_v60 = vmul.f32 %v11316_v33, %v12351_v7  ;;  %v12506_v7 = vld [vmem:[%s13099_s4 + $0x2] ss:$0 sm:$0xff]  ;;  %v5193_v33 = vld [vmem:[#allocation10 + $0x38] sm:$0xff] }
 0x5d1   :  { %v5012_v44 = vpop.f32.mrb[52].mxu1  ;;  %v4932_v6 = vadd.f32 %v12506_v7, %v4931_v31 }
 0x5d2   :  { %v11318_v9 = vpop.eup %11317  ;;  %v10187_v57 = vpop.f32.mrb[53].mxu1  ;;  %v5013_v47 = vadd.f32 %v12356_v15, %v5012_v44  ;;  %v5601_v44 = vld [vmem:[#allocation8 + $0x10] sm:$0xff] }
 0x5d3   :  { %v4689_v29 = vadd.f32 1.0, %v11318_v9  ;;  %v5602_v9 = vld [vmem:[#allocation8 + $0x18] sm:$0xff]  ;;  %v5589_v57 = vld [vmem:[#allocation2 + $0x15] sm:$0x1] }
 0x5d4   :  { %v12558_v55 = vpack.c.bf16 %v5602_v9, %v5601_v44  ;;  %v5683_v52 = vrot.slane %v5589_v57, 6 }
 0x5d5   :  { %11323 = vrcp.f32 %v4689_v29  ;;  %v5681_v29 = vrot.slane %v5588_v17, 7 }
 0x5d6   :  { %v11320_v11 = vpop.eup %11319 }
 0x5d7   :  { %v4429_v23 = vmul.f32 %v11320_v11, %v4428_v37  ;;  %v12556_v37 = vpack.c.bf16 %v5193_v33, %v5192_v18  ;;  %v5434_v11 = vld [vmem:[#allocation11 + $0x48] sm:$0xff]  ;;  %v5781_v18 = vld [vmem:[#allocation7 + $0x20] sm:$0xff] }
 0x5d8   :  { %v5782_v33 = vld [vmem:[#allocation7 + $0x28] sm:$0xff] }
 0x5d9   :  { %v12495_v8 = vadd.f32 %v4430_v60, %v4429_v23  ;;  %v5785_v60 = vld [vmem:[#allocation8 + $0x20] sm:$0xff]  ;;  %v5786_v23 = vld [vmem:[#allocation8 + $0x28] sm:$0xff]  ;;  %v12622_v57 = vpack.c.bf16 %v5782_v33, %v5781_v18  ;;  %v12679_v33 = vld [vmem:[%s13099_s4] ss:$0 sm:$0xff] }
 0x5da   :  { %v11322_v22 = vpop.eup %11321 }
 0x5db   :  { %v4433_v42 = vcombine.high %v12495_v8, %v12495_v8  ;;  %v4440_v36 = vrot.slane %v12495_v8, %v12004_v3  ;;  %10197 = vmatmul.mubr.msk.f32.vlgmr.msra.gmra.mrb[54].mxu0 %vm131_vm1, %v12495_v8  ;;  %v4851_v25 = vadd.f32 1.0, %v11322_v22 }
 0x5dc   :  { %10988 = vmatpush3.bf16.msra.mxu0 %v12493_v53  ;;  %10218 = vmatprep.mubr.msk.f32.mxu0 %vm11572_vm0, %v11573_v1 }
 0x5dd   :  { %v4447_v20 = vrot.slane %v4433_v42, %v12004_v3  ;;  %v4448_v38 = vcombine.high %v4440_v36, %v4440_v36  ;;  %v4456_v39 = vrot.slane %v4440_v36, %v12004_v3  ;;  %10989 = vmatprep.subr.bf16.mxu0 %v11571_v0  ;;  %11325 = vrcp.f32 %v4851_v25  ;;  %v5435_v25 = vld [vmem:[#allocation11 + $0x50] sm:$0xff] }
 0x5de   :  { %v12569_v42 = vpack.c.bf16 %v5434_v11, %v5433_v34  ;;  %v12571_v36 = vpack.c.bf16 %v5786_v23, %v5785_v60  ;;  %v6024_v11 = vld [vmem:[#allocation8 + $0x40] sm:$0xff]  ;;  %v6025_v60 = vld [vmem:[#allocation8 + $0x48] sm:$0xff] }
 0x5df   :  { %v11324_v41 = vpop.eup %11323  ;;  %v4449_v35 = vcombine.high %v4447_v20, %v4447_v20  ;;  %v4463_v48 = vrot.slane %v4447_v20, %v12004_v3  ;;  %v4470_v21 = vrot.slane %v4448_v38, %v12004_v3  ;;  %v4478_v19 = vcombine.high %v4456_v39, %v4456_v39  ;;  %4490 = vst.msk [vmem:[#allocation13 + $0x3] sm:$0x1] %vm1222_vm9, %v4456_v39  ;;  %v5591_v20 = vld [vmem:[#allocation2 + $0x25] sm:$0x1]  ;;  %v5436_v39 = vld [vmem:[#allocation11 + $0x58] sm:$0xff] }
 0x5e0   :  { %v5016_v27 = vmul.f32 %v11324_v41, %v5013_v47  ;;  %10991 = vmatpush3.bf16.msra.mxu0 %v12509_v56  ;;  %v5685_v38 = vrot.slane %v5590_v13, 5  ;;  %v5687_v41 = vrot.slane %v5591_v20, 4  ;;  %v12640_v23 = vpack.c.bf16 %v6025_v60, %v6024_v11  ;;  %v6026_v13 = vld [vmem:[#allocation8 + $0x50] sm:$0xff] }
 0x5e1   :  { %v4477_v51 = vrot.slane %v4449_v35, %v12004_v3  ;;  %v4479_v15 = vcombine.high %v4463_v48, %v4463_v48  ;;  %v4480_v10 = vcombine.high %v4470_v21, %v4470_v21  ;;  %4491 = vst.msk [vmem:[#allocation13 + $0xb] sm:$0x1] %vm1222_vm9, %v4470_v21  ;;  %4492 = vst.msk [vmem:[#allocation13 + $0x13] sm:$0x1] %vm1222_vm9, %v4478_v19  ;;  %10998 = vmatprep.subr.bf16.mxu0 %v11571_v0  ;;  %v5595_v19 = vld [vmem:[#allocation7] sm:$0xff] }
 0x5e2   :  { %4494 = vst.msk [vmem:[#allocation13 + $0x23] sm:$0x1] %vm1222_vm9, %v4463_v48  ;;  %v5017_v43 = vadd.f32 %v5016_v27, %v4932_v6  ;;  %v5592_v6 = vld [vmem:[#allocation2 + $0x2d] sm:$0x1]  ;;  %v12582_v35 = vpack.c.bf16 %v5436_v39, %v5435_v25  ;;  %v12584_v48 = vpack.c.bf16 %v5788_v46, %v5787_v62  ;;  %v5596_v27 = vld [vmem:[#allocation7 + $0x8] sm:$0xff] }
 0x5e3   :  { %v4481_v26 = vcombine.high %v4477_v51, %v4477_v51  ;;  %4493 = vst.msk [vmem:[#allocation13 + $0x1b] sm:$0x1] %vm1222_vm9, %v4480_v10  ;;  %4495 = vst.msk [vmem:[#allocation13 + $0x2b] sm:$0x1] %vm1222_vm9, %v4477_v51  ;;  %10219 = vmatmul.mubr.msk.f32.vlgmr.msra.gmra.mrb[56].mxu0 %vm131_vm1, %v12495_v8  ;;  %v5593_v51 = vld [vmem:[#allocation2 + $0x35] sm:$0x1] }
 0x5e4   :  { %4496 = vst.msk [vmem:[#allocation13 + $0x33] sm:$0x1] %vm1222_vm9, %v4479_v15  ;;  %11327 = vtanh.f32 %v5017_v43  ;;  %11000 = vmatpush3.bf16.msra.mxu0 %v12522_v24  ;;  %10240 = vmatprep.mubr.msk.f32.mxu0 %vm11572_vm0, %v11573_v1  ;;  %v5689_v15 = vrot.slane %v5592_v6, 3  ;;  %v5943_v10 = vld [vmem:[#allocation7 + $0x40] sm:$0xff]  ;;  %v12596_v43 = vpack.c.bf16 %v5596_v27, %v5595_v19  ;;  %v6119_v25 = vld [vmem:[#allocation11 + $0x18] sm:$0xff] }
 0x5e5   :  { %4497 = vst.msk [vmem:[#allocation13 + $0x3b] sm:$0x1] %vm1222_vm9, %v4481_v26  ;;  %11001 = vmatprep.subr.bf16.mxu0 %v11571_v0  ;;  %v5597_v26 = vld [vmem:[#allocation7 + $0x10] sm:$0xff]  ;;  %v12600_v58 = vpack.c.bf16 %v5944_v59, %v5943_v10 }
 0x5e6   :  { %v12684_v60 = vld [vmem:[%s13102_s7 + $0x3] ss:$0 sm:$0xff] }
 0x5e7   :  { %v11326_v31 = vpop.eup %11325 }
 0x5e8   :  { %11003 = vmatpush3.bf16.msra.mxu0 %v12535_v5  ;;  %v5019_v61 = vsub.f32 1.0, %v11326_v31  ;;  %v5021_v50 = vmul.f32 %v11326_v31, %v12394_v54  ;;  %v5587_v54 = vld [vmem:[#allocation2 + $0x5] sm:$0x1]  ;;  %v5598_v31 = vld [vmem:[#allocation7 + $0x18] sm:$0xff] }
 0x5e9   :  { %11010 = vmatprep.subr.bf16.mxu0 %v11571_v0  ;;  %v5682_v22 = vsel %vm214_vm2, %v5681_v29, %v5587_v54  ;;  %v5783_v29 = vld [vmem:[#allocation7 + $0x30] sm:$0xff]  ;;  %v5784_v54 = vld [vmem:[#allocation7 + $0x38] sm:$0xff] }
 0x5ea   :  { %v5684_v47 = vsel %vm217_vm3, %v5683_v52, %v5682_v22  ;;  %v12629_v34 = vpack.c.bf16 %v5784_v54, %v5783_v29  ;;  %v6027_v52 = vld [vmem:[#allocation8 + $0x58] sm:$0xff] }
 0x5eb   :  { %v5686_v21 = vsel %vm220_vm4, %v5685_v38, %v5684_v47  ;;  %v12645_v22 = vpack.c.bf16 %v6027_v52, %v6026_v13  ;;  %v12667_v47 = vld [vmem:[%s13102_s7] ss:$0 sm:$0xff] }
 0x5ec   :  { %v5688_v40 = vsel %vm223_vm5, %v5687_v41, %v5686_v21 }
 0x5ed   :  { %v5690_v2 = vsel %vm226_vm6, %v5689_v15, %v5688_v40  ;;  %v12673_v15 = vld [vmem:[%s13102_s7 + $0x1] ss:$0 sm:$0xff] }
 0x5ee   :  { %v11328_v16 = vpop.eup %11327 }
 0x5ef   :  { %v5020_v49 = vmul.f32 %v11328_v16, %v5019_v61  ;;  %v5691_v61 = vrot.slane %v5593_v51, 2  ;;  %v5946_v16 = vld [vmem:[#allocation7 + $0x58] sm:$0xff] }
 0x5f0   :  { %v12615_v44 = vpack.c.bf16 %v5946_v16, %v5945_v12 }
 0x5f1   :  { %v12548_v14 = vadd.f32 %v5021_v50, %v5020_v49  ;;  %v12608_v50 = vpack.c.bf16 %v5598_v31, %v5597_v26  ;;  %v5693_v49 = vrot.slane %v5594_v45, 1  ;;  %v5692_v17 = vsel %vm229_vm7, %v5691_v61, %v5690_v2 }
 0x5f3   :  { %10208 = vmatmul.mubr.msk.f32.vlgmr.msra.gmra.mrb[54].mxu1 %vm131_vm1, %v12548_v14  ;;  %10241 = vmatmul.mubr.msk.f32.vlgmr.msra.gmra.mrb[58].mxu0 %vm131_vm1, %v12548_v14  ;;  %v5694_v9 = vsel %vm232_vm8, %v5693_v49, %v5692_v17 }
 0x5f4   :  { %10994 = vmatpush3.bf16.msra.mxu1 %v12544_v30  ;;  %11012 = vmatpush3.bf16.msra.mxu0 %v12546_v32 }
 0x5f5   :  { %10995 = vmatprep.subr.bf16.mxu1 %v11571_v0  ;;  %11013 = vmatprep.subr.bf16.mxu0 %v11571_v0 }
 0x5f6   :  { %10229 = vmatprep.mubr.msk.f32.mxu1 %vm11572_vm0, %v11573_v1  ;;  %10262 = vmatprep.mubr.msk.f32.mxu0 %vm11572_vm0, %v11573_v1 }
 0x5f8   :  { %10997 = vmatpush3.bf16.msra.mxu1 %v12556_v37  ;;  %11015 = vmatpush3.bf16.msra.mxu0 %v12558_v55 }
 0x5f9   :  { %11004 = vmatprep.subr.bf16.mxu1 %v11571_v0  ;;  %11022 = vmatprep.subr.bf16.mxu0 %v11571_v0 }
 0x5fb   :  { %10230 = vmatmul.mubr.msk.f32.vlgmr.msra.gmra.mrb[56].mxu1 %vm131_vm1, %v12548_v14  ;;  %10263 = vmatmul.mubr.msk.f32.vlgmr.msra.gmra.mrb[60].mxu0 %vm131_vm1, %v12548_v14 }
 0x5fc   :  { %11006 = vmatpush3.bf16.msra.mxu1 %v12569_v42  ;;  %11024 = vmatpush3.bf16.msra.mxu0 %v12571_v36 }
 0x5fd   :  { %11007 = vmatprep.subr.bf16.mxu1 %v11571_v0  ;;  %11025 = vmatprep.subr.bf16.mxu0 %v11571_v0 }
 0x5fe   :  { %10251 = vmatprep.mubr.msk.f32.mxu1 %vm11572_vm0, %v11573_v1  ;;  %10284 = vmatprep.mubr.msk.f32.mxu0 %vm11572_vm0, %v11573_v1 }
 0x600   :  { %11009 = vmatpush3.bf16.msra.mxu1 %v12582_v35  ;;  %11027 = vmatpush3.bf16.msra.mxu0 %v12584_v48 }
 0x601   :  { %11016 = vmatprep.subr.bf16.mxu1 %v11571_v0  ;;  %11034 = vmatprep.subr.bf16.mxu0 %v11571_v0 }
 0x603   :  { %10252 = vmatmul.mubr.msk.f32.vlgmr.msra.gmra.mrb[58].mxu1 %vm131_vm1, %v12495_v8  ;;  %10285 = vmatmul.mubr.msk.f32.vlgmr.msra.gmra.mrb[62].mxu0 %vm131_vm1, %v12548_v14 }
 0x604   :  { %11018 = vmatpush3.bf16.msra.mxu1 %v12596_v43  ;;  %10273 = vmatprep.mubr.msk.f32.mxu1 %vm11572_vm0, %v11573_v1 }
 0x605   :  { %11019 = vmatprep.subr.bf16.mxu1 %v11571_v0  ;;  %11036 = vmatpush3.bf16.msra.mxu0 %v12600_v58 }
 0x606   :  { %11037 = vmatprep.subr.bf16.mxu0 %v11571_v0  ;;  %10306 = vmatprep.mubr.msk.f32.mxu0 %vm11572_vm0, %v11573_v1 }
 0x608   :  { %11021 = vmatpush3.bf16.msra.mxu1 %v12608_v50 }
 0x609   :  { %11028 = vmatprep.subr.bf16.mxu1 %v11571_v0  ;;  %11039 = vmatpush3.bf16.msra.mxu0 %v12615_v44 }
 0x60a   :  { %11046 = vmatprep.subr.bf16.mxu0 %v11571_v0 }
 0x60b   :  { %10274 = vmatmul.mubr.msk.f32.vlgmr.msra.gmra.mrb[60].mxu1 %vm131_vm1, %v5694_v9 }
 0x60c   :  { %11030 = vmatpush3.bf16.msra.mxu1 %v12622_v57  ;;  %10295 = vmatprep.mubr.msk.f32.mxu1 %vm11572_vm0, %v11573_v1 }
 0x60d   :  { %11031 = vmatprep.subr.bf16.mxu1 %v11571_v0  ;;  %10307 = vmatmul.mubr.msk.f32.vlgmr.msra.gmra.mrb[64].mxu0 %vm131_vm1, %v5694_v9 }
 0x60e   :  { %11048 = vmatpush3.bf16.msra.mxu0 %v12472_v28  ;;  %10328 = vmatprep.mubr.msk.f32.mxu0 %vm11572_vm0, %v11573_v1  ;;  %v6118_v28 = vld [vmem:[#allocation11 + $0x10] sm:$0xff] }
 0x60f   :  { %11049 = vmatprep.subr.bf16.mxu0 %v11571_v0  ;;  %v12660_v20 = vpack.c.bf16 %v6119_v25, %v6118_v28  ;;  %v12690_v25 = vld [vmem:[%s13102_s7 + $0x2] ss:$0 sm:$0xff] }
 0x610   :  { %11033 = vmatpush3.bf16.msra.mxu1 %v12629_v34 }
 0x611   :  { %11040 = vmatprep.subr.bf16.mxu1 %v11571_v0 }
 0x612   :  { %11051 = vmatpush3.bf16.msra.mxu0 %v12660_v20 }
 0x613   :  { %10296 = vmatmul.mubr.msk.f32.vlgmr.msra.gmra.mrb[62].mxu1 %vm131_vm1, %v5694_v9  ;;  %11058 = vmatprep.subr.bf16.mxu0 %v11571_v0 }
 0x614   :  { %11042 = vmatpush3.bf16.msra.mxu1 %v12640_v23  ;;  %10317 = vmatprep.mubr.msk.f32.mxu1 %vm11572_vm0, %v11573_v1 }
 0x615   :  { %11043 = vmatprep.subr.bf16.mxu1 %v11571_v0 }
 0x618   :  { %11045 = vmatpush3.bf16.msra.mxu1 %v12645_v22 }
 0x619   :  { %11052 = vmatprep.subr.bf16.mxu1 %v11571_v0 }
 0x61b   :  { %10318 = vmatmul.mubr.msk.f32.vlgmr.msra.gmra.mrb[64].mxu1 %vm131_vm1, %v12548_v14 }
 0x61c   :  { %11054 = vmatpush3.bf16.msra.mxu1 %v12478_v63  ;;  %10339 = vmatprep.mubr.msk.f32.mxu1 %vm11572_vm0, %v11573_v1 }
 0x61d   :  { %11055 = vmatprep.subr.bf16.mxu1 %v11571_v0 }
 0x620   :  { %11057 = vmatpush3.bf16.msra.mxu1 %v12482_v4 }
 0x621   :  { %11064 = vmatprep.subr.bf16.mxu1 %v11571_v0 }
 0x6ae   :  { %v5099_v38 = vpop.f32.mrb[54].mxu0 }
 0x6af   :  { %v10198_v39 = vpop.f32.mrb[55].mxu0 }
 0x6b6   :  { %v5264_v63 = vpop.f32.mrb[56].mxu0 }
 0x6b7   :  { %v10220_v62 = vpop.f32.mrb[57].mxu0 }
 0x6c6   :  { %v5172_v46 = vpop.f32.mrb[54].mxu1  ;;  %v5429_v4 = vpop.f32.mrb[58].mxu0 }
 0x6c7   :  { %v5173_v6 = vadd.f32 %v5172_v46, %v5099_v38  ;;  %v10209_v41 = vpop.f32.mrb[55].mxu1  ;;  %v10242_v21 = vpop.f32.mrb[59].mxu0  ;;  %v5430_v62 = vadd.f32 %v12690_v25, %v5429_v4 }
 0x6c8   :  { %v12697_v41 = vld [vmem:[%s13099_s4 + $0x1] ss:$0 sm:$0xff] }
 0x6c9   :  { %v5183_v19 = vadd.f32 %v12667_v47, %v5173_v6 }
 0x6cb   :  { %v9012_v27 = vmul.f32 -1.442695, %v5183_v19 }
 0x6cd   :  { %11329 = vpow2.f32 %v9012_v27 }
 0x6ce   :  { %v5334_v51 = vpop.f32.mrb[56].mxu1  ;;  %v5669_v10 = vpop.f32.mrb[60].mxu0 }
 0x6cf   :  { %v5335_v59 = vadd.f32 %v5334_v51, %v5264_v63  ;;  %v10231_v40 = vpop.f32.mrb[57].mxu1  ;;  %v10264_v26 = vpop.f32.mrb[61].mxu0 }
 0x6d1   :  { %v5345_v31 = vadd.f32 %v12673_v15, %v5335_v59 }
 0x6d3   :  { %v9017_v45 = vmul.f32 -1.442695, %v5345_v31 }
 0x6d5   :  { %11331 = vpow2.f32 %v9017_v45 }
 0x6d6   :  { %v5510_v61 = vpop.f32.mrb[58].mxu1  ;;  %v5855_v2 = vpop.f32.mrb[62].mxu0 }
 0x6d7   :  { %v11330_v12 = vpop.eup %11329  ;;  %v10253_v16 = vpop.f32.mrb[59].mxu1  ;;  %v5511_v38 = vadd.f32 %v12684_v60, %v5510_v61 }
 0x6d8   :  { %v10286_v49 = vpop.f32.mrb[63].mxu0  ;;  %v5187_v17 = vadd.f32 1.0, %v11330_v12 }
 0x6da   :  { %11333 = vrcp.f32 %v5187_v17  ;;  %v12706_v17 = vld [vmem:[%s13099_s4 + $0x3] ss:$0 sm:$0xff] }
 0x6de   :  { %v5763_v18 = vpop.f32.mrb[60].mxu1 }
 0x6df   :  { %v11332_v9 = vpop.eup %11331  ;;  %v5764_v29 = vadd.f32 %v5763_v18, %v5669_v10  ;;  %v10275_v54 = vpop.f32.mrb[61].mxu1 }
 0x6e0   :  { %v5349_v11 = vadd.f32 1.0, %v11332_v9  ;;  %v6020_v13 = vpop.f32.mrb[64].mxu0 }
 0x6e1   :  { %v5774_v52 = vadd.f32 %v12679_v33, %v5764_v29  ;;  %v10308_v28 = vpop.f32.mrb[65].mxu0 }
 0x6e2   :  { %11335 = vrcp.f32 %v5349_v11  ;;  %v6021_v28 = vadd.f32 %v12506_v7, %v6020_v13 }
 0x6e3   :  { %v9027_v39 = vmul.f32 -1.442695, %v5774_v52 }
 0x6e4   :  { %v11334_v63 = vpop.eup %11333 }
 0x6e5   :  { %v5514_v46 = vmul.f32 %v11334_v63, %v5511_v38  ;;  %11337 = vpow2.f32 %v9027_v39 }
 0x6e6   :  { %v5925_v6 = vpop.f32.mrb[62].mxu1 }
 0x6e7   :  { %v5515_v21 = vadd.f32 %v5514_v46, %v5430_v62  ;;  %v5926_v19 = vadd.f32 %v5925_v6, %v5855_v2  ;;  %v10297_v27 = vpop.f32.mrb[63].mxu1 }
 0x6e9   :  { %11339 = vtanh.f32 %v5515_v21  ;;  %v5936_v51 = vadd.f32 %v12697_v41, %v5926_v19 }
 0x6eb   :  { %v9032_v10 = vmul.f32 -1.442695, %v5936_v51 }
 0x6ec   :  { %v11336_v59 = vpop.eup %11335 }
 0x6ed   :  { %11341 = vpow2.f32 %v9032_v10  ;;  %v5517_v45 = vsub.f32 1.0, %v11336_v59  ;;  %v5519_v12 = vmul.f32 %v11336_v59, %v12495_v8 }
 0x6ee   :  { %v6101_v40 = vpop.f32.mrb[64].mxu1 }
 0x6ef   :  { %v11338_v26 = vpop.eup %11337  ;;  %v10319_v4 = vpop.f32.mrb[65].mxu1  ;;  %v6102_v52 = vadd.f32 %v12706_v17, %v6101_v40  ;;  %v6677_v40 = vld [vmem:[#allocation2 + $0xe] sm:$0x1] }
 0x6f0   :  { %v5778_v31 = vadd.f32 1.0, %v11338_v26  ;;  %v6770_v4 = vrot.slane %v6677_v40, 7 }
 0x6f2   :  { %11343 = vrcp.f32 %v5778_v31 }
 0x6f3   :  { %v11340_v61 = vpop.eup %11339 }
 0x6f4   :  { %v5518_v16 = vmul.f32 %v11340_v61, %v5517_v45 }
 0x6f6   :  { %v12701_v49 = vadd.f32 %v5519_v12, %v5518_v16  ;;  %v6681_v12 = vld [vmem:[#allocation2 + $0x2e] sm:$0x1] }
 0x6f7   :  { %v11342_v2 = vpop.eup %11341 }
 0x6f8   :  { %v5522_v18 = vcombine.high %v12701_v49, %v12701_v49  ;;  %v5529_v9 = vrot.slane %v12701_v49, %v12004_v3  ;;  %10329 = vmatmul.mubr.msk.f32.vlgmr.msra.gmra.mrb[66].mxu0 %vm131_vm1, %v12701_v49  ;;  %v5940_v29 = vadd.f32 1.0, %v11342_v2  ;;  %v6778_v2 = vrot.slane %v6681_v12, 3 }
 0x6f9   :  { %11060 = vmatpush3.bf16.msra.mxu0 %v12493_v53  ;;  %10350 = vmatprep.mubr.msk.f32.mxu0 %vm11572_vm0, %v11573_v1 }
 0x6fa   :  { %v5536_v8 = vrot.slane %v5522_v18, %v12004_v3  ;;  %v5537_v54 = vcombine.high %v5529_v9, %v5529_v9  ;;  %v5545_v11 = vrot.slane %v5529_v9, %v12004_v3  ;;  %11061 = vmatprep.subr.bf16.mxu0 %v11571_v0  ;;  %11345 = vrcp.f32 %v5940_v29 }
 0x6fc   :  { %v11344_v38 = vpop.eup %11343  ;;  %v5538_v39 = vcombine.high %v5536_v8, %v5536_v8  ;;  %v5552_v63 = vrot.slane %v5536_v8, %v12004_v3  ;;  %v5559_v53 = vrot.slane %v5537_v54, %v12004_v3  ;;  %v5567_v62 = vcombine.high %v5545_v11, %v5545_v11  ;;  %5579 = vst.msk [vmem:[#allocation13 + $0x4] sm:$0x1] %vm1222_vm9, %v5545_v11 }
 0x6fd   :  { %v6105_v46 = vmul.f32 %v11344_v38, %v6102_v52  ;;  %11063 = vmatpush3.bf16.msra.mxu0 %v12509_v56 }
 0x6fe   :  { %v5566_v6 = vrot.slane %v5538_v39, %v12004_v3  ;;  %v5568_v21 = vcombine.high %v5552_v63, %v5552_v63  ;;  %v5569_v19 = vcombine.high %v5559_v53, %v5559_v53  ;;  %5580 = vst.msk [vmem:[#allocation13 + $0xc] sm:$0x1] %vm1222_vm9, %v5559_v53  ;;  %5581 = vst.msk [vmem:[#allocation13 + $0x14] sm:$0x1] %vm1222_vm9, %v5567_v62  ;;  %11070 = vmatprep.subr.bf16.mxu0 %v11571_v0 }
 0x6ff   :  { %5583 = vst.msk [vmem:[#allocation13 + $0x24] sm:$0x1] %vm1222_vm9, %v5552_v63  ;;  %v6106_v7 = vadd.f32 %v6105_v46, %v6021_v28 }
 0x700   :  { %v5570_v13 = vcombine.high %v5566_v6, %v5566_v6  ;;  %5582 = vst.msk [vmem:[#allocation13 + $0x1c] sm:$0x1] %vm1222_vm9, %v5569_v19  ;;  %5584 = vst.msk [vmem:[#allocation13 + $0x2c] sm:$0x1] %vm1222_vm9, %v5566_v6  ;;  %10351 = vmatmul.mubr.msk.f32.vlgmr.msra.gmra.mrb[68].mxu0 %vm131_vm1, %v12701_v49 }
 0x701   :  { %5585 = vst.msk [vmem:[#allocation13 + $0x34] sm:$0x1] %vm1222_vm9, %v5568_v21  ;;  %11347 = vtanh.f32 %v6106_v7  ;;  %11072 = vmatpush3.bf16.msra.mxu0 %v12522_v24  ;;  %10372 = vmatprep.mubr.msk.f32.mxu0 %vm11572_vm0, %v11573_v1  ;;  %v6678_v24 = vld [vmem:[#allocation2 + $0x16] sm:$0x1] }
 0x702   :  { %5586 = vst.msk [vmem:[#allocation13 + $0x3c] sm:$0x1] %vm1222_vm9, %v5570_v13  ;;  %11073 = vmatprep.subr.bf16.mxu0 %v11571_v0  ;;  %v6772_v31 = vrot.slane %v6678_v24, 6 }
 0x704   :  { %v11346_v56 = vpop.eup %11345 }
 0x705   :  { %11075 = vmatpush3.bf16.msra.mxu0 %v12535_v5  ;;  %v6108_v27 = vsub.f32 1.0, %v11346_v56  ;;  %v6110_v10 = vmul.f32 %v11346_v56, %v12548_v14  ;;  %v6676_v5 = vld [vmem:[#allocation2 + $0x6] sm:$0x1]  ;;  %v6679_v14 = vld [vmem:[#allocation2 + $0x1e] sm:$0x1] }
 0x706   :  { %11082 = vmatprep.subr.bf16.mxu0 %v11571_v0  ;;  %v6771_v45 = vsel %vm214_vm2, %v6770_v4, %v6676_v5 }
 0x707   :  { %v6773_v61 = vsel %vm217_vm3, %v6772_v31, %v6771_v45 }
 0x70b   :  { %v11348_v51 = vpop.eup %11347 }
 0x70c   :  { %v6109_v59 = vmul.f32 %v11348_v51, %v6108_v27 }
 0x70e   :  { %v12744_v26 = vadd.f32 %v6110_v10, %v6109_v59 }
 0x710   :  { %10340 = vmatmul.mubr.msk.f32.vlgmr.msra.gmra.mrb[66].mxu1 %vm131_vm1, %v12744_v26  ;;  %10373 = vmatmul.mubr.msk.f32.vlgmr.msra.gmra.mrb[70].mxu0 %vm131_vm1, %v12744_v26 }
 0x711   :  { %11066 = vmatpush3.bf16.msra.mxu1 %v12544_v30  ;;  %11084 = vmatpush3.bf16.msra.mxu0 %v12546_v32  ;;  %v6680_v30 = vld [vmem:[#allocation2 + $0x26] sm:$0x1]  ;;  %v6774_v32 = vrot.slane %v6679_v14, 5 }
 0x712   :  { %11067 = vmatprep.subr.bf16.mxu1 %v11571_v0  ;;  %11085 = vmatprep.subr.bf16.mxu0 %v11571_v0  ;;  %v6776_v16 = vrot.slane %v6680_v30, 4 }
 0x713   :  { %10361 = vmatprep.mubr.msk.f32.mxu1 %vm11572_vm0, %v11573_v1  ;;  %10394 = vmatprep.mubr.msk.f32.mxu0 %vm11572_vm0, %v11573_v1 }
 0x715   :  { %11069 = vmatpush3.bf16.msra.mxu1 %v12556_v37  ;;  %11087 = vmatpush3.bf16.msra.mxu0 %v12558_v55  ;;  %v6775_v37 = vsel %vm220_vm4, %v6774_v32, %v6773_v61  ;;  %v6682_v55 = vld [vmem:[#allocation2 + $0x36] sm:$0x1] }
 0x716   :  { %11076 = vmatprep.subr.bf16.mxu1 %v11571_v0  ;;  %11094 = vmatprep.subr.bf16.mxu0 %v11571_v0  ;;  %v6777_v18 = vsel %vm223_vm5, %v6776_v16, %v6775_v37 }
 0x717   :  { %v6779_v9 = vsel %vm226_vm6, %v6778_v2, %v6777_v18 }
 0x718   :  { %10362 = vmatmul.mubr.msk.f32.vlgmr.msra.gmra.mrb[68].mxu1 %vm131_vm1, %v12744_v26  ;;  %10395 = vmatmul.mubr.msk.f32.vlgmr.msra.gmra.mrb[72].mxu0 %vm131_vm1, %v12744_v26 }
 0x719   :  { %11078 = vmatpush3.bf16.msra.mxu1 %v12569_v42  ;;  %11096 = vmatpush3.bf16.msra.mxu0 %v12571_v36  ;;  %v6683_v42 = vld [vmem:[#allocation2 + $0x3e] sm:$0x1]  ;;  %v6780_v36 = vrot.slane %v6682_v55, 2 }
 0x71a   :  { %11079 = vmatprep.subr.bf16.mxu1 %v11571_v0  ;;  %11097 = vmatprep.subr.bf16.mxu0 %v11571_v0 }
 0x71b   :  { %10383 = vmatprep.mubr.msk.f32.mxu1 %vm11572_vm0, %v11573_v1  ;;  %10416 = vmatprep.mubr.msk.f32.mxu0 %vm11572_vm0, %v11573_v1 }
 0x71d   :  { %11081 = vmatpush3.bf16.msra.mxu1 %v12582_v35  ;;  %11099 = vmatpush3.bf16.msra.mxu0 %v12584_v48  ;;  %v6782_v35 = vrot.slane %v6683_v42, 1  ;;  %v6781_v48 = vsel %vm229_vm7, %v6780_v36, %v6779_v9 }
 0x71e   :  { %11088 = vmatprep.subr.bf16.mxu1 %v11571_v0  ;;  %11106 = vmatprep.subr.bf16.mxu0 %v11571_v0 }
 0x71f   :  { %v6783_v29 = vsel %vm232_vm8, %v6782_v35, %v6781_v48 }
 0x720   :  { %10384 = vmatmul.mubr.msk.f32.vlgmr.msra.gmra.mrb[70].mxu1 %vm131_vm1, %v12701_v49  ;;  %10417 = vmatmul.mubr.msk.f32.vlgmr.msra.gmra.mrb[74].mxu0 %vm131_vm1, %v12744_v26 }
 0x721   :  { %11090 = vmatpush3.bf16.msra.mxu1 %v12596_v43  ;;  %10405 = vmatprep.mubr.msk.f32.mxu1 %vm11572_vm0, %v11573_v1  ;;  %v7205_v43 = vld [vmem:[#allocation11] sm:$0xff] }
 0x722   :  { %11091 = vmatprep.subr.bf16.mxu1 %v11571_v0  ;;  %11108 = vmatpush3.bf16.msra.mxu0 %v12600_v58  ;;  %v7206_v58 = vld [vmem:[#allocation11 + $0x8] sm:$0xff] }
 0x723   :  { %11109 = vmatprep.subr.bf16.mxu0 %v11571_v0  ;;  %10438 = vmatprep.mubr.msk.f32.mxu0 %vm11572_vm0, %v11573_v1 }
 0x725   :  { %11093 = vmatpush3.bf16.msra.mxu1 %v12608_v50  ;;  %v12822_v50 = vpack.c.bf16 %v7206_v58, %v7205_v43 }
 0x726   :  { %11100 = vmatprep.subr.bf16.mxu1 %v11571_v0  ;;  %11111 = vmatpush3.bf16.msra.mxu0 %v12615_v44  ;;  %v7201_v44 = vld [vmem:[#allocation10] sm:$0xff] }
 0x727   :  { %11118 = vmatprep.subr.bf16.mxu0 %v11571_v0 }
 0x728   :  { %10406 = vmatmul.mubr.msk.f32.vlgmr.msra.gmra.mrb[72].mxu1 %vm131_vm1, %v6783_v29 }
 0x729   :  { %11102 = vmatpush3.bf16.msra.mxu1 %v12622_v57  ;;  %10427 = vmatprep.mubr.msk.f32.mxu1 %vm11572_vm0, %v11573_v1  ;;  %v7202_v57 = vld [vmem:[#allocation10 + $0x8] sm:$0xff] }
 0x72a   :  { %11103 = vmatprep.subr.bf16.mxu1 %v11571_v0  ;;  %10439 = vmatmul.mubr.msk.f32.vlgmr.msra.gmra.mrb[76].mxu0 %vm131_vm1, %v6783_v29 }
 0x72b   :  { %10460 = vmatprep.mubr.msk.f32.mxu0 %vm11572_vm0, %v11573_v1  ;;  %11120 = vmatpush3.bf16.msra.mxu0 %v12822_v50 }
 0x72c   :  { %11121 = vmatprep.subr.bf16.mxu0 %v11571_v0 }
 0x72d   :  { %11105 = vmatpush3.bf16.msra.mxu1 %v12629_v34  ;;  %v12828_v34 = vpack.c.bf16 %v7202_v57, %v7201_v44  ;;  %v7372_v44 = vld [vmem:[#allocation11 + $0x20] sm:$0xff] }
 0x72e   :  { %11112 = vmatprep.subr.bf16.mxu1 %v11571_v0 }
 0x72f   :  { %11123 = vmatpush3.bf16.msra.mxu0 %v12660_v20 }
 0x730   :  { %10428 = vmatmul.mubr.msk.f32.vlgmr.msra.gmra.mrb[74].mxu1 %vm131_vm1, %v6783_v29  ;;  %11130 = vmatprep.subr.bf16.mxu0 %v11571_v0 }
 0x731   :  { %11114 = vmatpush3.bf16.msra.mxu1 %v12640_v23  ;;  %10449 = vmatprep.mubr.msk.f32.mxu1 %vm11572_vm0, %v11573_v1  ;;  %v7203_v23 = vld [vmem:[#allocation10 + $0x10] sm:$0xff] }
 0x732   :  { %11115 = vmatprep.subr.bf16.mxu1 %v11571_v0 }
 0x735   :  { %11117 = vmatpush3.bf16.msra.mxu1 %v12645_v22  ;;  %v7204_v22 = vld [vmem:[#allocation10 + $0x18] sm:$0xff] }
 0x736   :  { %11124 = vmatprep.subr.bf16.mxu1 %v11571_v0  ;;  %v12832_v8 = vpack.c.bf16 %v7204_v22, %v7203_v23 }
 0x738   :  { %10450 = vmatmul.mubr.msk.f32.vlgmr.msra.gmra.mrb[76].mxu1 %vm131_vm1, %v12744_v26 }
 0x739   :  { %10471 = vmatprep.mubr.msk.f32.mxu1 %vm11572_vm0, %v11573_v1  ;;  %11126 = vmatpush3.bf16.msra.mxu1 %v12828_v34 }
 0x73a   :  { %11127 = vmatprep.subr.bf16.mxu1 %v11571_v0 }
 0x73d   :  { %11129 = vmatpush3.bf16.msra.mxu1 %v12832_v8 }
 0x73e   :  { %11136 = vmatprep.subr.bf16.mxu1 %v11571_v0 }
 0x7cb   :  { %v6188_v54 = vpop.f32.mrb[66].mxu0 }
 0x7cc   :  { %v10330_v20 = vpop.f32.mrb[67].mxu0 }
 0x7d3   :  { %v6353_v11 = vpop.f32.mrb[68].mxu0 }
 0x7d4   :  { %v10352_v52 = vpop.f32.mrb[69].mxu0 }
 0x7e3   :  { %v6261_v28 = vpop.f32.mrb[66].mxu1  ;;  %v6518_v38 = vpop.f32.mrb[70].mxu0 }
 0x7e4   :  { %v6262_v39 = vadd.f32 %v6261_v28, %v6188_v54  ;;  %v10341_v63 = vpop.f32.mrb[67].mxu1  ;;  %v10374_v53 = vpop.f32.mrb[71].mxu0  ;;  %v6519_v37 = vadd.f32 %v12690_v25, %v6518_v38  ;;  %v7373_v25 = vld [vmem:[#allocation11 + $0x28] sm:$0xff] }
 0x7e5   :  { %v12843_v54 = vpack.c.bf16 %v7373_v25, %v7372_v44  ;;  %v7611_v25 = vld [vmem:[#allocation11 + $0x40] sm:$0xff] }
 0x7e6   :  { %v6272_v62 = vadd.f32 %v12667_v47, %v6262_v39 }
 0x7e8   :  { %v9042_v46 = vmul.f32 -1.442695, %v6272_v62 }
 0x7ea   :  { %11349 = vpow2.f32 %v9042_v46 }
 0x7eb   :  { %v6423_v6 = vpop.f32.mrb[68].mxu1  ;;  %v6758_v21 = vpop.f32.mrb[72].mxu0 }
 0x7ec   :  { %v6424_v19 = vadd.f32 %v6423_v6, %v6353_v11  ;;  %v10363_v7 = vpop.f32.mrb[69].mxu1  ;;  %v10396_v13 = vpop.f32.mrb[73].mxu0  ;;  %v7375_v11 = vld [vmem:[#allocation11 + $0x38] sm:$0xff]  ;;  %v7530_v6 = vld [vmem:[#allocation10 + $0x40] sm:$0xff] }
 0x7ee   :  { %v6434_v56 = vadd.f32 %v12673_v15, %v6424_v19 }
 0x7f0   :  { %v9047_v27 = vmul.f32 -1.442695, %v6434_v56 }
 0x7f2   :  { %11351 = vpow2.f32 %v9047_v27 }
 0x7f3   :  { %v6599_v51 = vpop.f32.mrb[70].mxu1  ;;  %v6944_v10 = vpop.f32.mrb[74].mxu0 }
 0x7f4   :  { %v11350_v59 = vpop.eup %11349  ;;  %v10385_v40 = vpop.f32.mrb[71].mxu1  ;;  %v6600_v15 = vadd.f32 %v12684_v60, %v6599_v51 }
 0x7f5   :  { %v10418_v24 = vpop.f32.mrb[75].mxu0  ;;  %v6276_v4 = vadd.f32 1.0, %v11350_v59 }
 0x7f7   :  { %11353 = vrcp.f32 %v6276_v4 }
 0x7fb   :  { %v6852_v5 = vpop.f32.mrb[72].mxu1 }
 0x7fc   :  { %v11352_v47 = vpop.eup %11351  ;;  %v6853_v14 = vadd.f32 %v6852_v5, %v6758_v21  ;;  %v10407_v31 = vpop.f32.mrb[73].mxu1  ;;  %v7531_v21 = vld [vmem:[#allocation10 + $0x48] sm:$0xff]  ;;  %v7532_v5 = vld [vmem:[#allocation10 + $0x50] sm:$0xff] }
 0x7fd   :  { %v6438_v45 = vadd.f32 1.0, %v11352_v47  ;;  %v7109_v30 = vpop.f32.mrb[76].mxu0  ;;  %v12872_v40 = vpack.c.bf16 %v7531_v21, %v7530_v6  ;;  %v7533_v47 = vld [vmem:[#allocation10 + $0x58] sm:$0xff]  ;;  %v7965_v6 = vld [vmem:[#allocation8 + $0x30] sm:$0xff] }
 0x7fe   :  { %v6863_v32 = vadd.f32 %v12679_v33, %v6853_v14  ;;  %v10440_v61 = vpop.f32.mrb[77].mxu0  ;;  %v7966_v21 = vld [vmem:[#allocation8 + $0x38] sm:$0xff] }
 0x7ff   :  { %11355 = vrcp.f32 %v6438_v45  ;;  %v12885_v45 = vpack.c.bf16 %v7533_v47, %v7532_v5  ;;  %v8122_v5 = vld [vmem:[#allocation7 + $0x48] sm:$0xff] }
 0x800   :  { %v9057_v12 = vmul.f32 -1.442695, %v6863_v32  ;;  %v7368_v32 = vld [vmem:[#allocation10 + $0x20] sm:$0xff] }
 0x801   :  { %v11354_v16 = vpop.eup %11353 }
 0x802   :  { %v6603_v55 = vmul.f32 %v11354_v16, %v6600_v15  ;;  %11357 = vpow2.f32 %v9057_v12  ;;  %v7369_v15 = vld [vmem:[#allocation10 + $0x28] sm:$0xff]  ;;  %v7777_v12 = vld [vmem:[#allocation8] sm:$0xff] }
 0x803   :  { %v7014_v2 = vpop.f32.mrb[74].mxu1  ;;  %v7778_v16 = vld [vmem:[#allocation8 + $0x8] sm:$0xff] }
 0x804   :  { %v6604_v18 = vadd.f32 %v6603_v55, %v6519_v37  ;;  %v7015_v42 = vadd.f32 %v7014_v2, %v6944_v10  ;;  %v10429_v36 = vpop.f32.mrb[75].mxu1 }
 0x805   :  { %v11155_v36 = vpack.c.bf16 %v7778_v16, %v7777_v12  ;;  %v8123_v16 = vld [vmem:[#allocation7 + $0x50] sm:$0xff] }
 0x806   :  { %11359 = vtanh.f32 %v6604_v18  ;;  %v7025_v9 = vadd.f32 %v12697_v41, %v7015_v42  ;;  %v7374_v41 = vld [vmem:[#allocation11 + $0x30] sm:$0xff]  ;;  %v7766_v18 = vld [vmem:[#allocation2 + $0xf] sm:$0x1]  ;;  %v12894_v42 = vpack.c.bf16 %v7369_v15, %v7368_v32  ;;  %v7772_v32 = vld [vmem:[#allocation2 + $0x3f] sm:$0x1] }
 0x807   :  { %v12859_v63 = vpack.c.bf16 %v7375_v11, %v7374_v41  ;;  %v7768_v41 = vld [vmem:[#allocation2 + $0x1f] sm:$0x1] }
 0x808   :  { %v9062_v35 = vmul.f32 -1.442695, %v7025_v9  ;;  %v7370_v9 = vld [vmem:[#allocation10 + $0x30] sm:$0xff] }
 0x809   :  { %v11356_v33 = vpop.eup %11355 }
 0x80a   :  { %11361 = vpow2.f32 %v9062_v35  ;;  %v6606_v58 = vsub.f32 1.0, %v11356_v33  ;;  %v6608_v23 = vmul.f32 %v11356_v33, %v12701_v49  ;;  %v12856_v49 = vld [vmem:[%s13099_s4 + $0x2] ss:$0 sm:$0xff]  ;;  %v7371_v33 = vld [vmem:[#allocation10 + $0x38] sm:$0xff] }
 0x80b   :  { %v7190_v48 = vpop.f32.mrb[76].mxu1  ;;  %v7110_v7 = vadd.f32 %v12856_v49, %v7109_v30 }
 0x80c   :  { %v11358_v29 = vpop.eup %11357  ;;  %v10451_v60 = vpop.f32.mrb[77].mxu1  ;;  %v7191_v19 = vadd.f32 %v12706_v17, %v7190_v48  ;;  %v7779_v48 = vld [vmem:[#allocation8 + $0x10] sm:$0xff] }
 0x80d   :  { %v6867_v43 = vadd.f32 1.0, %v11358_v29  ;;  %v7780_v29 = vld [vmem:[#allocation8 + $0x18] sm:$0xff]  ;;  %v7767_v60 = vld [vmem:[#allocation2 + $0x17] sm:$0x1] }
 0x80e   :  { %v11158_v44 = vpack.c.bf16 %v7780_v29, %v7779_v48  ;;  %v7861_v11 = vrot.slane %v7767_v60, 6  ;;  %v7961_v60 = vld [vmem:[#allocation7 + $0x30] sm:$0xff] }
 0x80f   :  { %11363 = vrcp.f32 %v6867_v43  ;;  %v7859_v43 = vrot.slane %v7766_v18, 7 }
 0x810   :  { %v11360_v57 = vpop.eup %11359 }
 0x811   :  { %v6607_v22 = vmul.f32 %v11360_v57, %v6606_v58  ;;  %v12903_v58 = vpack.c.bf16 %v7371_v33, %v7370_v9  ;;  %v7612_v57 = vld [vmem:[#allocation11 + $0x48] sm:$0xff] }
 0x812   :  { %v7960_v9 = vld [vmem:[#allocation7 + $0x28] sm:$0xff] }
 0x813   :  { %v12845_v20 = vadd.f32 %v6608_v23, %v6607_v22  ;;  %v7963_v23 = vld [vmem:[#allocation8 + $0x20] sm:$0xff]  ;;  %v7964_v22 = vld [vmem:[#allocation8 + $0x28] sm:$0xff] }
 0x814   :  { %v11362_v52 = vpop.eup %11361 }
 0x815   :  { %v6611_v28 = vcombine.high %v12845_v20, %v12845_v20  ;;  %v6618_v38 = vrot.slane %v12845_v20, %v12004_v3  ;;  %10461 = vmatmul.mubr.msk.f32.vlgmr.msra.gmra.mrb[78].mxu0 %vm131_vm1, %v12845_v20  ;;  %v7029_v39 = vadd.f32 1.0, %v11362_v52 }
 0x816   :  { %11132 = vmatpush3.bf16.msra.mxu0 %v12843_v54  ;;  %10482 = vmatprep.mubr.msk.f32.mxu0 %vm11572_vm0, %v11573_v1 }
 0x817   :  { %v6625_v53 = vrot.slane %v6611_v28, %v12004_v3  ;;  %v6626_v62 = vcombine.high %v6618_v38, %v6618_v38  ;;  %v6634_v46 = vrot.slane %v6618_v38, %v12004_v3  ;;  %11133 = vmatprep.subr.bf16.mxu0 %v11571_v0  ;;  %11365 = vrcp.f32 %v7029_v39  ;;  %v7613_v39 = vld [vmem:[#allocation11 + $0x50] sm:$0xff] }
 0x818   :  { %v12913_v28 = vpack.c.bf16 %v7612_v57, %v7611_v25  ;;  %v11167_v38 = vpack.c.bf16 %v7964_v22, %v7963_v23  ;;  %v8203_v25 = vld [vmem:[#allocation8 + $0x48] sm:$0xff]  ;;  %v8204_v23 = vld [vmem:[#allocation8 + $0x50] sm:$0xff]  ;;  %v8205_v22 = vld [vmem:[#allocation8 + $0x58] sm:$0xff] }
 0x819   :  { %v11364_v13 = vpop.eup %11363  ;;  %v6627_v56 = vcombine.high %v6625_v53, %v6625_v53  ;;  %v6641_v27 = vrot.slane %v6625_v53, %v12004_v3  ;;  %v6648_v51 = vrot.slane %v6626_v62, %v12004_v3  ;;  %v6656_v10 = vcombine.high %v6634_v46, %v6634_v46  ;;  %6668 = vst.msk [vmem:[#allocation13 + $0x5] sm:$0x1] %vm1222_vm9, %v6634_v46  ;;  %v7769_v53 = vld [vmem:[#allocation2 + $0x27] sm:$0x1]  ;;  %v7614_v46 = vld [vmem:[#allocation11 + $0x58] sm:$0xff] }
 0x81a   :  { %v7194_v59 = vmul.f32 %v11364_v13, %v7191_v19  ;;  %11135 = vmatpush3.bf16.msra.mxu0 %v12859_v63  ;;  %v7863_v62 = vrot.slane %v7768_v41, 5  ;;  %v7865_v13 = vrot.slane %v7769_v53, 4  ;;  %v11188_v41 = vpack.c.bf16 %v8205_v22, %v8204_v23 }
 0x81b   :  { %v6655_v24 = vrot.slane %v6627_v56, %v12004_v3  ;;  %v6657_v17 = vcombine.high %v6641_v27, %v6641_v27  ;;  %v6658_v4 = vcombine.high %v6648_v51, %v6648_v51  ;;  %6669 = vst.msk [vmem:[#allocation13 + $0xd] sm:$0x1] %vm1222_vm9, %v6648_v51  ;;  %6670 = vst.msk [vmem:[#allocation13 + $0x15] sm:$0x1] %vm1222_vm9, %v6656_v10  ;;  %11142 = vmatprep.subr.bf16.mxu0 %v11571_v0  ;;  %v7773_v10 = vld [vmem:[#allocation7] sm:$0xff] }
 0x81c   :  { %6672 = vst.msk [vmem:[#allocation13 + $0x25] sm:$0x1] %vm1222_vm9, %v6641_v27  ;;  %v7195_v14 = vadd.f32 %v7194_v59, %v7110_v7  ;;  %v7770_v7 = vld [vmem:[#allocation2 + $0x2f] sm:$0x1]  ;;  %v12923_v56 = vpack.c.bf16 %v7614_v46, %v7613_v39  ;;  %v11170_v27 = vpack.c.bf16 %v7966_v21, %v7965_v6  ;;  %v7774_v59 = vld [vmem:[#allocation7 + $0x8] sm:$0xff] }
 0x81d   :  { %v6659_v31 = vcombine.high %v6655_v24, %v6655_v24  ;;  %6671 = vst.msk [vmem:[#allocation13 + $0x1d] sm:$0x1] %vm1222_vm9, %v6658_v4  ;;  %6673 = vst.msk [vmem:[#allocation13 + $0x2d] sm:$0x1] %vm1222_vm9, %v6655_v24  ;;  %10483 = vmatmul.mubr.msk.f32.vlgmr.msra.gmra.mrb[80].mxu0 %vm131_vm1, %v12845_v20  ;;  %v7771_v24 = vld [vmem:[#allocation2 + $0x37] sm:$0x1] }
 0x81e   :  { %6674 = vst.msk [vmem:[#allocation13 + $0x35] sm:$0x1] %vm1222_vm9, %v6657_v17  ;;  %11367 = vtanh.f32 %v7195_v14  ;;  %11144 = vmatpush3.bf16.msra.mxu0 %v12872_v40  ;;  %10504 = vmatprep.mubr.msk.f32.mxu0 %vm11572_vm0, %v11573_v1  ;;  %v7867_v17 = vrot.slane %v7770_v7, 3  ;;  %v8121_v4 = vld [vmem:[#allocation7 + $0x40] sm:$0xff]  ;;  %v11161_v14 = vpack.c.bf16 %v7774_v59, %v7773_v10  ;;  %v12978_v46 = vld [vmem:[%s13102_s7] ss:$0 sm:$0xff] }
 0x81f   :  { %6675 = vst.msk [vmem:[#allocation13 + $0x3d] sm:$0x1] %vm1222_vm9, %v6659_v31  ;;  %11145 = vmatprep.subr.bf16.mxu0 %v11571_v0  ;;  %v7775_v31 = vld [vmem:[#allocation7 + $0x10] sm:$0xff]  ;;  %v11179_v15 = vpack.c.bf16 %v8122_v5, %v8121_v4 }
 0x821   :  { %v11366_v30 = vpop.eup %11365 }
 0x822   :  { %11147 = vmatpush3.bf16.msra.mxu0 %v12885_v45  ;;  %v7197_v61 = vsub.f32 1.0, %v11366_v30  ;;  %v7199_v55 = vmul.f32 %v11366_v30, %v12744_v26  ;;  %v7765_v26 = vld [vmem:[#allocation2 + $0x7] sm:$0x1]  ;;  %v7776_v30 = vld [vmem:[#allocation7 + $0x18] sm:$0xff] }
 0x823   :  { %11154 = vmatprep.subr.bf16.mxu0 %v11571_v0  ;;  %v7860_v52 = vsel %vm214_vm2, %v7859_v43, %v7765_v26  ;;  %v7962_v43 = vld [vmem:[#allocation7 + $0x38] sm:$0xff] }
 0x824   :  { %v7862_v19 = vsel %vm217_vm3, %v7861_v11, %v7860_v52  ;;  %v11176_v26 = vpack.c.bf16 %v7962_v43, %v7961_v60  ;;  %v8297_v11 = vld [vmem:[#allocation11 + $0x18] sm:$0xff] }
 0x825   :  { %v7864_v51 = vsel %vm220_vm4, %v7863_v62, %v7862_v19 }
 0x826   :  { %v7866_v47 = vsel %vm223_vm5, %v7865_v13, %v7864_v51  ;;  %v12984_v51 = vld [vmem:[%s13102_s7 + $0x1] ss:$0 sm:$0xff] }
 0x827   :  { %v7868_v12 = vsel %vm226_vm6, %v7867_v17, %v7866_v47 }
 0x828   :  { %v11368_v37 = vpop.eup %11367 }
 0x829   :  { %v7198_v2 = vmul.f32 %v11368_v37, %v7197_v61  ;;  %v7869_v61 = vrot.slane %v7771_v24, 2  ;;  %v8124_v37 = vld [vmem:[#allocation7 + $0x58] sm:$0xff] }
 0x82a   :  { %v11182_v33 = vpack.c.bf16 %v8124_v37, %v8123_v16 }
 0x82b   :  { %v12896_v35 = vadd.f32 %v7199_v55, %v7198_v2  ;;  %v11164_v55 = vpack.c.bf16 %v7776_v30, %v7775_v31  ;;  %v7871_v2 = vrot.slane %v7772_v32, 1  ;;  %v7870_v18 = vsel %vm229_vm7, %v7869_v61, %v7868_v12  ;;  %v9086_v12 = vld [vmem:[%s13099_s4] ss:$0 sm:$0xff] }
 0x82d   :  { %10472 = vmatmul.mubr.msk.f32.vlgmr.msra.gmra.mrb[78].mxu1 %vm131_vm1, %v12896_v35  ;;  %10505 = vmatmul.mubr.msk.f32.vlgmr.msra.gmra.mrb[82].mxu0 %vm131_vm1, %v12896_v35  ;;  %v7872_v48 = vsel %vm232_vm8, %v7871_v2, %v7870_v18  ;;  %v12993_v18 = vld [vmem:[%s13102_s7 + $0x3] ss:$0 sm:$0xff] }
 0x82e   :  { %11138 = vmatpush3.bf16.msra.mxu1 %v12894_v42  ;;  %11156 = vmatpush3.bf16.msra.mxu0 %v11155_v36  ;;  %v7959_v36 = vld [vmem:[#allocation7 + $0x20] sm:$0xff] }
 0x82f   :  { %11139 = vmatprep.subr.bf16.mxu1 %v11571_v0  ;;  %11157 = vmatprep.subr.bf16.mxu0 %v11571_v0  ;;  %v11173_v29 = vpack.c.bf16 %v7960_v9, %v7959_v36 }
 0x830   :  { %10493 = vmatprep.mubr.msk.f32.mxu1 %vm11572_vm0, %v11573_v1  ;;  %10526 = vmatprep.mubr.msk.f32.mxu0 %vm11572_vm0, %v11573_v1 }
 0x832   :  { %11141 = vmatpush3.bf16.msra.mxu1 %v12903_v58  ;;  %11159 = vmatpush3.bf16.msra.mxu0 %v11158_v44  ;;  %v8202_v44 = vld [vmem:[#allocation8 + $0x40] sm:$0xff] }
 0x833   :  { %11148 = vmatprep.subr.bf16.mxu1 %v11571_v0  ;;  %11166 = vmatprep.subr.bf16.mxu0 %v11571_v0  ;;  %v11185_v57 = vpack.c.bf16 %v8203_v25, %v8202_v44 }
 0x835   :  { %10494 = vmatmul.mubr.msk.f32.vlgmr.msra.gmra.mrb[80].mxu1 %vm131_vm1, %v12896_v35  ;;  %10527 = vmatmul.mubr.msk.f32.vlgmr.msra.gmra.mrb[84].mxu0 %vm131_vm1, %v12896_v35 }
 0x836   :  { %11150 = vmatpush3.bf16.msra.mxu1 %v12913_v28  ;;  %11168 = vmatpush3.bf16.msra.mxu0 %v11167_v38 }
 0x837   :  { %11151 = vmatprep.subr.bf16.mxu1 %v11571_v0  ;;  %11169 = vmatprep.subr.bf16.mxu0 %v11571_v0 }
 0x838   :  { %10515 = vmatprep.mubr.msk.f32.mxu1 %vm11572_vm0, %v11573_v1  ;;  %10548 = vmatprep.mubr.msk.f32.mxu0 %vm11572_vm0, %v11573_v1 }
 0x83a   :  { %11153 = vmatpush3.bf16.msra.mxu1 %v12923_v56  ;;  %11171 = vmatpush3.bf16.msra.mxu0 %v11170_v27 }
 0x83b   :  { %11160 = vmatprep.subr.bf16.mxu1 %v11571_v0  ;;  %11178 = vmatprep.subr.bf16.mxu0 %v11571_v0 }
 0x83d   :  { %10516 = vmatmul.mubr.msk.f32.vlgmr.msra.gmra.mrb[82].mxu1 %vm131_vm1, %v12845_v20  ;;  %10549 = vmatmul.mubr.msk.f32.vlgmr.msra.gmra.mrb[86].mxu0 %vm131_vm1, %v12896_v35 }
 0x83e   :  { %11162 = vmatpush3.bf16.msra.mxu1 %v11161_v14  ;;  %10537 = vmatprep.mubr.msk.f32.mxu1 %vm11572_vm0, %v11573_v1 }
 0x83f   :  { %11163 = vmatprep.subr.bf16.mxu1 %v11571_v0  ;;  %11180 = vmatpush3.bf16.msra.mxu0 %v11179_v15 }
 0x840   :  { %11181 = vmatprep.subr.bf16.mxu0 %v11571_v0  ;;  %10570 = vmatprep.mubr.msk.f32.mxu0 %vm11572_vm0, %v11573_v1 }
 0x842   :  { %11165 = vmatpush3.bf16.msra.mxu1 %v11164_v55 }
 0x843   :  { %11172 = vmatprep.subr.bf16.mxu1 %v11571_v0  ;;  %11183 = vmatpush3.bf16.msra.mxu0 %v11182_v33 }
 0x844   :  { %11190 = vmatprep.subr.bf16.mxu0 %v11571_v0 }
 0x845   :  { %10538 = vmatmul.mubr.msk.f32.vlgmr.msra.gmra.mrb[84].mxu1 %vm131_vm1, %v7872_v48 }
 0x846   :  { %11174 = vmatpush3.bf16.msra.mxu1 %v11173_v29  ;;  %10559 = vmatprep.mubr.msk.f32.mxu1 %vm11572_vm0, %v11573_v1 }
 0x847   :  { %11175 = vmatprep.subr.bf16.mxu1 %v11571_v0  ;;  %10571 = vmatmul.mubr.msk.f32.vlgmr.msra.gmra.mrb[88].mxu0 %vm131_vm1, %v7872_v48 }
 0x848   :  { %11192 = vmatpush3.bf16.msra.mxu0 %v12822_v50  ;;  %10592 = vmatprep.mubr.msk.f32.mxu0 %vm11572_vm0, %v11573_v1  ;;  %v8296_v50 = vld [vmem:[#allocation11 + $0x10] sm:$0xff] }
 0x849   :  { %11193 = vmatprep.subr.bf16.mxu0 %v11571_v0  ;;  %v11194_v52 = vpack.c.bf16 %v8297_v11, %v8296_v50 }
 0x84a   :  { %11177 = vmatpush3.bf16.msra.mxu1 %v11176_v26 }
 0x84b   :  { %11184 = vmatprep.subr.bf16.mxu1 %v11571_v0 }
 0x84c   :  { %11195 = vmatpush3.bf16.msra.mxu0 %v11194_v52 }
 0x84d   :  { %10560 = vmatmul.mubr.msk.f32.vlgmr.msra.gmra.mrb[86].mxu1 %vm131_vm1, %v7872_v48  ;;  %11202 = vmatprep.subr.bf16.mxu0 %v11571_v0  ;;  %v12998_v48 = vld [vmem:[%s13102_s7 + $0x2] ss:$0 sm:$0xff] }
 0x84e   :  { %11186 = vmatpush3.bf16.msra.mxu1 %v11185_v57  ;;  %10581 = vmatprep.mubr.msk.f32.mxu1 %vm11572_vm0, %v11573_v1  ;;  %v9091_v57 = vld [vmem:[%s13099_s4 + $0x1] ss:$0 sm:$0xff] }
 0x84f   :  { %11187 = vmatprep.subr.bf16.mxu1 %v11571_v0 }
 0x852   :  { %11189 = vmatpush3.bf16.msra.mxu1 %v11188_v41 }
 0x853   :  { %11196 = vmatprep.subr.bf16.mxu1 %v11571_v0 }
 0x855   :  { %10582 = vmatmul.mubr.msk.f32.vlgmr.msra.gmra.mrb[88].mxu1 %vm131_vm1, %v12896_v35 }
 0x856   :  { %11198 = vmatpush3.bf16.msra.mxu1 %v12828_v34  ;;  %10603 = vmatprep.mubr.msk.f32.mxu1 %vm11572_vm0, %v11573_v1 }
 0x857   :  { %11199 = vmatprep.subr.bf16.mxu1 %v11571_v0 }
 0x85a   :  { %11201 = vmatpush3.bf16.msra.mxu1 %v12832_v8 }
 0x85b   :  { %11208 = vmatprep.subr.bf16.mxu1 %v11571_v0 }
 0x8e8   :  { %v7277_v38 = vpop.f32.mrb[78].mxu0 }
 0x8e9   :  { %v10462_v39 = vpop.f32.mrb[79].mxu0 }
 0x8f0   :  { %v7442_v53 = vpop.f32.mrb[80].mxu0 }
 0x8f1   :  { %v10484_v62 = vpop.f32.mrb[81].mxu0 }
 0x900   :  { %v7350_v34 = vpop.f32.mrb[78].mxu1  ;;  %v7607_v6 = vpop.f32.mrb[82].mxu0 }
 0x901   :  { %v7351_v8 = vadd.f32 %v7350_v34, %v7277_v38  ;;  %v10473_v21 = vpop.f32.mrb[79].mxu1  ;;  %v10506_v19 = vpop.f32.mrb[83].mxu0  ;;  %v7608_v26 = vadd.f32 %v12998_v48, %v7607_v6 }
 0x903   :  { %v7361_v7 = vadd.f32 %v12978_v46, %v7351_v8 }
 0x905   :  { %v9072_v13 = vmul.f32 -1.442695, %v7361_v7 }
 0x907   :  { %11369 = vpow2.f32 %v9072_v13  ;;  %v9097_v13 = vld [vmem:[%s13099_s4 + $0x3] ss:$0 sm:$0xff]  ;;  %s11575_s4 = smov [#allocation13]  }
 0x908   :  { %v7512_v27 = vpop.f32.mrb[80].mxu1  ;;  %v7847_v10 = vpop.f32.mrb[84].mxu0  ;;  %s8859_s3 = sshll.u32 %s11575_s4, 4  ;;  %s8860_s3 = int_to_ptr.vmem [resolvable:$true] %s8859_s3 }
 0x909   :  { %v7513_v59 = vadd.f32 %v7512_v27, %v7442_v53  ;;  %v10495_v24 = vpop.f32.mrb[81].mxu1  ;;  %v10528_v17 = vpop.f32.mrb[85].mxu0  ;;  %s11531_s30 = scalar_lea.vmem %s8860_s3, 1024  ;;  %p11536_p7 = scmp.lt.s32.totalorder %s8860_s3, %s8860_s3 }
 0x90a   :  { %p11532_p6 = scmp.ne.s32.totalorder %s8860_s3, %s11531_s30  ;;  %p11537_p8 = scmp.lt.s32.totalorder %s11531_s30, %s11531_s30 }
 0x90b   :  { %v7523_v4 = vadd.f32 %v12984_v51, %v7513_v59 }
 0x90c   :  { %p11538_p9 = por %p11537_p8, %p11536_p7 }
 0x90d   :  { %v9077_v5 = vmul.f32 -1.442695, %v7523_v4 }
 0x90e   :  { %p11539_p10 = pnand %p11538_p9, %p11532_p6 }
 0x90f   :  { %11371 = vpow2.f32 %v9077_v5 }
 0x910   :  { %v7688_v47 = vpop.f32.mrb[82].mxu1  ;;  %v8033_v14 = vpop.f32.mrb[86].mxu0 }
 0x911   :  { %v11370_v31 = vpop.eup %11369  ;;  %v10517_v30 = vpop.f32.mrb[83].mxu1  ;;  %v7689_v29 = vadd.f32 %v12993_v18, %v7688_v47 }
 0x912   :  { %v10550_v32 = vpop.f32.mrb[87].mxu0  ;;  %v7365_v61 = vadd.f32 1.0, %v11370_v31 }
 0x914   :  { %11373 = vrcp.f32 %v7365_v61 }
 0x918   :  { %v7941_v15 = vpop.f32.mrb[84].mxu1 }
 0x919   :  { %v11372_v16 = vpop.eup %11371  ;;  %v7942_v37 = vadd.f32 %v7941_v15, %v7847_v10  ;;  %v10539_v55 = vpop.f32.mrb[85].mxu1 }
 0x91a   :  { %v7527_v2 = vadd.f32 1.0, %v11372_v16  ;;  %v8198_v36 = vpop.f32.mrb[88].mxu0 }
 0x91b   :  { %v7952_v9 = vadd.f32 %v9086_v12, %v7942_v37  ;;  %v10572_v33 = vpop.f32.mrb[89].mxu0  ;;  %v8199_v5 = vadd.f32 %v12856_v49, %v8198_v36 }
 0x91c   :  { %11375 = vrcp.f32 %v7527_v2 }
 0x91d   :  { %v9087_v60 = vmul.f32 -1.442695, %v7952_v9 }
 0x91e   :  { %v11374_v43 = vpop.eup %11373 }
 0x91f   :  { %v7692_v44 = vmul.f32 %v11374_v43, %v7689_v29  ;;  %11377 = vpow2.f32 %v9087_v60 }
 0x920   :  { %v8103_v25 = vpop.f32.mrb[86].mxu1 }
 0x921   :  { %v7693_v23 = vadd.f32 %v7692_v44, %v7608_v26  ;;  %v8104_v22 = vadd.f32 %v8103_v25, %v8033_v14  ;;  %v10561_v41 = vpop.f32.mrb[87].mxu1 }
 0x923   :  { %11379 = vtanh.f32 %v7693_v23  ;;  %v8114_v50 = vadd.f32 %v9091_v57, %v8104_v22 }
 0x925   :  { %v9092_v11 = vmul.f32 -1.442695, %v8114_v50 }
 0x926   :  { %v11376_v52 = vpop.eup %11375 }
 0x927   :  { %11381 = vpow2.f32 %v9092_v11  ;;  %v7695_v34 = vsub.f32 1.0, %v11376_v52  ;;  %v7697_v8 = vmul.f32 %v11376_v52, %v12845_v20 }
 0x928   :  { %v8279_v38 = vpop.f32.mrb[88].mxu1 }
 0x929   :  { %v11378_v39 = vpop.eup %11377  ;;  %v10583_v53 = vpop.f32.mrb[89].mxu1  ;;  %v8280_v4 = vadd.f32 %v9097_v13, %v8279_v38 }
 0x92a   :  { %v7956_v62 = vadd.f32 1.0, %v11378_v39 }
 0x92c   :  { %11383 = vrcp.f32 %v7956_v62 }
 0x92d   :  { %v11380_v6 = vpop.eup %11379 }
 0x92e   :  { %v7696_v21 = vmul.f32 %v11380_v6, %v7695_v34 }
 0x930   :  { %v13006_v19 = vadd.f32 %v7697_v8, %v7696_v21 }
 0x931   :  { %v11382_v7 = vpop.eup %11381 }
 0x932   :  { %v7700_v27 = vcombine.high %v13006_v19, %v13006_v19  ;;  %v7707_v10 = vrot.slane %v13006_v19, %v12004_v3  ;;  %10593 = vmatmul.mubr.msk.f32.vlgmr.msra.gmra.mrb[90].mxu0 %vm131_vm1, %v13006_v19  ;;  %v8118_v59 = vadd.f32 1.0, %v11382_v7 }
 0x933   :  { %11204 = vmatpush3.bf16.msra.mxu0 %v12843_v54  ;;  %10614 = vmatprep.mubr.msk.f32.mxu0 %vm11572_vm0, %v11573_v1 }
 0x934   :  { %v7714_v20 = vrot.slane %v7700_v27, %v12004_v3  ;;  %v7715_v24 = vcombine.high %v7707_v10, %v7707_v10  ;;  %v7723_v17 = vrot.slane %v7707_v10, %v12004_v3  ;;  %11205 = vmatprep.subr.bf16.mxu0 %v11571_v0  ;;  %11385 = vrcp.f32 %v8118_v59 }
 0x936   :  { %v11384_v47 = vpop.eup %11383  ;;  %v7716_v14 = vcombine.high %v7714_v20, %v7714_v20  ;;  %v7730_v31 = vrot.slane %v7714_v20, %v12004_v3  ;;  %v7737_v30 = vrot.slane %v7715_v24, %v12004_v3  ;;  %v7745_v54 = vcombine.high %v7723_v17, %v7723_v17  ;;  %7757 = vst.msk [vmem:[#allocation13 + $0x6] sm:$0x1] %vm1222_vm9, %v7723_v17 }
 0x937   :  { %v8283_v32 = vmul.f32 %v11384_v47, %v8280_v4  ;;  %11207 = vmatpush3.bf16.msra.mxu0 %v12859_v63 }
 0x938   :  { %v7744_v61 = vrot.slane %v7716_v14, %v12004_v3  ;;  %v7746_v15 = vcombine.high %v7730_v31, %v7730_v31  ;;  %v7747_v12 = vcombine.high %v7737_v30, %v7737_v30  ;;  %7758 = vst.msk [vmem:[#allocation13 + $0xe] sm:$0x1] %vm1222_vm9, %v7737_v30  ;;  %7759 = vst.msk [vmem:[#allocation13 + $0x16] sm:$0x1] %vm1222_vm9, %v7745_v54  ;;  %11214 = vmatprep.subr.bf16.mxu0 %v11571_v0 }
 0x939   :  { %7761 = vst.msk [vmem:[#allocation13 + $0x26] sm:$0x1] %vm1222_vm9, %v7730_v31  ;;  %v8284_v49 = vadd.f32 %v8283_v32, %v8199_v5 }
 0x93a   :  { %v7748_v16 = vcombine.high %v7744_v61, %v7744_v61  ;;  %7760 = vst.msk [vmem:[#allocation13 + $0x1e] sm:$0x1] %vm1222_vm9, %v7747_v12  ;;  %7762 = vst.msk [vmem:[#allocation13 + $0x2e] sm:$0x1] %vm1222_vm9, %v7744_v61  ;;  %10615 = vmatmul.mubr.msk.f32.vlgmr.msra.gmra.mrb[92].mxu0 %vm131_vm1, %v13006_v19 }
 0x93b   :  { %7763 = vst.msk [vmem:[#allocation13 + $0x36] sm:$0x1] %vm1222_vm9, %v7746_v15  ;;  %11387 = vtanh.f32 %v8284_v49  ;;  %11216 = vmatpush3.bf16.msra.mxu0 %v12872_v40  ;;  %10636 = vmatprep.mubr.msk.f32.mxu0 %vm11572_vm0, %v11573_v1 }
 0x93c   :  { %7764 = vst.msk [vmem:[#allocation13 + $0x3e] sm:$0x1] %vm1222_vm9, %v7748_v16  ;;  %11217 = vmatprep.subr.bf16.mxu0 %v11571_v0 }
 0x93e   :  { %v11386_v63 = vpop.eup %11385 }
 0x93f   :  { %11219 = vmatpush3.bf16.msra.mxu0 %v12885_v45  ;;  %v8286_v37 = vsub.f32 1.0, %v11386_v63  ;;  %v8288_v36 = vmul.f32 %v11386_v63, %v12896_v35 }
 0x945   :  { %v11388_v55 = vpop.eup %11387 }
 0x946   :  { %v8287_v2 = vmul.f32 %v11388_v55, %v8286_v37 }
 0x948   :  { %v8289_v9 = vadd.f32 %v8288_v36, %v8287_v2 }
 0x94a   :  { %10604 = vmatmul.mubr.msk.f32.vlgmr.msra.gmra.mrb[90].mxu1 %vm131_vm1, %v8289_v9  ;;  %10637 = vmatmul.mubr.msk.f32.vlgmr.msra.gmra.mrb[94].mxu0 %vm131_vm1, %v8289_v9 }
 0x94b   :  { %11210 = vmatpush3.bf16.msra.mxu1 %v12894_v42  ;;  %10625 = vmatprep.mubr.msk.f32.mxu1 %vm11572_vm0, %v11573_v1 }
 0x94c   :  { %11211 = vmatprep.subr.bf16.mxu1 %v11571_v0 }
 0x94f   :  { %11213 = vmatpush3.bf16.msra.mxu1 %v12903_v58 }
 0x950   :  { %11220 = vmatprep.subr.bf16.mxu1 %v11571_v0 }
 0x952   :  { %10626 = vmatmul.mubr.msk.f32.vlgmr.msra.gmra.mrb[92].mxu1 %vm131_vm1, %v8289_v9 }
 0x953   :  { %11222 = vmatpush3.bf16.msra.mxu1 %v12913_v28  ;;  %10647 = vmatprep.mubr.msk.f32.mxu1 %vm11572_vm0, %v11573_v1 }
 0x954   :  { %11223 = vmatprep.subr.bf16.mxu1 %v11571_v0 }
 0x957   :  { %11225 = vmatpush3.bf16.msra.mxu1 %v12923_v56 }
 0x95a   :  { %10648 = vmatmul.mubr.msk.f32.vlgmr.msra.gmra.mrb[94].mxu1 %vm131_vm1, %v13006_v19 }
 0xa05   :  { %v8366_v40 = vpop.f32.mrb[90].mxu0 }
 0xa06   :  { %v10594_v45 = vpop.f32.mrb[91].mxu0 }
 0xa0d   :  { %v8531_v42 = vpop.f32.mrb[92].mxu0 }
 0xa0e   :  { %v10616_v35 = vpop.f32.mrb[93].mxu0 }
 0xa1d   :  { %v8439_v58 = vpop.f32.mrb[90].mxu1  ;;  %v8696_v33 = vpop.f32.mrb[94].mxu0 }
 0xa1e   :  { %v8440_v29 = vadd.f32 %v8439_v58, %v8366_v40  ;;  %v10605_v60 = vpop.f32.mrb[91].mxu1  ;;  %v10638_v43 = vpop.f32.mrb[95].mxu0 }
 0xa20   :  { %v8450_v28 = vadd.f32 %v12978_v46, %v8440_v29  ;;  %v8697_v46 = vadd.f32 %v12998_v48, %v8696_v33 }
 0xa22   :  { %v9102_v26 = vmul.f32 -1.442695, %v8450_v28 }
 0xa24   :  { %11389 = vpow2.f32 %v9102_v26 }
 0xa25   :  { %v8601_v1 = vpop.f32.mrb[92].mxu1 }
 0xa26   :  { %v8602_v0 = vadd.f32 %v8601_v1, %v8531_v42  ;;  %v10627_v44 = vpop.f32.mrb[93].mxu1 }
 0xa28   :  { %v8612_v56 = vadd.f32 %v12984_v51, %v8602_v0 }
 0xa2a   :  { %v9107_v25 = vmul.f32 -1.442695, %v8612_v56 }
 0xa2c   :  { %11391 = vpow2.f32 %v9107_v25 }
 0xa2d   :  { %v8777_v57 = vpop.f32.mrb[94].mxu1 }
 0xa2e   :  { %v11390_v23 = vpop.eup %11389  ;;  %v10649_v22 = vpop.f32.mrb[95].mxu1  ;;  %v8778_v52 = vadd.f32 %v12993_v18, %v8777_v57 }
 0xa2f   :  { %v8454_v41 = vadd.f32 1.0, %v11390_v23 }
 0xa31   :  { %11393 = vrcp.f32 %v8454_v41 }
 0xa36   :  { %v11392_v50 = vpop.eup %11391 }
 0xa37   :  { %v8616_v11 = vadd.f32 1.0, %v11392_v50 }
 0xa39   :  { %11395 = vrcp.f32 %v8616_v11 }
 0xa3b   :  { %v11394_v38 = vpop.eup %11393 }
 0xa3c   :  { %v8781_v39 = vmul.f32 %v11394_v38, %v8778_v52 }
 0xa3e   :  { %v8782_v53 = vadd.f32 %v8781_v39, %v8697_v46 }
 0xa40   :  { %11397 = vtanh.f32 %v8782_v53 }
 0xa43   :  { %v11396_v62 = vpop.eup %11395 }
 0xa44   :  { %v8784_v51 = vsub.f32 1.0, %v11396_v62  ;;  %v8786_v6 = vmul.f32 %v11396_v62, %v13006_v19 }
 0xa4a   :  { %v11398_v34 = vpop.eup %11397 }
 0xa4b   :  { %v8785_v8 = vmul.f32 %v11398_v34, %v8784_v51 }
 0xa4d   :  { %v8787_v21 = vadd.f32 %v8786_v6, %v8785_v8 }
 0xa4f   :  { %v8789_v7 = vcombine.high %v8787_v21, %v8787_v21  ;;  %v8796_v13 = vrot.slane %v8787_v21, %v12004_v3 }
 0xa51   :  { %v8803_v27 = vrot.slane %v8789_v7, %v12004_v3  ;;  %v8804_v18 = vcombine.high %v8796_v13, %v8796_v13  ;;  %v8812_v10 = vrot.slane %v8796_v13, %v12004_v3 }
 0xa53   :  { %v8805_v48 = vcombine.high %v8803_v27, %v8803_v27  ;;  %v8819_v59 = vrot.slane %v8803_v27, %v12004_v3  ;;  %v8826_v20 = vrot.slane %v8804_v18, %v12004_v3  ;;  %v8834_v24 = vcombine.high %v8812_v10, %v8812_v10  ;;  %8846 = vst.msk [vmem:[#allocation13 + $0x7] sm:$0x1] %vm1222_vm9, %v8812_v10 }
 0xa55   :  { %v8833_v19 = vrot.slane %v8805_v48, %v12004_v3  ;;  %v8835_v17 = vcombine.high %v8819_v59, %v8819_v59  ;;  %v8836_v4 = vcombine.high %v8826_v20, %v8826_v20  ;;  %8847 = vst.msk [vmem:[#allocation13 + $0xf] sm:$0x1] %vm1222_vm9, %v8826_v20  ;;  %8848 = vst.msk [vmem:[#allocation13 + $0x17] sm:$0x1] %vm1222_vm9, %v8834_v24 }
 0xa56   :  { %8850 = vst.msk [vmem:[#allocation13 + $0x27] sm:$0x1] %vm1222_vm9, %v8819_v59 }
 0xa57   :  { %v8837_v5 = vcombine.high %v8833_v19, %v8833_v19  ;;  %8849 = vst.msk [vmem:[#allocation13 + $0x1f] sm:$0x1] %vm1222_vm9, %v8836_v4  ;;  %8851 = vst.msk [vmem:[#allocation13 + $0x2f] sm:$0x1] %vm1222_vm9, %v8833_v19 }
 0xa58   :  { %8852 = vst.msk [vmem:[#allocation13 + $0x37] sm:$0x1] %vm1222_vm9, %v8835_v17 }
 0xa59   :  { %8853 = vst.msk [vmem:[#allocation13 + $0x3f] sm:$0x1] %vm1222_vm9, %v8837_v5 }
 0xa5a   :  { %11542 = shalt.err (!%p11539_p10)
}
 0xa5b   :  { %s11543_s22 = scalar_lea.hbm %s13103_s8, 1024 }
 0xa5c   :  { %p11544_p11 = scmp.ne.s32.totalorder %s13103_s8, %s11543_s22  ;;  %p11547_p12 = scmp.lt.u32.totalorder %s11543_s22, %s13103_s8 }
 0xa5e   :  { %p11549_p13 = pnand %p11547_p12, %p11544_p11 }
 0xa60   :  { %11552 = shalt.err (!%p11549_p13)
}
 0xa61   :  { %8865 = dma.vmem_to_hbm [thread:$0]  %s8860_s3, 1024, %s13103_s8, [#allocation4], %s11565_s17, %s11565_s17, %s11566_s18  }
 0xa62   :  { %11561 = dma.done.wait [#allocation4], 1024  }
 0xa63   :  { %11562 = vsyncadd [#allocation4], 4294966272 }
 0xa64   :  { %8869 = vsyncpa [#allocation3], 1 }
 0xa65   :  { %8870 = vsyncpa [#allocation6], 1 }
 0xa66   :  { %8871 = vsyncpa [#allocation9], 1 }
 0xa67   :  { %8872 = vsyncpa [#allocation12], 1 }
 0xa68   :  { %8873 = vsyncpa [#allocation4], 1 }

</bundles_post_ra>
